<compile_context>
chip_gen: v7x
topology: tpu7x:2x2x1
jax: 0.10.0
libtpu: 0.0.40
codegen_flags: <defaults>
</compile_context>

<pallas_src>
import functools

import jax
import jax.numpy as jnp
from jax import lax
from jax.experimental import pallas as pl
from jax.experimental.pallas import tpu as pltpu


_PARALLEL1 = pltpu.CompilerParams(dimension_semantics=("parallel",))


# ---------------------------------------------------------------------------
# Pallas kernels
# ---------------------------------------------------------------------------

def _dwconv_kernel(xp_ref, w_ref, b_ref, o_ref, *, K, H, W, residual):
    """Depthwise KxK conv + fused-BN bias (+ optional residual), NHWC layout.

    xp_ref: (H+2p, W+2p, C) spatially pre-padded input for one batch element.
    w_ref : (K*K, C) fused depthwise taps.   b_ref: (1, C) fused bias.
    o_ref : (H, W, C).
    """
    xp = xp_ref[...]
    w = w_ref[...]
    c = xp.shape[-1]
    acc = jnp.zeros((H, W, c), jnp.float32)
    for dh in range(K):
        for dw in range(K):
            idx = dh * K + dw
            tap = w[idx:idx + 1, :][None].astype(jnp.float32)          # (1, 1, C)
            acc = acc + xp[dh:dh + H, dw:dw + W, :].astype(jnp.float32) * tap
    acc = acc + b_ref[...][None].astype(jnp.float32)
    if residual:
        p = K // 2
        acc = acc + xp[p:p + H, p:p + W, :].astype(jnp.float32)
    o_ref[...] = acc.astype(o_ref.dtype)


def _pw_kernel(x_ref, w_ref, b_ref, o_ref):
    """Fused 1x1 Conv_BN:  out = x @ W + b  over a (tile, Cin) token block."""
    y = jnp.dot(x_ref[...], w_ref[...], preferred_element_type=jnp.float32)
    o_ref[...] = (y + b_ref[...]).astype(o_ref.dtype)


def _ffn_kernel(x_ref, w1_ref, b1_ref, w2_ref, b2_ref, o_ref):
    """Fused FFN + residual:  out = x + relu(x @ W1 + b1) @ W2 + b2."""
    x = x_ref[...]
    h = jnp.dot(x, w1_ref[...], preferred_element_type=jnp.float32) + b1_ref[...]
    h = jnp.maximum(h, 0.0).astype(x.dtype)
    y = jnp.dot(h, w2_ref[...], preferred_element_type=jnp.float32) + b2_ref[...]
    o_ref[...] = (x.astype(jnp.float32) + y).astype(o_ref.dtype)


def _relu_pw_residual_kernel(a_ref, res_ref, w_ref, b_ref, o_ref):
    """Mixer projection + residual:  out = res + relu(a) @ W + b."""
    a = jnp.maximum(a_ref[...], 0.0)
    y = jnp.dot(a, w_ref[...], preferred_element_type=jnp.float32) + b_ref[...]
    o_ref[...] = (res_ref[...].astype(jnp.float32) + y).astype(o_ref.dtype)


def _win_attn_kernel(q_ref, k_ref, v_ref, pos_ref, o_ref, *, scale):
    """All heads of one (batch, window):  softmax(q k^T * scale + pos) @ v.

    q_ref/k_ref: (nh, Ws, kd), v_ref: (nh, Ws, d), pos_ref: (nh, Ws, Ws).
    """
    nh = q_ref.shape[0]
    for h in range(nh):
        q = q_ref[h].astype(jnp.float32)                  # (Ws, kd)
        k = k_ref[h].astype(jnp.float32)                  # (Ws, kd)
        logits = jnp.dot(q, k.T, preferred_element_type=jnp.float32) * scale
        logits = logits + pos_ref[h].astype(jnp.float32)
        m = jnp.max(logits, axis=-1, keepdims=True)
        e = jnp.exp(logits - m)
        attn = e / jnp.sum(e, axis=-1, keepdims=True)
        o = jnp.dot(attn, v_ref[h].astype(jnp.float32),
                    preferred_element_type=jnp.float32)
        o_ref[h] = o.astype(o_ref.dtype)


# ---------------------------------------------------------------------------
# pallas_call wrappers
# ---------------------------------------------------------------------------

def _token_tile(T, cap=512):
    return min(T, cap)


def dwconv_bn_pallas(x_nhwc, wf, bf, *, residual):
    """x_nhwc (N,H,W,C); wf (C,K,K) fused depthwise weight; bf (C,) fused bias."""
    N, H, W, C = x_nhwc.shape
    K = wf.shape[-1]
    p = K // 2
    xp = jnp.pad(x_nhwc, ((0, 0), (p, p), (p, p), (0, 0)))
    w_kc = jnp.transpose(wf.reshape(C, K * K), (1, 0))              # (K*K, C)
    b_1c = bf.reshape(1, C)
    Hp, Wp = H + 2 * p, W + 2 * p
    kern = functools.partial(_dwconv_kernel, K=K, H=H, W=W, residual=residual)
    return pl.pallas_call(
        kern,
        out_shape=jax.ShapeDtypeStruct((N, H, W, C), x_nhwc.dtype),
        grid_spec=pltpu.PrefetchScalarGridSpec(
            num_scalar_prefetch=0,
            grid=(N,),
            in_specs=[
                pl.BlockSpec((None, Hp, Wp, C), lambda n: (n, 0, 0, 0)),
                pl.BlockSpec((K * K, C), lambda n: (0, 0)),
                pl.BlockSpec((1, C), lambda n: (0, 0)),
            ],
            out_specs=pl.BlockSpec((None, H, W, C), lambda n: (n, 0, 0, 0)),
        ),
        compiler_params=_PARALLEL1,
    )(xp, w_kc, b_1c)


def pw_conv_pallas(x2, wf, bf):
    """x2 (T, Cin); wf (Cout, Cin) fused 1x1 Conv_BN weight; bf (Cout,)."""
    T, Cin = x2.shape
    Cout = wf.shape[0]
    tile = _token_tile(T)
    cost = pl.CostEstimate(
        flops=2 * T * Cin * Cout, transcendentals=0,
        bytes_accessed=4 * (T * Cin + Cin * Cout + T * Cout + Cout))
    return pl.pallas_call(
        _pw_kernel,
        out_shape=jax.ShapeDtypeStruct((T, Cout), x2.dtype),
        grid_spec=pltpu.PrefetchScalarGridSpec(
            num_scalar_prefetch=0,
            grid=(pl.cdiv(T, tile),),
            in_specs=[
                pl.BlockSpec((tile, Cin), lambda i: (i, 0)),
                pl.BlockSpec((Cin, Cout), lambda i: (0, 0)),
                pl.BlockSpec((1, Cout), lambda i: (0, 0)),
            ],
            out_specs=pl.BlockSpec((tile, Cout), lambda i: (i, 0)),
        ),
        compiler_params=_PARALLEL1,
        cost_estimate=cost,
    )(x2, jnp.transpose(wf), bf.reshape(1, Cout))


def ffn_residual_pallas(x_nhwc, w1, b1, w2, b2):
    """Residual FFN: x + pw2(relu(pw1(x))).  w1 (Ch, C), w2 (C, Ch) fused."""
    N, H, W, C = x_nhwc.shape
    Ch = w1.shape[0]
    T = N * H * W
    x2 = x_nhwc.reshape(T, C)
    tile = _token_tile(T)
    cost = pl.CostEstimate(
        flops=4 * T * C * Ch, transcendentals=0,
        bytes_accessed=4 * (2 * T * C + 2 * C * Ch + C + Ch))
    out = pl.pallas_call(
        _ffn_kernel,
        out_shape=jax.ShapeDtypeStruct((T, C), x2.dtype),
        grid_spec=pltpu.PrefetchScalarGridSpec(
            num_scalar_prefetch=0,
            grid=(pl.cdiv(T, tile),),
            in_specs=[
                pl.BlockSpec((tile, C), lambda i: (i, 0)),
                pl.BlockSpec((C, Ch), lambda i: (0, 0)),
                pl.BlockSpec((1, Ch), lambda i: (0, 0)),
                pl.BlockSpec((Ch, C), lambda i: (0, 0)),
                pl.BlockSpec((1, C), lambda i: (0, 0)),
            ],
            out_specs=pl.BlockSpec((tile, C), lambda i: (i, 0)),
        ),
        compiler_params=_PARALLEL1,
        cost_estimate=cost,
    )(x2, jnp.transpose(w1), b1.reshape(1, Ch), jnp.transpose(w2), b2.reshape(1, C))
    return out.reshape(N, H, W, C)


def relu_pw_residual_pallas(a2, res2, wf, bf):
    """out = res + relu(a) @ W + b, token-tiled."""
    T, Cin = a2.shape
    Cout = wf.shape[0]
    tile = _token_tile(T)
    return pl.pallas_call(
        _relu_pw_residual_kernel,
        out_shape=jax.ShapeDtypeStruct((T, Cout), res2.dtype),
        grid_spec=pltpu.PrefetchScalarGridSpec(
            num_scalar_prefetch=0,
            grid=(pl.cdiv(T, tile),),
            in_specs=[
                pl.BlockSpec((tile, Cin), lambda i: (i, 0)),
                pl.BlockSpec((tile, Cout), lambda i: (i, 0)),
                pl.BlockSpec((Cin, Cout), lambda i: (0, 0)),
                pl.BlockSpec((1, Cout), lambda i: (0, 0)),
            ],
            out_specs=pl.BlockSpec((tile, Cout), lambda i: (i, 0)),
        ),
        compiler_params=_PARALLEL1,
    )(a2, res2, jnp.transpose(wf), bf.reshape(1, Cout))


def window_attention_pallas(qw, kw, vw, pos, scale):
    """qw,kw (G,nh,Ws,kd); vw (G,nh,Ws,d); pos (nh,Ws,Ws)  ->  (G,nh,Ws,d)."""
    G, nh, Ws, kd = qw.shape
    d = vw.shape[-1]
    kern = functools.partial(_win_attn_kernel, scale=scale)
    return pl.pallas_call(
        kern,
        out_shape=jax.ShapeDtypeStruct((G, nh, Ws, d), vw.dtype),
        grid_spec=pltpu.PrefetchScalarGridSpec(
            num_scalar_prefetch=0,
            grid=(G,),
            in_specs=[
                pl.BlockSpec((None, nh, Ws, kd), lambda g: (g, 0, 0, 0)),
                pl.BlockSpec((None, nh, Ws, kd), lambda g: (g, 0, 0, 0)),
                pl.BlockSpec((None, nh, Ws, d), lambda g: (g, 0, 0, 0)),
                pl.BlockSpec((nh, Ws, Ws), lambda g: (0, 0, 0)),
            ],
            out_specs=pl.BlockSpec((None, nh, Ws, d), lambda g: (g, 0, 0, 0)),
        ),
        compiler_params=_PARALLEL1,
    )(qw, kw, vw, pos)


# ---------------------------------------------------------------------------
# Block-level wrappers (layout plumbing only, all math is in Pallas kernels)
# ---------------------------------------------------------------------------

def local_window_attention_residual_pallas(x_nhwc, p, cfg):
    nh, kd, d, Wh = cfg["num_heads"], cfg["key_dim"], cfg["d"], cfg["window"]
    scale = cfg["scale"]
    N, H, W, C = x_nhwc.shape
    pad_h = (Wh - H % Wh) % Wh
    pad_w = (Wh - W % Wh) % Wh
    Hp, Wp = H + pad_h, W + pad_w
    xp = x_nhwc
    if pad_h or pad_w:
        xp = jnp.pad(x_nhwc, ((0, 0), (0, pad_h), (0, pad_w), (0, 0)))

    # qkv 1x1 Conv_BN
    qkv2 = pw_conv_pallas(xp.reshape(N * Hp * Wp, C), p["qkv_w"], p["qkv_b"])
    qkv = qkv2.reshape(N, Hp, Wp, nh, 2 * kd + d)
    q = qkv[..., :kd]
    k = qkv[..., kd:2 * kd]
    v = qkv[..., 2 * kd:]

    # per-head depthwise Conv_BN on q (fused across heads when kernel sizes match)
    ksizes = {int(wf.shape[-1]) for wf in p["dw_w"]}
    if len(ksizes) == 1:
        w_cat = jnp.concatenate(p["dw_w"], axis=0)         # (nh*kd, K, K)
        b_cat = jnp.concatenate(p["dw_b"], axis=0)
        q = dwconv_bn_pallas(q.reshape(N, Hp, Wp, nh * kd), w_cat, b_cat,
                             residual=False).reshape(N, Hp, Wp, nh, kd)
    else:
        q = jnp.stack(
            [dwconv_bn_pallas(q[..., i, :], p["dw_w"][i], p["dw_b"][i],
                              residual=False) for i in range(nh)],
            axis=3)

    # window partition
    nWh, nWw = Hp // Wh, Wp // Wh
    Ws = Wh * Wh
    G = N * nWh * nWw

    def part(t):
        ch = t.shape[-1]
        t = t.reshape(N, nWh, Wh, nWw, Wh, nh, ch)
        t = t.transpose(0, 1, 3, 5, 2, 4, 6)               # (N,nWh,nWw,nh,Wh,Ww,ch)
        return t.reshape(G, nh, Ws, ch)

    o = window_attention_pallas(part(q), part(k), part(v), p["pos"], scale)

    # un-partition to NHWC, channels head-major (matches torch's nh*d ordering)
    o = o.reshape(N, nWh, nWw, nh, Wh, Wh, d)
    o = o.transpose(0, 1, 4, 2, 5, 3, 6)                   # (N,nWh,Wh,nWw,Ww,nh,d)
    o = o.reshape(N, Hp, Wp, nh * d)
    if pad_h or pad_w:
        o = o[:, :H, :W, :]

    # proj (ReLU -> 1x1 Conv_BN) fused with the mixer residual
    T = N * H * W
    y = relu_pw_residual_pallas(o.reshape(T, nh * d), x_nhwc.reshape(T, C),
                                p["proj_w"], p["proj_b"])
    return y.reshape(N, H, W, C)


def efficientvit_block_pallas(x_nchw, P, cfg):
    x = jnp.transpose(x_nchw, (0, 2, 3, 1))                # NHWC internal layout
    x = dwconv_bn_pallas(x, P["dw0_w"], P["dw0_b"], residual=True)
    x = ffn_residual_pallas(x, P["ffn0_w1"], P["ffn0_b1"], P["ffn0_w2"], P["ffn0_b2"])
    x = local_window_attention_residual_pallas(x, P["lwa"], cfg)
    x = dwconv_bn_pallas(x, P["dw1_w"], P["dw1_b"], residual=True)
    x = ffn_residual_pallas(x, P["ffn1_w1"], P["ffn1_b1"], P["ffn1_w2"], P["ffn1_b2"])
    return jnp.transpose(x, (0, 3, 1, 2))


# ---------------------------------------------------------------------------
# Pure-JAX reference (faithful transcription of the PyTorch eval forward)
# ---------------------------------------------------------------------------

def _dw_conv_ref(x, wf, bf):
    C = x.shape[1]
    K = wf.shape[-1]
    p = K // 2
    y = lax.conv_general_dilated(
        x, wf[:, None, :, :], window_strides=(1, 1), padding=[(p, p), (p, p)],
        dimension_numbers=("NCHW", "OIHW", "NCHW"), feature_group_count=C)
    return y + bf[None, :, None, None]


def _pw_conv_ref(x, wf, bf):
    return jnp.einsum("nchw,oc->nohw", x, wf) + bf[None, :, None, None]


def _ffn_ref(x, w1, b1, w2, b2):
    h = jnp.maximum(_pw_conv_ref(x, w1, b1), 0.0)
    return _pw_conv_ref(h, w2, b2)


def _lwa_ref(x, p, cfg):
    nh, kd, d, Wh = cfg["num_heads"], cfg["key_dim"], cfg["d"], cfg["window"]
    scale = cfg["scale"]
    B, C, H, W = x.shape
    pad_h = (Wh - H % Wh) % Wh
    pad_w = (Wh - W % Wh) % Wh
    if pad_h or pad_w:
        x = jnp.pad(x, ((0, 0), (0, 0), (0, pad_h), (0, pad_w)))
    Hp, Wp = H + pad_h, W + pad_w
    qkv = _pw_conv_ref(x, p["qkv_w"], p["qkv_b"]).reshape(B, nh, 2 * kd + d, Hp, Wp)
    q, k, v = qkv[:, :, :kd], qkv[:, :, kd:2 * kd], qkv[:, :, 2 * kd:]
    q = jnp.stack([_dw_conv_ref(q[:, i], p["dw_w"][i], p["dw_b"][i])
                   for i in range(nh)], axis=1)
    nWh, nWw = Hp // Wh, Wp // Wh
    Ws = Wh * Wh

    def part(t):
        ch = t.shape[2]
        t = t.reshape(B, nh, ch, nWh, Wh, nWw, Wh).transpose(0, 1, 3, 5, 2, 4, 6)
        t = t.reshape(B, nh, nWh, nWw, ch, Ws)
        return t.transpose(0, 1, 2, 3, 5, 4)

    qw, kw, vw = part(q), part(k), part(v)
    attn = jnp.einsum("bhxyqc,bhxykc->bhxyqk", qw, kw) * scale
    attn = attn + p["pos"][None, :, None, None, :, :]
    attn = jax.nn.softmax(attn, axis=-1)
    o = jnp.einsum("bhxyqk,bhxykc->bhxyqc", attn, vw)
    o = o.reshape(B, nh, nWh, nWw, Wh, Wh, d)
    o = o.transpose(0, 1, 6, 2, 4, 3, 5).reshape(B, nh * d, Hp, Wp)
    if pad_h or pad_w:
        o = o[:, :, :H, :W]
    return _pw_conv_ref(jnp.maximum(o, 0.0), p["proj_w"], p["proj_b"])


def efficientvit_block_ref(x, P, cfg):
    x = x + _dw_conv_ref(x, P["dw0_w"], P["dw0_b"])
    x = x + _ffn_ref(x, P["ffn0_w1"], P["ffn0_b1"], P["ffn0_w2"], P["ffn0_b2"])
    x = x + _lwa_ref(x, P["lwa"], cfg)
    x = x + _dw_conv_ref(x, P["dw1_w"], P["dw1_b"])
    x = x + _ffn_ref(x, P["ffn1_w1"], P["ffn1_b1"], P["ffn1_w2"], P["ffn1_b2"])
    return x


# ---------------------------------------------------------------------------
# Parameter construction (random conv weights + random BN stats, BN folded in)
# ---------------------------------------------------------------------------

def _rand_bn(key, c):
    k1, k2, k3, k4 = jax.random.split(key, 4)
    gamma = 1.0 + 0.1 * jax.random.normal(k1, (c,), jnp.float32)
    beta = 0.1 * jax.random.normal(k2, (c,), jnp.float32)
    mean = 0.1 * jax.random.normal(k3, (c,), jnp.float32)
    var = jax.random.uniform(k4, (c,), jnp.float32, 0.5, 1.5)
    return gamma, beta, mean, var


def _fuse_bn(w, gamma, beta, mean, var, eps=1e-5):
    s = gamma / jnp.sqrt(var + eps)
    wf = w * (s[:, None] if w.ndim == 2 else s[:, None, None])
    bf = beta - mean * s
    return wf, bf


def _make_pw(key, cin, cout, wscale=0.2):
    kw, kb = jax.random.split(key)
    w = wscale * jax.random.normal(kw, (cout, cin), jnp.float32)
    return _fuse_bn(w, *_rand_bn(kb, cout))


def _make_dw(key, c, k, wscale=0.3):
    kw, kb = jax.random.split(key)
    w = wscale * jax.random.normal(kw, (c, k, k), jnp.float32)
    return _fuse_bn(w, *_rand_bn(kb, c))


if __name__ == "__main__":
    # Small EfficientViTBlock config using the LocalWindowAttention mixer path.
    dim, key_dim, num_heads, attn_ratio = 32, 4, 2, 2
    resolution, window_resolution = 8, 4
    kernels = [3, 3]
    N = 2
    d = int(attn_ratio * key_dim)
    hidden = int(dim * 2)
    Ws = window_resolution * window_resolution
    cfg = dict(num_heads=num_heads, key_dim=key_dim, d=d,
               window=window_resolution, scale=key_dim ** -0.5)

    key = jax.random.PRNGKey(0)
    keys = jax.random.split(key, 16)
    x = jax.random.normal(keys[0], (N, dim, resolution, resolution), jnp.float32)

    dw0_w, dw0_b = _make_dw(keys[1], dim, 3)
    ffn0_w1, ffn0_b1 = _make_pw(keys[2], dim, hidden)
    ffn0_w2, ffn0_b2 = _make_pw(keys[3], hidden, dim)
    dw1_w, dw1_b = _make_dw(keys[4], dim, 3)
    ffn1_w1, ffn1_b1 = _make_pw(keys[5], dim, hidden)
    ffn1_w2, ffn1_b2 = _make_pw(keys[6], hidden, dim)

    qkv_w, qkv_b = _make_pw(keys[7], dim, num_heads * (2 * key_dim + d))
    dw_w, dw_b = [], []
    for i in range(num_heads):
        wfi, bfi = _make_dw(keys[8 + i], key_dim, kernels[i])
        dw_w.append(wfi)
        dw_b.append(bfi)
    proj_w, proj_b = _make_pw(keys[12], num_heads * d, dim)
    pos = 0.1 * jax.random.normal(keys[13], (num_heads, Ws, Ws), jnp.float32)

    P = dict(
        dw0_w=dw0_w, dw0_b=dw0_b,
        ffn0_w1=ffn0_w1, ffn0_b1=ffn0_b1, ffn0_w2=ffn0_w2, ffn0_b2=ffn0_b2,
        dw1_w=dw1_w, dw1_b=dw1_b,
        ffn1_w1=ffn1_w1, ffn1_b1=ffn1_b1, ffn1_w2=ffn1_w2, ffn1_b2=ffn1_b2,
        lwa=dict(qkv_w=qkv_w, qkv_b=qkv_b, dw_w=dw_w, dw_b=dw_b,
                 pos=pos, proj_w=proj_w, proj_b=proj_b),
    )

    fwd = jax.jit(lambda xx, pp: efficientvit_block_pallas(xx, pp, cfg))
    out = jax.block_until_ready(fwd(x, P))

    with jax.default_matmul_precision("highest"):
        ref = jax.block_until_ready(efficientvit_block_ref(x, P, cfg))

    assert out.shape == x.shape
    err = float(jnp.max(jnp.abs(out - ref)))
    assert jnp.allclose(out, ref, atol=2e-2, rtol=2e-2), f"mismatch vs reference, max abs err {err}"

    print("KERNEL_OK")
</pallas_src>

<mosaic_0001>
module attributes {stable_mosaic.version = 11 : i64} {
  func.func @_dwconv_kernel(%arg0: i32, %arg1: memref<1x10x10x32xf32, #tpu.memory_space<vmem>>, %arg2: memref<9x32xf32, #tpu.memory_space<vmem>>, %arg3: memref<1x32xf32, #tpu.memory_space<vmem>>, %arg4: memref<1x8x8x32xf32, #tpu.memory_space<vmem>>) attributes {dimension_semantics = [#tpu.dimension_semantics<parallel>], iteration_bounds = array<i64: 2>, scalar_prefetch = 0 : i64, scratch_operands = 0 : i64, tpu.core_type = #tpu.core_type<tc>, window_params = [{transform_indices = @transform_0, window_bounds = array<i64: 1, 10, 10, 32>}, {pipeline_mode = #tpu.pipeline_mode<synchronous>, transform_indices = @transform_1, window_bounds = array<i64: 9, 32>}, {pipeline_mode = #tpu.pipeline_mode<synchronous>, transform_indices = @transform_2, window_bounds = array<i64: 1, 32>}, {transform_indices = @transform_3, window_bounds = array<i64: 1, 8, 8, 32>}]} {
    %c0 = arith.constant 0 : index
    %c0_0 = arith.constant 0 : index
    %c0_1 = arith.constant 0 : index
    %c0_2 = arith.constant 0 : index
    %0 = vector.load %arg1[%c0, %c0_0, %c0_1, %c0_2] : memref<1x10x10x32xf32, #tpu.memory_space<vmem>>, vector<1x10x10x32xf32>
    %1 = vector.shape_cast %0 : vector<1x10x10x32xf32> to vector<10x10x32xf32>
    %c0_3 = arith.constant 0 : index
    %c0_4 = arith.constant 0 : index
    %2 = vector.load %arg2[%c0_3, %c0_4] : memref<9x32xf32, #tpu.memory_space<vmem>>, vector<9x32xf32>
    %cst = arith.constant 0.000000e+00 : f32
    %3 = vector.broadcast %cst : f32 to vector<8x8x32xf32>
    %4 = vector.extract_strided_slice %2 {offsets = [0, 0], sizes = [1, 32], strides = [1, 1]} : vector<9x32xf32> to vector<1x32xf32>
    %5 = vector.shape_cast %4 : vector<1x32xf32> to vector<1x1x32xf32>
    %6 = vector.extract_strided_slice %1 {offsets = [0, 0, 0], sizes = [8, 8, 32], strides = [1, 1, 1]} : vector<10x10x32xf32> to vector<8x8x32xf32>
    %7 = vector.broadcast %5 : vector<1x1x32xf32> to vector<8x8x32xf32>
    %8 = arith.mulf %6, %7 : vector<8x8x32xf32>
    %9 = arith.addf %3, %8 : vector<8x8x32xf32>
    %10 = vector.extract_strided_slice %2 {offsets = [1, 0], sizes = [1, 32], strides = [1, 1]} : vector<9x32xf32> to vector<1x32xf32>
    %11 = vector.shape_cast %10 : vector<1x32xf32> to vector<1x1x32xf32>
    %12 = vector.extract_strided_slice %1 {offsets = [0, 1, 0], sizes = [8, 8, 32], strides = [1, 1, 1]} : vector<10x10x32xf32> to vector<8x8x32xf32>
    %13 = vector.broadcast %11 : vector<1x1x32xf32> to vector<8x8x32xf32>
    %14 = arith.mulf %12, %13 : vector<8x8x32xf32>
    %15 = arith.addf %9, %14 : vector<8x8x32xf32>
    %16 = vector.extract_strided_slice %2 {offsets = [2, 0], sizes = [1, 32], strides = [1, 1]} : vector<9x32xf32> to vector<1x32xf32>
    %17 = vector.shape_cast %16 : vector<1x32xf32> to vector<1x1x32xf32>
    %18 = vector.extract_strided_slice %1 {offsets = [0, 2, 0], sizes = [8, 8, 32], strides = [1, 1, 1]} : vector<10x10x32xf32> to vector<8x8x32xf32>
    %19 = vector.broadcast %17 : vector<1x1x32xf32> to vector<8x8x32xf32>
    %20 = arith.mulf %18, %19 : vector<8x8x32xf32>
    %21 = arith.addf %15, %20 : vector<8x8x32xf32>
    %22 = vector.extract_strided_slice %2 {offsets = [3, 0], sizes = [1, 32], strides = [1, 1]} : vector<9x32xf32> to vector<1x32xf32>
    %23 = vector.shape_cast %22 : vector<1x32xf32> to vector<1x1x32xf32>
    %24 = vector.extract_strided_slice %1 {offsets = [1, 0, 0], sizes = [8, 8, 32], strides = [1, 1, 1]} : vector<10x10x32xf32> to vector<8x8x32xf32>
    %25 = vector.broadcast %23 : vector<1x1x32xf32> to vector<8x8x32xf32>
    %26 = arith.mulf %24, %25 : vector<8x8x32xf32>
    %27 = arith.addf %21, %26 : vector<8x8x32xf32>
    %28 = vector.extract_strided_slice %2 {offsets = [4, 0], sizes = [1, 32], strides = [1, 1]} : vector<9x32xf32> to vector<1x32xf32>
    %29 = vector.shape_cast %28 : vector<1x32xf32> to vector<1x1x32xf32>
    %30 = vector.extract_strided_slice %1 {offsets = [1, 1, 0], sizes = [8, 8, 32], strides = [1, 1, 1]} : vector<10x10x32xf32> to vector<8x8x32xf32>
    %31 = vector.broadcast %29 : vector<1x1x32xf32> to vector<8x8x32xf32>
    %32 = arith.mulf %30, %31 : vector<8x8x32xf32>
    %33 = arith.addf %27, %32 : vector<8x8x32xf32>
    %34 = vector.extract_strided_slice %2 {offsets = [5, 0], sizes = [1, 32], strides = [1, 1]} : vector<9x32xf32> to vector<1x32xf32>
    %35 = vector.shape_cast %34 : vector<1x32xf32> to vector<1x1x32xf32>
    %36 = vector.extract_strided_slice %1 {offsets = [1, 2, 0], sizes = [8, 8, 32], strides = [1, 1, 1]} : vector<10x10x32xf32> to vector<8x8x32xf32>
    %37 = vector.broadcast %35 : vector<1x1x32xf32> to vector<8x8x32xf32>
    %38 = arith.mulf %36, %37 : vector<8x8x32xf32>
    %39 = arith.addf %33, %38 : vector<8x8x32xf32>
    %40 = vector.extract_strided_slice %2 {offsets = [6, 0], sizes = [1, 32], strides = [1, 1]} : vector<9x32xf32> to vector<1x32xf32>
    %41 = vector.shape_cast %40 : vector<1x32xf32> to vector<1x1x32xf32>
    %42 = vector.extract_strided_slice %1 {offsets = [2, 0, 0], sizes = [8, 8, 32], strides = [1, 1, 1]} : vector<10x10x32xf32> to vector<8x8x32xf32>
    %43 = vector.broadcast %41 : vector<1x1x32xf32> to vector<8x8x32xf32>
    %44 = arith.mulf %42, %43 : vector<8x8x32xf32>
    %45 = arith.addf %39, %44 : vector<8x8x32xf32>
    %46 = vector.extract_strided_slice %2 {offsets = [7, 0], sizes = [1, 32], strides = [1, 1]} : vector<9x32xf32> to vector<1x32xf32>
    %47 = vector.shape_cast %46 : vector<1x32xf32> to vector<1x1x32xf32>
    %48 = vector.extract_strided_slice %1 {offsets = [2, 1, 0], sizes = [8, 8, 32], strides = [1, 1, 1]} : vector<10x10x32xf32> to vector<8x8x32xf32>
    %49 = vector.broadcast %47 : vector<1x1x32xf32> to vector<8x8x32xf32>
    %50 = arith.mulf %48, %49 : vector<8x8x32xf32>
    %51 = arith.addf %45, %50 : vector<8x8x32xf32>
    %52 = vector.extract_strided_slice %2 {offsets = [8, 0], sizes = [1, 32], strides = [1, 1]} : vector<9x32xf32> to vector<1x32xf32>
    %53 = vector.shape_cast %52 : vector<1x32xf32> to vector<1x1x32xf32>
    %54 = vector.extract_strided_slice %1 {offsets = [2, 2, 0], sizes = [8, 8, 32], strides = [1, 1, 1]} : vector<10x10x32xf32> to vector<8x8x32xf32>
    %55 = vector.broadcast %53 : vector<1x1x32xf32> to vector<8x8x32xf32>
    %56 = arith.mulf %54, %55 : vector<8x8x32xf32>
    %57 = arith.addf %51, %56 : vector<8x8x32xf32>
    %c0_5 = arith.constant 0 : index
    %c0_6 = arith.constant 0 : index
    %58 = vector.load %arg3[%c0_5, %c0_6] : memref<1x32xf32, #tpu.memory_space<vmem>>, vector<1x32xf32>
    %59 = vector.shape_cast %58 : vector<1x32xf32> to vector<1x1x32xf32>
    %60 = vector.broadcast %59 : vector<1x1x32xf32> to vector<8x8x32xf32>
    %61 = arith.addf %57, %60 : vector<8x8x32xf32>
    %62 = vector.extract_strided_slice %1 {offsets = [1, 1, 0], sizes = [8, 8, 32], strides = [1, 1, 1]} : vector<10x10x32xf32> to vector<8x8x32xf32>
    %63 = arith.addf %61, %62 : vector<8x8x32xf32>
    %c0_7 = arith.constant 0 : index
    %c0_8 = arith.constant 0 : index
    %c0_9 = arith.constant 0 : index
    %c0_10 = arith.constant 0 : index
    %64 = vector.load %arg4[%c0_7, %c0_8, %c0_9, %c0_10] : memref<1x8x8x32xf32, #tpu.memory_space<vmem>>, vector<1x8x8x32xf32>
    %65 = vector.shape_cast %64 : vector<1x8x8x32xf32> to vector<8x8x32xf32>
    %66 = vector.shape_cast %63 : vector<8x8x32xf32> to vector<1x8x8x32xf32>
    tpu.vector_store %arg4[%c0_7, %c0_8, %c0_9, %c0_10], %66 {strides = array<i32>} : memref<1x8x8x32xf32, #tpu.memory_space<vmem>>, vector<1x8x8x32xf32>,
    return
  }
  func.func @transform_0(%arg0: i32) -> (i32, i32, i32, i32) {
    %c0_i32 = arith.constant 0 : i32
    %c0_i32_0 = arith.constant 0 : i32
    %c0_i32_1 = arith.constant 0 : i32
    %c0_i32_2 = arith.constant 0 : i32
    return %arg0, %c0_i32, %c0_i32_0, %c0_i32_1 : i32, i32, i32, i32
  }
  func.func @transform_1(%arg0: i32) -> (i32, i32) {
    %c0_i32 = arith.constant 0 : i32
    %c0_i32_0 = arith.constant 0 : i32
    %c0_i32_1 = arith.constant 0 : i32
    return %c0_i32, %c0_i32_0 : i32, i32
  }
  func.func @transform_2(%arg0: i32) -> (i32, i32) {
    %c0_i32 = arith.constant 0 : i32
    %c0_i32_0 = arith.constant 0 : i32
    %c0_i32_1 = arith.constant 0 : i32
    return %c0_i32, %c0_i32_0 : i32, i32
  }
  func.func @transform_3(%arg0: i32) -> (i32, i32, i32, i32) {
    %c0_i32 = arith.constant 0 : i32
    %c0_i32_0 = arith.constant 0 : i32
    %c0_i32_1 = arith.constant 0 : i32
    %c0_i32_2 = arith.constant 0 : i32
    return %arg0, %c0_i32, %c0_i32_0, %c0_i32_1 : i32, i32, i32, i32
  }
}

module attributes {stable_mosaic.version = 11 : i64} {
  func.func @_pw_kernel(%arg0: i32, %arg1: memref<128x32xf32, #tpu.memory_space<vmem>>, %arg2: memref<32x32xf32, #tpu.memory_space<vmem>>, %arg3: memref<1x32xf32, #tpu.memory_space<vmem>>, %arg4: memref<128x32xf32, #tpu.memory_space<vmem>>) attributes {dimension_semantics = [#tpu.dimension_semantics<parallel>], iteration_bounds = array<i64: 1>, scalar_prefetch = 0 : i64, scratch_operands = 0 : i64, tpu.core_type = #tpu.core_type<tc>, window_params = [{transform_indices = @transform_0, window_bounds = array<i64: 128, 32>}, {pipeline_mode = #tpu.pipeline_mode<synchronous>, transform_indices = @transform_1, window_bounds = array<i64: 32, 32>}, {pipeline_mode = #tpu.pipeline_mode<synchronous>, transform_indices = @transform_2, window_bounds = array<i64: 1, 32>}, {transform_indices = @transform_3, window_bounds = array<i64: 128, 32>}]} {
    %c0 = arith.constant 0 : index
    %c0_0 = arith.constant 0 : index
    %0 = vector.load %arg1[%c0, %c0_0] : memref<128x32xf32, #tpu.memory_space<vmem>>, vector<128x32xf32>
    %c0_1 = arith.constant 0 : index
    %c0_2 = arith.constant 0 : index
    %1 = vector.load %arg2[%c0_1, %c0_2] : memref<32x32xf32, #tpu.memory_space<vmem>>, vector<32x32xf32>
    %cst = arith.constant dense<0.000000e+00> : vector<128x32xf32>
    %2 = tpu.matmul %0, %1, %cst {dimension_numbers = #tpu.dot_dimension_numbers<[1], [0], [0], [1], [0, 0, 1, 1], [], []>} : vector<128x32xf32>, vector<32x32xf32>, vector<128x32xf32> -> vector<128x32xf32>
    %c0_3 = arith.constant 0 : index
    %c0_4 = arith.constant 0 : index
    %3 = vector.load %arg3[%c0_3, %c0_4] : memref<1x32xf32, #tpu.memory_space<vmem>>, vector<1x32xf32>
    %4 = vector.broadcast %3 : vector<1x32xf32> to vector<128x32xf32>
    %5 = arith.addf %2, %4 : vector<128x32xf32>
    %c0_5 = arith.constant 0 : index
    %c0_6 = arith.constant 0 : index
    %6 = vector.load %arg4[%c0_5, %c0_6] : memref<128x32xf32, #tpu.memory_space<vmem>>, vector<128x32xf32>
    tpu.vector_store %arg4[%c0_5, %c0_6], %5 {strides = array<i32>} : memref<128x32xf32, #tpu.memory_space<vmem>>, vector<128x32xf32>,
    return
  }
  func.func @transform_0(%arg0: i32) -> (i32, i32) {
    %c0_i32 = arith.constant 0 : i32
    %c0_i32_0 = arith.constant 0 : i32
    return %arg0, %c0_i32 : i32, i32
  }
  func.func @transform_1(%arg0: i32) -> (i32, i32) {
    %c0_i32 = arith.constant 0 : i32
    %c0_i32_0 = arith.constant 0 : i32
    %c0_i32_1 = arith.constant 0 : i32
    return %c0_i32, %c0_i32_0 : i32, i32
  }
  func.func @transform_2(%arg0: i32) -> (i32, i32) {
    %c0_i32 = arith.constant 0 : i32
    %c0_i32_0 = arith.constant 0 : i32
    %c0_i32_1 = arith.constant 0 : i32
    return %c0_i32, %c0_i32_0 : i32, i32
  }
  func.func @transform_3(%arg0: i32) -> (i32, i32) {
    %c0_i32 = arith.constant 0 : i32
    %c0_i32_0 = arith.constant 0 : i32
    return %arg0, %c0_i32 : i32, i32
  }
}

module attributes {stable_mosaic.version = 11 : i64} {
  func.func @_ffn_kernel(%arg0: i32, %arg1: memref<128x32xf32, #tpu.memory_space<vmem>>, %arg2: memref<32x64xf32, #tpu.memory_space<vmem>>, %arg3: memref<1x64xf32, #tpu.memory_space<vmem>>, %arg4: memref<64x32xf32, #tpu.memory_space<vmem>>, %arg5: memref<1x32xf32, #tpu.memory_space<vmem>>, %arg6: memref<128x32xf32, #tpu.memory_space<vmem>>) attributes {dimension_semantics = [#tpu.dimension_semantics<parallel>], iteration_bounds = array<i64: 1>, scalar_prefetch = 0 : i64, scratch_operands = 0 : i64, tpu.core_type = #tpu.core_type<tc>, window_params = [{transform_indices = @transform_0, window_bounds = array<i64: 128, 32>}, {pipeline_mode = #tpu.pipeline_mode<synchronous>, transform_indices = @transform_1, window_bounds = array<i64: 32, 64>}, {pipeline_mode = #tpu.pipeline_mode<synchronous>, transform_indices = @transform_2, window_bounds = array<i64: 1, 64>}, {pipeline_mode = #tpu.pipeline_mode<synchronous>, transform_indices = @transform_3, window_bounds = array<i64: 64, 32>}, {pipeline_mode = #tpu.pipeline_mode<synchronous>, transform_indices = @transform_4, window_bounds = array<i64: 1, 32>}, {transform_indices = @transform_5, window_bounds = array<i64: 128, 32>}]} {
    %c0 = arith.constant 0 : index
    %c0_0 = arith.constant 0 : index
    %0 = vector.load %arg1[%c0, %c0_0] : memref<128x32xf32, #tpu.memory_space<vmem>>, vector<128x32xf32>
    %c0_1 = arith.constant 0 : index
    %c0_2 = arith.constant 0 : index
    %1 = vector.load %arg2[%c0_1, %c0_2] : memref<32x64xf32, #tpu.memory_space<vmem>>, vector<32x64xf32>
    %cst = arith.constant dense<0.000000e+00> : vector<128x64xf32>
    %2 = tpu.matmul %0, %1, %cst {dimension_numbers = #tpu.dot_dimension_numbers<[1], [0], [0], [1], [0, 0, 1, 1], [], []>} : vector<128x32xf32>, vector<32x64xf32>, vector<128x64xf32> -> vector<128x64xf32>
    %c0_3 = arith.constant 0 : index
    %c0_4 = arith.constant 0 : index
    %3 = vector.load %arg3[%c0_3, %c0_4] : memref<1x64xf32, #tpu.memory_space<vmem>>, vector<1x64xf32>
    %4 = vector.broadcast %3 : vector<1x64xf32> to vector<128x64xf32>
    %5 = arith.addf %2, %4 : vector<128x64xf32>
    %cst_5 = arith.constant 0.000000e+00 : f32
    %6 = vector.broadcast %cst_5 : f32 to vector<128x64xf32>
    %7 = arith.maximumf %5, %6 : vector<128x64xf32>
    %c0_6 = arith.constant 0 : index
    %c0_7 = arith.constant 0 : index
    %8 = vector.load %arg4[%c0_6, %c0_7] : memref<64x32xf32, #tpu.memory_space<vmem>>, vector<64x32xf32>
    %cst_8 = arith.constant dense<0.000000e+00> : vector<128x32xf32>
    %9 = tpu.matmul %7, %8, %cst_8 {dimension_numbers = #tpu.dot_dimension_numbers<[1], [0], [0], [1], [0, 0, 1, 1], [], []>} : vector<128x64xf32>, vector<64x32xf32>, vector<128x32xf32> -> vector<128x32xf32>
    %c0_9 = arith.constant 0 : index
    %c0_10 = arith.constant 0 : index
    %10 = vector.load %arg5[%c0_9, %c0_10] : memref<1x32xf32, #tpu.memory_space<vmem>>, vector<1x32xf32>
    %11 = vector.broadcast %10 : vector<1x32xf32> to vector<128x32xf32>
    %12 = arith.addf %9, %11 : vector<128x32xf32>
    %13 = arith.addf %0, %12 : vector<128x32xf32>
    %c0_11 = arith.constant 0 : index
    %c0_12 = arith.constant 0 : index
    %14 = vector.load %arg6[%c0_11, %c0_12] : memref<128x32xf32, #tpu.memory_space<vmem>>, vector<128x32xf32>
    tpu.vector_store %arg6[%c0_11, %c0_12], %13 {strides = array<i32>} : memref<128x32xf32, #tpu.memory_space<vmem>>, vector<128x32xf32>,
    return
  }
  func.func @transform_0(%arg0: i32) -> (i32, i32) {
    %c0_i32 = arith.constant 0 : i32
    %c0_i32_0 = arith.constant 0 : i32
    return %arg0, %c0_i32 : i32, i32
  }
  func.func @transform_1(%arg0: i32) -> (i32, i32) {
    %c0_i32 = arith.constant 0 : i32
    %c0_i32_0 = arith.constant 0 : i32
    %c0_i32_1 = arith.constant 0 : i32
    return %c0_i32, %c0_i32_0 : i32, i32
  }
  func.func @transform_2(%arg0: i32) -> (i32, i32) {
    %c0_i32 = arith.constant 0 : i32
    %c0_i32_0 = arith.constant 0 : i32
    %c0_i32_1 = arith.constant 0 : i32
    return %c0_i32, %c0_i32_0 : i32, i32
  }
  func.func @transform_3(%arg0: i32) -> (i32, i32) {
    %c0_i32 = arith.constant 0 : i32
    %c0_i32_0 = arith.constant 0 : i32
    %c0_i32_1 = arith.constant 0 : i32
    return %c0_i32, %c0_i32_0 : i32, i32
  }
  func.func @transform_4(%arg0: i32) -> (i32, i32) {
    %c0_i32 = arith.constant 0 : i32
    %c0_i32_0 = arith.constant 0 : i32
    %c0_i32_1 = arith.constant 0 : i32
    return %c0_i32, %c0_i32_0 : i32, i32
  }
  func.func @transform_5(%arg0: i32) -> (i32, i32) {
    %c0_i32 = arith.constant 0 : i32
    %c0_i32_0 = arith.constant 0 : i32
    return %arg0, %c0_i32 : i32, i32
  }
}

module attributes {stable_mosaic.version = 11 : i64} {
  func.func @_dwconv_kernel(%arg0: i32, %arg1: memref<1x10x10x8xf32, #tpu.memory_space<vmem>>, %arg2: memref<9x8xf32, #tpu.memory_space<vmem>>, %arg3: memref<1x8xf32, #tpu.memory_space<vmem>>, %arg4: memref<1x8x8x8xf32, #tpu.memory_space<vmem>>) attributes {dimension_semantics = [#tpu.dimension_semantics<parallel>], iteration_bounds = array<i64: 2>, scalar_prefetch = 0 : i64, scratch_operands = 0 : i64, tpu.core_type = #tpu.core_type<tc>, window_params = [{transform_indices = @transform_0, window_bounds = array<i64: 1, 10, 10, 8>}, {pipeline_mode = #tpu.pipeline_mode<synchronous>, transform_indices = @transform_1, window_bounds = array<i64: 9, 8>}, {pipeline_mode = #tpu.pipeline_mode<synchronous>, transform_indices = @transform_2, window_bounds = array<i64: 1, 8>}, {transform_indices = @transform_3, window_bounds = array<i64: 1, 8, 8, 8>}]} {
    %c0 = arith.constant 0 : index
    %c0_0 = arith.constant 0 : index
    %c0_1 = arith.constant 0 : index
    %c0_2 = arith.constant 0 : index
    %0 = vector.load %arg1[%c0, %c0_0, %c0_1, %c0_2] : memref<1x10x10x8xf32, #tpu.memory_space<vmem>>, vector<1x10x10x8xf32>
    %1 = vector.shape_cast %0 : vector<1x10x10x8xf32> to vector<10x10x8xf32>
    %c0_3 = arith.constant 0 : index
    %c0_4 = arith.constant 0 : index
    %2 = vector.load %arg2[%c0_3, %c0_4] : memref<9x8xf32, #tpu.memory_space<vmem>>, vector<9x8xf32>
    %cst = arith.constant 0.000000e+00 : f32
    %3 = vector.broadcast %cst : f32 to vector<8x8x8xf32>
    %4 = vector.extract_strided_slice %2 {offsets = [0, 0], sizes = [1, 8], strides = [1, 1]} : vector<9x8xf32> to vector<1x8xf32>
    %5 = vector.shape_cast %4 : vector<1x8xf32> to vector<1x1x8xf32>
    %6 = vector.extract_strided_slice %1 {offsets = [0, 0, 0], sizes = [8, 8, 8], strides = [1, 1, 1]} : vector<10x10x8xf32> to vector<8x8x8xf32>
    %7 = vector.broadcast %5 : vector<1x1x8xf32> to vector<8x8x8xf32>
    %8 = arith.mulf %6, %7 : vector<8x8x8xf32>
    %9 = arith.addf %3, %8 : vector<8x8x8xf32>
    %10 = vector.extract_strided_slice %2 {offsets = [1, 0], sizes = [1, 8], strides = [1, 1]} : vector<9x8xf32> to vector<1x8xf32>
    %11 = vector.shape_cast %10 : vector<1x8xf32> to vector<1x1x8xf32>
    %12 = vector.extract_strided_slice %1 {offsets = [0, 1, 0], sizes = [8, 8, 8], strides = [1, 1, 1]} : vector<10x10x8xf32> to vector<8x8x8xf32>
    %13 = vector.broadcast %11 : vector<1x1x8xf32> to vector<8x8x8xf32>
    %14 = arith.mulf %12, %13 : vector<8x8x8xf32>
    %15 = arith.addf %9, %14 : vector<8x8x8xf32>
    %16 = vector.extract_strided_slice %2 {offsets = [2, 0], sizes = [1, 8], strides = [1, 1]} : vector<9x8xf32> to vector<1x8xf32>
    %17 = vector.shape_cast %16 : vector<1x8xf32> to vector<1x1x8xf32>
    %18 = vector.extract_strided_slice %1 {offsets = [0, 2, 0], sizes = [8, 8, 8], strides = [1, 1, 1]} : vector<10x10x8xf32> to vector<8x8x8xf32>
    %19 = vector.broadcast %17 : vector<1x1x8xf32> to vector<8x8x8xf32>
    %20 = arith.mulf %18, %19 : vector<8x8x8xf32>
    %21 = arith.addf %15, %20 : vector<8x8x8xf32>
    %22 = vector.extract_strided_slice %2 {offsets = [3, 0], sizes = [1, 8], strides = [1, 1]} : vector<9x8xf32> to vector<1x8xf32>
    %23 = vector.shape_cast %22 : vector<1x8xf32> to vector<1x1x8xf32>
    %24 = vector.extract_strided_slice %1 {offsets = [1, 0, 0], sizes = [8, 8, 8], strides = [1, 1, 1]} : vector<10x10x8xf32> to vector<8x8x8xf32>
    %25 = vector.broadcast %23 : vector<1x1x8xf32> to vector<8x8x8xf32>
    %26 = arith.mulf %24, %25 : vector<8x8x8xf32>
    %27 = arith.addf %21, %26 : vector<8x8x8xf32>
    %28 = vector.extract_strided_slice %2 {offsets = [4, 0], sizes = [1, 8], strides = [1, 1]} : vector<9x8xf32> to vector<1x8xf32>
    %29 = vector.shape_cast %28 : vector<1x8xf32> to vector<1x1x8xf32>
    %30 = vector.extract_strided_slice %1 {offsets = [1, 1, 0], sizes = [8, 8, 8], strides = [1, 1, 1]} : vector<10x10x8xf32> to vector<8x8x8xf32>
    %31 = vector.broadcast %29 : vector<1x1x8xf32> to vector<8x8x8xf32>
    %32 = arith.mulf %30, %31 : vector<8x8x8xf32>
    %33 = arith.addf %27, %32 : vector<8x8x8xf32>
    %34 = vector.extract_strided_slice %2 {offsets = [5, 0], sizes = [1, 8], strides = [1, 1]} : vector<9x8xf32> to vector<1x8xf32>
    %35 = vector.shape_cast %34 : vector<1x8xf32> to vector<1x1x8xf32>
    %36 = vector.extract_strided_slice %1 {offsets = [1, 2, 0], sizes = [8, 8, 8], strides = [1, 1, 1]} : vector<10x10x8xf32> to vector<8x8x8xf32>
    %37 = vector.broadcast %35 : vector<1x1x8xf32> to vector<8x8x8xf32>
    %38 = arith.mulf %36, %37 : vector<8x8x8xf32>
    %39 = arith.addf %33, %38 : vector<8x8x8xf32>
    %40 = vector.extract_strided_slice %2 {offsets = [6, 0], sizes = [1, 8], strides = [1, 1]} : vector<9x8xf32> to vector<1x8xf32>
    %41 = vector.shape_cast %40 : vector<1x8xf32> to vector<1x1x8xf32>
    %42 = vector.extract_strided_slice %1 {offsets = [2, 0, 0], sizes = [8, 8, 8], strides = [1, 1, 1]} : vector<10x10x8xf32> to vector<8x8x8xf32>
    %43 = vector.broadcast %41 : vector<1x1x8xf32> to vector<8x8x8xf32>
    %44 = arith.mulf %42, %43 : vector<8x8x8xf32>
    %45 = arith.addf %39, %44 : vector<8x8x8xf32>
    %46 = vector.extract_strided_slice %2 {offsets = [7, 0], sizes = [1, 8], strides = [1, 1]} : vector<9x8xf32> to vector<1x8xf32>
    %47 = vector.shape_cast %46 : vector<1x8xf32> to vector<1x1x8xf32>
    %48 = vector.extract_strided_slice %1 {offsets = [2, 1, 0], sizes = [8, 8, 8], strides = [1, 1, 1]} : vector<10x10x8xf32> to vector<8x8x8xf32>
    %49 = vector.broadcast %47 : vector<1x1x8xf32> to vector<8x8x8xf32>
    %50 = arith.mulf %48, %49 : vector<8x8x8xf32>
    %51 = arith.addf %45, %50 : vector<8x8x8xf32>
    %52 = vector.extract_strided_slice %2 {offsets = [8, 0], sizes = [1, 8], strides = [1, 1]} : vector<9x8xf32> to vector<1x8xf32>
    %53 = vector.shape_cast %52 : vector<1x8xf32> to vector<1x1x8xf32>
    %54 = vector.extract_strided_slice %1 {offsets = [2, 2, 0], sizes = [8, 8, 8], strides = [1, 1, 1]} : vector<10x10x8xf32> to vector<8x8x8xf32>
    %55 = vector.broadcast %53 : vector<1x1x8xf32> to vector<8x8x8xf32>
    %56 = arith.mulf %54, %55 : vector<8x8x8xf32>
    %57 = arith.addf %51, %56 : vector<8x8x8xf32>
    %c0_5 = arith.constant 0 : index
    %c0_6 = arith.constant 0 : index
    %58 = vector.load %arg3[%c0_5, %c0_6] : memref<1x8xf32, #tpu.memory_space<vmem>>, vector<1x8xf32>
    %59 = vector.shape_cast %58 : vector<1x8xf32> to vector<1x1x8xf32>
    %60 = vector.broadcast %59 : vector<1x1x8xf32> to vector<8x8x8xf32>
    %61 = arith.addf %57, %60 : vector<8x8x8xf32>
    %c0_7 = arith.constant 0 : index
    %c0_8 = arith.constant 0 : index
    %c0_9 = arith.constant 0 : index
    %c0_10 = arith.constant 0 : index
    %62 = vector.load %arg4[%c0_7, %c0_8, %c0_9, %c0_10] : memref<1x8x8x8xf32, #tpu.memory_space<vmem>>, vector<1x8x8x8xf32>
    %63 = vector.shape_cast %62 : vector<1x8x8x8xf32> to vector<8x8x8xf32>
    %64 = vector.shape_cast %61 : vector<8x8x8xf32> to vector<1x8x8x8xf32>
    tpu.vector_store %arg4[%c0_7, %c0_8, %c0_9, %c0_10], %64 {strides = array<i32>} : memref<1x8x8x8xf32, #tpu.memory_space<vmem>>, vector<1x8x8x8xf32>,
    return
  }
  func.func @transform_0(%arg0: i32) -> (i32, i32, i32, i32) {
    %c0_i32 = arith.constant 0 : i32
    %c0_i32_0 = arith.constant 0 : i32
    %c0_i32_1 = arith.constant 0 : i32
    %c0_i32_2 = arith.constant 0 : i32
    return %arg0, %c0_i32, %c0_i32_0, %c0_i32_1 : i32, i32, i32, i32
  }
  func.func @transform_1(%arg0: i32) -> (i32, i32) {
    %c0_i32 = arith.constant 0 : i32
    %c0_i32_0 = arith.constant 0 : i32
    %c0_i32_1 = arith.constant 0 : i32
    return %c0_i32, %c0_i32_0 : i32, i32
  }
  func.func @transform_2(%arg0: i32) -> (i32, i32) {
    %c0_i32 = arith.constant 0 : i32
    %c0_i32_0 = arith.constant 0 : i32
    %c0_i32_1 = arith.constant 0 : i32
    return %c0_i32, %c0_i32_0 : i32, i32
  }
  func.func @transform_3(%arg0: i32) -> (i32, i32, i32, i32) {
    %c0_i32 = arith.constant 0 : i32
    %c0_i32_0 = arith.constant 0 : i32
    %c0_i32_1 = arith.constant 0 : i32
    %c0_i32_2 = arith.constant 0 : i32
    return %arg0, %c0_i32, %c0_i32_0, %c0_i32_1 : i32, i32, i32, i32
  }
}

module attributes {stable_mosaic.version = 11 : i64} {
  func.func @_win_attn_kernel(%arg0: i32, %arg1: memref<1x2x16x4xf32, #tpu.memory_space<vmem>>, %arg2: memref<1x2x16x4xf32, #tpu.memory_space<vmem>>, %arg3: memref<1x2x16x8xf32, #tpu.memory_space<vmem>>, %arg4: memref<2x16x16xf32, #tpu.memory_space<vmem>>, %arg5: memref<1x2x16x8xf32, #tpu.memory_space<vmem>>) attributes {dimension_semantics = [#tpu.dimension_semantics<parallel>], iteration_bounds = array<i64: 8>, scalar_prefetch = 0 : i64, scratch_operands = 0 : i64, tpu.core_type = #tpu.core_type<tc>, window_params = [{transform_indices = @transform_0, window_bounds = array<i64: 1, 2, 16, 4>}, {transform_indices = @transform_1, window_bounds = array<i64: 1, 2, 16, 4>}, {transform_indices = @transform_2, window_bounds = array<i64: 1, 2, 16, 8>}, {pipeline_mode = #tpu.pipeline_mode<synchronous>, transform_indices = @transform_3, window_bounds = array<i64: 2, 16, 16>}, {transform_indices = @transform_4, window_bounds = array<i64: 1, 2, 16, 8>}]} {
    %c0 = arith.constant 0 : index
    %c0_0 = arith.constant 0 : index
    %c0_1 = arith.constant 0 : index
    %c0_2 = arith.constant 0 : index
    %0 = vector.load %arg1[%c0, %c0_0, %c0_1, %c0_2] : memref<1x2x16x4xf32, #tpu.memory_space<vmem>>, vector<1x1x16x4xf32>
    %1 = vector.shape_cast %0 : vector<1x1x16x4xf32> to vector<16x4xf32>
    %c0_3 = arith.constant 0 : index
    %c0_4 = arith.constant 0 : index
    %c0_5 = arith.constant 0 : index
    %c0_6 = arith.constant 0 : index
    %2 = vector.load %arg2[%c0_3, %c0_4, %c0_5, %c0_6] : memref<1x2x16x4xf32, #tpu.memory_space<vmem>>, vector<1x1x16x4xf32>
    %3 = vector.shape_cast %2 : vector<1x1x16x4xf32> to vector<16x4xf32>
    %4 = tpu.transpose %3, [1, 0] : vector<16x4xf32> -> vector<4x16xf32>
    %cst = arith.constant dense<0.000000e+00> : vector<16x16xf32>
    %5 = tpu.matmul %1, %4, %cst {dimension_numbers = #tpu.dot_dimension_numbers<[1], [0], [0], [1], [0, 0, 1, 1], [], []>} : vector<16x4xf32>, vector<4x16xf32>, vector<16x16xf32> -> vector<16x16xf32>
    %cst_7 = arith.constant 5.000000e-01 : f32
    %6 = vector.broadcast %cst_7 : f32 to vector<16x16xf32>
    %7 = arith.mulf %5, %6 : vector<16x16xf32>
    %c0_8 = arith.constant 0 : index
    %c0_9 = arith.constant 0 : index
    %c0_10 = arith.constant 0 : index
    %8 = vector.load %arg4[%c0_8, %c0_9, %c0_10] : memref<2x16x16xf32, #tpu.memory_space<vmem>>, vector<1x16x16xf32>
    %9 = vector.shape_cast %8 : vector<1x16x16xf32> to vector<16x16xf32>
    %10 = arith.addf %7, %9 : vector<16x16xf32>
    %cst_11 = arith.constant dense<0xFF800000> : vector<16xf32>
    %11 = vector.multi_reduction <maximumf>, %10, %cst_11 [1] : vector<16x16xf32> to vector<16xf32>
    %12 = vector.shape_cast %11 : vector<16xf32> to vector<16x1xf32>
    %13 = vector.broadcast %12 : vector<16x1xf32> to vector<16x16xf32>
    %14 = arith.subf %10, %13 : vector<16x16xf32>
    %15 = math.exp %14 : vector<16x16xf32>
    %cst_12 = arith.constant dense<0.000000e+00> : vector<16xf32>
    %16 = vector.multi_reduction <add>, %15, %cst_12 [1] : vector<16x16xf32> to vector<16xf32>
    %17 = vector.shape_cast %16 : vector<16xf32> to vector<16x1xf32>
    %18 = vector.broadcast %17 : vector<16x1xf32> to vector<16x16xf32>
    %19 = arith.divf %15, %18 : vector<16x16xf32>
    %c0_13 = arith.constant 0 : index
    %c0_14 = arith.constant 0 : index
    %c0_15 = arith.constant 0 : index
    %c0_16 = arith.constant 0 : index
    %20 = vector.load %arg3[%c0_13, %c0_14, %c0_15, %c0_16] : memref<1x2x16x8xf32, #tpu.memory_space<vmem>>, vector<1x1x16x8xf32>
    %21 = vector.shape_cast %20 : vector<1x1x16x8xf32> to vector<16x8xf32>
    %cst_17 = arith.constant dense<0.000000e+00> : vector<16x8xf32>
    %22 = tpu.matmul %19, %21, %cst_17 {dimension_numbers = #tpu.dot_dimension_numbers<[1], [0], [0], [1], [0, 0, 1, 1], [], []>} : vector<16x16xf32>, vector<16x8xf32>, vector<16x8xf32> -> vector<16x8xf32>
    %c0_18 = arith.constant 0 : index
    %c0_19 = arith.constant 0 : index
    %c0_20 = arith.constant 0 : index
    %c0_21 = arith.constant 0 : index
    %23 = vector.load %arg5[%c0_18, %c0_19, %c0_20, %c0_21] : memref<1x2x16x8xf32, #tpu.memory_space<vmem>>, vector<1x1x16x8xf32>
    %24 = vector.shape_cast %23 : vector<1x1x16x8xf32> to vector<16x8xf32>
    %25 = vector.shape_cast %22 : vector<16x8xf32> to vector<1x1x16x8xf32>
    tpu.vector_store %arg5[%c0_18, %c0_19, %c0_20, %c0_21], %25 {strides = array<i32>} : memref<1x2x16x8xf32, #tpu.memory_space<vmem>>, vector<1x1x16x8xf32>,
    %c0_22 = arith.constant 0 : index
    %c1 = arith.constant 1 : index
    %c0_23 = arith.constant 0 : index
    %c0_24 = arith.constant 0 : index
    %26 = vector.load %arg1[%c0_22, %c1, %c0_23, %c0_24] : memref<1x2x16x4xf32, #tpu.memory_space<vmem>>, vector<1x1x16x4xf32>
    %27 = vector.shape_cast %26 : vector<1x1x16x4xf32> to vector<16x4xf32>
    %c0_25 = arith.constant 0 : index
    %c1_26 = arith.constant 1 : index
    %c0_27 = arith.constant 0 : index
    %c0_28 = arith.constant 0 : index
    %28 = vector.load %arg2[%c0_25, %c1_26, %c0_27, %c0_28] : memref<1x2x16x4xf32, #tpu.memory_space<vmem>>, vector<1x1x16x4xf32>
    %29 = vector.shape_cast %28 : vector<1x1x16x4xf32> to vector<16x4xf32>
    %30 = tpu.transpose %29, [1, 0] : vector<16x4xf32> -> vector<4x16xf32>
    %cst_29 = arith.constant dense<0.000000e+00> : vector<16x16xf32>
    %31 = tpu.matmul %27, %30, %cst_29 {dimension_numbers = #tpu.dot_dimension_numbers<[1], [0], [0], [1], [0, 0, 1, 1], [], []>} : vector<16x4xf32>, vector<4x16xf32>, vector<16x16xf32> -> vector<16x16xf32>
    %cst_30 = arith.constant 5.000000e-01 : f32
    %32 = vector.broadcast %cst_30 : f32 to vector<16x16xf32>
    %33 = arith.mulf %31, %32 : vector<16x16xf32>
    %c1_31 = arith.constant 1 : index
    %c0_32 = arith.constant 0 : index
    %c0_33 = arith.constant 0 : index
    %34 = vector.load %arg4[%c1_31, %c0_32, %c0_33] : memref<2x16x16xf32, #tpu.memory_space<vmem>>, vector<1x16x16xf32>
    %35 = vector.shape_cast %34 : vector<1x16x16xf32> to vector<16x16xf32>
    %36 = arith.addf %33, %35 : vector<16x16xf32>
    %cst_34 = arith.constant dense<0xFF800000> : vector<16xf32>
    %37 = vector.multi_reduction <maximumf>, %36, %cst_34 [1] : vector<16x16xf32> to vector<16xf32>
    %38 = vector.shape_cast %37 : vector<16xf32> to vector<16x1xf32>
    %39 = vector.broadcast %38 : vector<16x1xf32> to vector<16x16xf32>
    %40 = arith.subf %36, %39 : vector<16x16xf32>
    %41 = math.exp %40 : vector<16x16xf32>
    %cst_35 = arith.constant dense<0.000000e+00> : vector<16xf32>
    %42 = vector.multi_reduction <add>, %41, %cst_35 [1] : vector<16x16xf32> to vector<16xf32>
    %43 = vector.shape_cast %42 : vector<16xf32> to vector<16x1xf32>
    %44 = vector.broadcast %43 : vector<16x1xf32> to vector<16x16xf32>
    %45 = arith.divf %41, %44 : vector<16x16xf32>
    %c0_36 = arith.constant 0 : index
    %c1_37 = arith.constant 1 : index
    %c0_38 = arith.constant 0 : index
    %c0_39 = arith.constant 0 : index
    %46 = vector.load %arg3[%c0_36, %c1_37, %c0_38, %c0_39] : memref<1x2x16x8xf32, #tpu.memory_space<vmem>>, vector<1x1x16x8xf32>
    %47 = vector.shape_cast %46 : vector<1x1x16x8xf32> to vector<16x8xf32>
    %cst_40 = arith.constant dense<0.000000e+00> : vector<16x8xf32>
    %48 = tpu.matmul %45, %47, %cst_40 {dimension_numbers = #tpu.dot_dimension_numbers<[1], [0], [0], [1], [0, 0, 1, 1], [], []>} : vector<16x16xf32>, vector<16x8xf32>, vector<16x8xf32> -> vector<16x8xf32>
    %c0_41 = arith.constant 0 : index
    %c1_42 = arith.constant 1 : index
    %c0_43 = arith.constant 0 : index
    %c0_44 = arith.constant 0 : index
    %49 = vector.load %arg5[%c0_41, %c1_42, %c0_43, %c0_44] : memref<1x2x16x8xf32, #tpu.memory_space<vmem>>, vector<1x1x16x8xf32>
    %50 = vector.shape_cast %49 : vector<1x1x16x8xf32> to vector<16x8xf32>
    %51 = vector.shape_cast %48 : vector<16x8xf32> to vector<1x1x16x8xf32>
    tpu.vector_store %arg5[%c0_41, %c1_42, %c0_43, %c0_44], %51 {strides = array<i32>} : memref<1x2x16x8xf32, #tpu.memory_space<vmem>>, vector<1x1x16x8xf32>,
    return
  }
  func.func @transform_0(%arg0: i32) -> (i32, i32, i32, i32) {
    %c0_i32 = arith.constant 0 : i32
    %c0_i32_0 = arith.constant 0 : i32
    %c0_i32_1 = arith.constant 0 : i32
    %c0_i32_2 = arith.constant 0 : i32
    return %arg0, %c0_i32, %c0_i32_0, %c0_i32_1 : i32, i32, i32, i32
  }
  func.func @transform_1(%arg0: i32) -> (i32, i32, i32, i32) {
    %c0_i32 = arith.constant 0 : i32
    %c0_i32_0 = arith.constant 0 : i32
    %c0_i32_1 = arith.constant 0 : i32
    %c0_i32_2 = arith.constant 0 : i32
    return %arg0, %c0_i32, %c0_i32_0, %c0_i32_1 : i32, i32, i32, i32
  }
  func.func @transform_2(%arg0: i32) -> (i32, i32, i32, i32) {
    %c0_i32 = arith.constant 0 : i32
    %c0_i32_0 = arith.constant 0 : i32
    %c0_i32_1 = arith.constant 0 : i32
    %c0_i32_2 = arith.constant 0 : i32
    return %arg0, %c0_i32, %c0_i32_0, %c0_i32_1 : i32, i32, i32, i32
  }
  func.func @transform_3(%arg0: i32) -> (i32, i32, i32) {
    %c0_i32 = arith.constant 0 : i32
    %c0_i32_0 = arith.constant 0 : i32
    %c0_i32_1 = arith.constant 0 : i32
    %c0_i32_2 = arith.constant 0 : i32
    return %c0_i32, %c0_i32_0, %c0_i32_1 : i32, i32, i32
  }
  func.func @transform_4(%arg0: i32) -> (i32, i32, i32, i32) {
    %c0_i32 = arith.constant 0 : i32
    %c0_i32_0 = arith.constant 0 : i32
    %c0_i32_1 = arith.constant 0 : i32
    %c0_i32_2 = arith.constant 0 : i32
    return %arg0, %c0_i32, %c0_i32_0, %c0_i32_1 : i32, i32, i32, i32
  }
}

module attributes {stable_mosaic.version = 11 : i64} {
  func.func @_relu_pw_residual_kernel(%arg0: i32, %arg1: memref<128x16xf32, #tpu.memory_space<vmem>>, %arg2: memref<128x32xf32, #tpu.memory_space<vmem>>, %arg3: memref<16x32xf32, #tpu.memory_space<vmem>>, %arg4: memref<1x32xf32, #tpu.memory_space<vmem>>, %arg5: memref<128x32xf32, #tpu.memory_space<vmem>>) attributes {dimension_semantics = [#tpu.dimension_semantics<parallel>], iteration_bounds = array<i64: 1>, scalar_prefetch = 0 : i64, scratch_operands = 0 : i64, tpu.core_type = #tpu.core_type<tc>, window_params = [{transform_indices = @transform_0, window_bounds = array<i64: 128, 16>}, {transform_indices = @transform_1, window_bounds = array<i64: 128, 32>}, {pipeline_mode = #tpu.pipeline_mode<synchronous>, transform_indices = @transform_2, window_bounds = array<i64: 16, 32>}, {pipeline_mode = #tpu.pipeline_mode<synchronous>, transform_indices = @transform_3, window_bounds = array<i64: 1, 32>}, {transform_indices = @transform_4, window_bounds = array<i64: 128, 32>}]} {
    %c0 = arith.constant 0 : index
    %c0_0 = arith.constant 0 : index
    %0 = vector.load %arg1[%c0, %c0_0] : memref<128x16xf32, #tpu.memory_space<vmem>>, vector<128x16xf32>
    %cst = arith.constant 0.000000e+00 : f32
    %1 = vector.broadcast %cst : f32 to vector<128x16xf32>
    %2 = arith.maximumf %0, %1 : vector<128x16xf32>
    %c0_1 = arith.constant 0 : index
    %c0_2 = arith.constant 0 : index
    %3 = vector.load %arg3[%c0_1, %c0_2] : memref<16x32xf32, #tpu.memory_space<vmem>>, vector<16x32xf32>
    %cst_3 = arith.constant dense<0.000000e+00> : vector<128x32xf32>
    %4 = tpu.matmul %2, %3, %cst_3 {dimension_numbers = #tpu.dot_dimension_numbers<[1], [0], [0], [1], [0, 0, 1, 1], [], []>} : vector<128x16xf32>, vector<16x32xf32>, vector<128x32xf32> -> vector<128x32xf32>
    %c0_4 = arith.constant 0 : index
    %c0_5 = arith.constant 0 : index
    %5 = vector.load %arg4[%c0_4, %c0_5] : memref<1x32xf32, #tpu.memory_space<vmem>>, vector<1x32xf32>
    %6 = vector.broadcast %5 : vector<1x32xf32> to vector<128x32xf32>
    %7 = arith.addf %4, %6 : vector<128x32xf32>
    %c0_6 = arith.constant 0 : index
    %c0_7 = arith.constant 0 : index
    %8 = vector.load %arg2[%c0_6, %c0_7] : memref<128x32xf32, #tpu.memory_space<vmem>>, vector<128x32xf32>
    %9 = arith.addf %8, %7 : vector<128x32xf32>
    %c0_8 = arith.constant 0 : index
    %c0_9 = arith.constant 0 : index
    %10 = vector.load %arg5[%c0_8, %c0_9] : memref<128x32xf32, #tpu.memory_space<vmem>>, vector<128x32xf32>
    tpu.vector_store %arg5[%c0_8, %c0_9], %9 {strides = array<i32>} : memref<128x32xf32, #tpu.memory_space<vmem>>, vector<128x32xf32>,
    return
  }
  func.func @transform_0(%arg0: i32) -> (i32, i32) {
    %c0_i32 = arith.constant 0 : i32
    %c0_i32_0 = arith.constant 0 : i32
    return %arg0, %c0_i32 : i32, i32
  }
  func.func @transform_1(%arg0: i32) -> (i32, i32) {
    %c0_i32 = arith.constant 0 : i32
    %c0_i32_0 = arith.constant 0 : i32
    return %arg0, %c0_i32 : i32, i32
  }
  func.func @transform_2(%arg0: i32) -> (i32, i32) {
    %c0_i32 = arith.constant 0 : i32
    %c0_i32_0 = arith.constant 0 : i32
    %c0_i32_1 = arith.constant 0 : i32
    return %c0_i32, %c0_i32_0 : i32, i32
  }
  func.func @transform_3(%arg0: i32) -> (i32, i32) {
    %c0_i32 = arith.constant 0 : i32
    %c0_i32_0 = arith.constant 0 : i32
    %c0_i32_1 = arith.constant 0 : i32
    return %c0_i32, %c0_i32_0 : i32, i32
  }
  func.func @transform_4(%arg0: i32) -> (i32, i32) {
    %c0_i32 = arith.constant 0 : i32
    %c0_i32_0 = arith.constant 0 : i32
    return %arg0, %c0_i32 : i32, i32
  }
}

module attributes {stable_mosaic.version = 11 : i64} {
  func.func @_ffn_kernel(%arg0: i32, %arg1: memref<128x32xf32, #tpu.memory_space<vmem>>, %arg2: memref<32x64xf32, #tpu.memory_space<vmem>>, %arg3: memref<1x64xf32, #tpu.memory_space<vmem>>, %arg4: memref<64x32xf32, #tpu.memory_space<vmem>>, %arg5: memref<1x32xf32, #tpu.memory_space<vmem>>, %arg6: memref<128x32xf32, #tpu.memory_space<vmem>>) attributes {dimension_semantics = [#tpu.dimension_semantics<parallel>], iteration_bounds = array<i64: 1>, scalar_prefetch = 0 : i64, scratch_operands = 0 : i64, tpu.core_type = #tpu.core_type<tc>, window_params = [{transform_indices = @transform_0, window_bounds = array<i64: 128, 32>}, {pipeline_mode = #tpu.pipeline_mode<synchronous>, transform_indices = @transform_1, window_bounds = array<i64: 32, 64>}, {pipeline_mode = #tpu.pipeline_mode<synchronous>, transform_indices = @transform_2, window_bounds = array<i64: 1, 64>}, {pipeline_mode = #tpu.pipeline_mode<synchronous>, transform_indices = @transform_3, window_bounds = array<i64: 64, 32>}, {pipeline_mode = #tpu.pipeline_mode<synchronous>, transform_indices = @transform_4, window_bounds = array<i64: 1, 32>}, {transform_indices = @transform_5, window_bounds = array<i64: 128, 32>}]} {
    %c0 = arith.constant 0 : index
    %c0_0 = arith.constant 0 : index
    %0 = vector.load %arg1[%c0, %c0_0] : memref<128x32xf32, #tpu.memory_space<vmem>>, vector<128x32xf32>
    %c0_1 = arith.constant 0 : index
    %c0_2 = arith.constant 0 : index
    %1 = vector.load %arg2[%c0_1, %c0_2] : memref<32x64xf32, #tpu.memory_space<vmem>>, vector<32x64xf32>
    %cst = arith.constant dense<0.000000e+00> : vector<128x64xf32>
    %2 = tpu.matmul %0, %1, %cst {dimension_numbers = #tpu.dot_dimension_numbers<[1], [0], [0], [1], [0, 0, 1, 1], [], []>} : vector<128x32xf32>, vector<32x64xf32>, vector<128x64xf32> -> vector<128x64xf32>
    %c0_3 = arith.constant 0 : index
    %c0_4 = arith.constant 0 : index
    %3 = vector.load %arg3[%c0_3, %c0_4] : memref<1x64xf32, #tpu.memory_space<vmem>>, vector<1x64xf32>
    %4 = vector.broadcast %3 : vector<1x64xf32> to vector<128x64xf32>
    %5 = arith.addf %2, %4 : vector<128x64xf32>
    %cst_5 = arith.constant 0.000000e+00 : f32
    %6 = vector.broadcast %cst_5 : f32 to vector<128x64xf32>
    %7 = arith.maximumf %5, %6 : vector<128x64xf32>
    %c0_6 = arith.constant 0 : index
    %c0_7 = arith.constant 0 : index
    %8 = vector.load %arg4[%c0_6, %c0_7] : memref<64x32xf32, #tpu.memory_space<vmem>>, vector<64x32xf32>
    %cst_8 = arith.constant dense<0.000000e+00> : vector<128x32xf32>
    %9 = tpu.matmul %7, %8, %cst_8 {dimension_numbers = #tpu.dot_dimension_numbers<[1], [0], [0], [1], [0, 0, 1, 1], [], []>} : vector<128x64xf32>, vector<64x32xf32>, vector<128x32xf32> -> vector<128x32xf32>
    %c0_9 = arith.constant 0 : index
    %c0_10 = arith.constant 0 : index
    %10 = vector.load %arg5[%c0_9, %c0_10] : memref<1x32xf32, #tpu.memory_space<vmem>>, vector<1x32xf32>
    %11 = vector.broadcast %10 : vector<1x32xf32> to vector<128x32xf32>
    %12 = arith.addf %9, %11 : vector<128x32xf32>
    %13 = arith.addf %0, %12 : vector<128x32xf32>
    %c0_11 = arith.constant 0 : index
    %c0_12 = arith.constant 0 : index
    %14 = vector.load %arg6[%c0_11, %c0_12] : memref<128x32xf32, #tpu.memory_space<vmem>>, vector<128x32xf32>
    tpu.vector_store %arg6[%c0_11, %c0_12], %13 {strides = array<i32>} : memref<128x32xf32, #tpu.memory_space<vmem>>, vector<128x32xf32>,
    return
  }
  func.func @transform_0(%arg0: i32) -> (i32, i32) {
    %c0_i32 = arith.constant 0 : i32
    %c0_i32_0 = arith.constant 0 : i32
    return %arg0, %c0_i32 : i32, i32
  }
  func.func @transform_1(%arg0: i32) -> (i32, i32) {
    %c0_i32 = arith.constant 0 : i32
    %c0_i32_0 = arith.constant 0 : i32
    %c0_i32_1 = arith.constant 0 : i32
    return %c0_i32, %c0_i32_0 : i32, i32
  }
  func.func @transform_2(%arg0: i32) -> (i32, i32) {
    %c0_i32 = arith.constant 0 : i32
    %c0_i32_0 = arith.constant 0 : i32
    %c0_i32_1 = arith.constant 0 : i32
    return %c0_i32, %c0_i32_0 : i32, i32
  }
  func.func @transform_3(%arg0: i32) -> (i32, i32) {
    %c0_i32 = arith.constant 0 : i32
    %c0_i32_0 = arith.constant 0 : i32
    %c0_i32_1 = arith.constant 0 : i32
    return %c0_i32, %c0_i32_0 : i32, i32
  }
  func.func @transform_4(%arg0: i32) -> (i32, i32) {
    %c0_i32 = arith.constant 0 : i32
    %c0_i32_0 = arith.constant 0 : i32
    %c0_i32_1 = arith.constant 0 : i32
    return %c0_i32, %c0_i32_0 : i32, i32
  }
  func.func @transform_5(%arg0: i32) -> (i32, i32) {
    %c0_i32 = arith.constant 0 : i32
    %c0_i32_0 = arith.constant 0 : i32
    return %arg0, %c0_i32 : i32, i32
  }
}

</mosaic_0001>

<bundles_post_ra>
// kernel: _lambda_.10
= control target key start
LH: loop header
LB: loop body
LE: loop exit
PB: predicated region body
PF: predicated region fallthrough
CT: control target
= control target key end

     0   :  { %vm41_vm0 = vcmask 261120   ;;  %s499_s1 = inlined_call_operand.vmem [shape: f32[32,32], index: 1, kind: input, shape index: {}]   ;;  %s500_s0 = inlined_call_operand.vmem [shape: f32[128,32], index: 0, kind: input, shape index: {}]   ;;  %s501_s2 = inlined_call_operand.vmem [shape: f32[1,32], index: 2, kind: input, shape index: {}]   ;;  %s502_s3 = inlined_call_operand.vmem [shape: f32[128,32], index: 3, kind: output, shape index: {}]  }
   0x1   :  { %v30_v0 = vld [vmem:[%s499_s1] sm:$0xff]  ;;  %v31_v1 = vld [vmem:[%s499_s1 + $0x8] sm:$0xff]  ;;  %v32_v2 = vld [vmem:[%s499_s1 + $0x10] sm:$0xff] }
   0x2   :  { %v324_v3 = vpack.c.bf16 %v31_v1, %v30_v0  ;;  %v33_v4 = vld [vmem:[%s499_s1 + $0x18] sm:$0xff]  ;;  %v14_v5 = vld [vmem:[%s500_s0] sm:$0xff]  ;;  %v15_v8 = vld [vmem:[%s500_s0 + $0x8] sm:$0xff] }
   0x3   :  { %v22_v6 = vld [vmem:[%s500_s0 + $0x40] sm:$0xff]  ;;  %v328_v7 = vpack.c.bf16 %v33_v4, %v32_v2  ;;  %300 = vmatprep.mubr.msk.f32.mxu0 %vm41_vm0, %v14_v5  ;;  %v23_v9 = vld [vmem:[%s500_s0 + $0x48] sm:$0xff]  ;;  %v16_v10 = vld [vmem:[%s500_s0 + $0x10] sm:$0xff] }
   0x4   :  { %312 = vmatprep.mubr.msk.f32.mxu1 %vm41_vm0, %v22_v6  ;;  %325 = vmatprep.subr.bf16.mxu0 %v324_v3  ;;  %v24_v11 = vld [vmem:[%s500_s0 + $0x50] sm:$0xff]  ;;  %v17_v12 = vld [vmem:[%s500_s0 + $0x18] sm:$0xff]  ;;  %v18_v14 = vld [vmem:[%s500_s0 + $0x20] sm:$0xff] }
   0x5   :  { %332 = vmatprep.subr.bf16.mxu1 %v324_v3  ;;  %327 = vmatpush3.bf16.msra.mxu0 %v324_v3  ;;  %v25_v13 = vld [vmem:[%s500_s0 + $0x58] sm:$0xff]  ;;  %v26_v15 = vld [vmem:[%s500_s0 + $0x60] sm:$0xff]  ;;  %v19_v16 = vld [vmem:[%s500_s0 + $0x28] sm:$0xff] }
   0x6   :  { %334 = vmatpush3.bf16.msra.mxu1 %v324_v3  ;;  %329 = vmatprep.subr.bf16.mxu0 %v328_v7  ;;  %v27_v17 = vld [vmem:[%s500_s0 + $0x68] sm:$0xff]  ;;  %v20_v18 = vld [vmem:[%s500_s0 + $0x30] sm:$0xff]  ;;  %v21_v20 = vld [vmem:[%s500_s0 + $0x38] sm:$0xff] }
   0x7   :  { %333 = vmatprep.subr.bf16.mxu1 %v328_v7  ;;  %v28_v19 = vld [vmem:[%s500_s0 + $0x70] sm:$0xff]  ;;  %v29_v21 = vld [vmem:[%s500_s0 + $0x78] sm:$0xff]  ;;  %v255_v22 = vld [vmem:[%s501_s2] ss:$0 sm:$0xff] }
   0x9   :  { %331 = vmatpush3.bf16.msra.mxu0 %v328_v7 }
   0xa   :  { %335 = vmatpush3.bf16.msra.mxu1 %v328_v7 }
   0xc   :  { %301 = vmatmul.mubr.msk.f32.vlgmr.msra.gmra.mrb[0].mxu0 %vm41_vm0, %v15_v8 }
   0xd   :  { %313 = vmatmul.mubr.msk.f32.vlgmr.msra.gmra.mrb[0].mxu1 %vm41_vm0, %v23_v9  ;;  %303 = vmatprep.mubr.msk.f32.mxu0 %vm41_vm0, %v16_v10 }
   0xe   :  { %315 = vmatprep.mubr.msk.f32.mxu1 %vm41_vm0, %v24_v11 }
  0x10   :  { %304 = vmatmul.mubr.msk.f32.gmra.mrb[2].mxu0 %vm41_vm0, %v17_v12 }
  0x11   :  { %316 = vmatmul.mubr.msk.f32.gmra.mrb[2].mxu1 %vm41_vm0, %v25_v13  ;;  %306 = vmatprep.mubr.msk.f32.mxu0 %vm41_vm0, %v18_v14 }
  0x12   :  { %318 = vmatprep.mubr.msk.f32.mxu1 %vm41_vm0, %v26_v15 }
  0x14   :  { %307 = vmatmul.mubr.msk.f32.gmra.mrb[4].mxu0 %vm41_vm0, %v19_v16 }
  0x15   :  { %319 = vmatmul.mubr.msk.f32.gmra.mrb[4].mxu1 %vm41_vm0, %v27_v17  ;;  %309 = vmatprep.mubr.msk.f32.mxu0 %vm41_vm0, %v20_v18 }
  0x16   :  { %321 = vmatprep.mubr.msk.f32.mxu1 %vm41_vm0, %v28_v19 }
  0x18   :  { %310 = vmatmul.mubr.msk.f32.gmra.mrb[6].mxu0 %vm41_vm0, %v21_v20 }
  0x19   :  { %322 = vmatmul.mubr.msk.f32.gmra.mrb[6].mxu1 %vm41_vm0, %v29_v21 }
  0xdf   :  { %v302_v23 = vpop.f32.mrb[0].mxu0 }
  0xe0   :  { %v314_v24 = vpop.f32.mrb[0].mxu1  ;;  %v162_v25 = vadd.f32 %v302_v23, %v255_v22  ;;  %v156_v27 = vpop.f32.mrb[1].mxu0 }
  0xe1   :  { %v202_v26 = vadd.f32 %v314_v24, %v255_v22  ;;  %v196_v28 = vpop.f32.mrb[1].mxu1  ;;  %v157_v29 = vadd.f32 %v255_v22, %v156_v27 }
  0xe2   :  { %v197_v30 = vadd.f32 %v255_v22, %v196_v28  ;;  %236 = vst.msk [vmem:[%s502_s3 + $0x8] sm:$0xff] %vm41_vm0, %v162_v25 }
  0xe3   :  { %244 = vst.msk [vmem:[%s502_s3 + $0x48] sm:$0xff] %vm41_vm0, %v202_v26  ;;  %235 = vst.msk [vmem:[%s502_s3] sm:$0xff] %vm41_vm0, %v157_v29  ;;  %v305_v31 = vpop.f32.mrb[2].mxu0 }
  0xe4   :  { %243 = vst.msk [vmem:[%s502_s3 + $0x40] sm:$0xff] %vm41_vm0, %v197_v30  ;;  %v317_v32 = vpop.f32.mrb[2].mxu1  ;;  %v172_v33 = vadd.f32 %v305_v31, %v255_v22  ;;  %v166_v35 = vpop.f32.mrb[3].mxu0 }
  0xe5   :  { %v212_v34 = vadd.f32 %v317_v32, %v255_v22  ;;  %v206_v36 = vpop.f32.mrb[3].mxu1  ;;  %v167_v37 = vadd.f32 %v255_v22, %v166_v35 }
  0xe6   :  { %v207_v38 = vadd.f32 %v255_v22, %v206_v36  ;;  %238 = vst.msk [vmem:[%s502_s3 + $0x18] sm:$0xff] %vm41_vm0, %v172_v33 }
  0xe7   :  { %246 = vst.msk [vmem:[%s502_s3 + $0x58] sm:$0xff] %vm41_vm0, %v212_v34  ;;  %237 = vst.msk [vmem:[%s502_s3 + $0x10] sm:$0xff] %vm41_vm0, %v167_v37  ;;  %v308_v39 = vpop.f32.mrb[4].mxu0 }
  0xe8   :  { %245 = vst.msk [vmem:[%s502_s3 + $0x50] sm:$0xff] %vm41_vm0, %v207_v38  ;;  %v320_v40 = vpop.f32.mrb[4].mxu1  ;;  %v182_v41 = vadd.f32 %v308_v39, %v255_v22  ;;  %v176_v43 = vpop.f32.mrb[5].mxu0 }
  0xe9   :  { %v222_v42 = vadd.f32 %v320_v40, %v255_v22  ;;  %v216_v44 = vpop.f32.mrb[5].mxu1  ;;  %v177_v45 = vadd.f32 %v255_v22, %v176_v43 }
  0xea   :  { %v217_v46 = vadd.f32 %v255_v22, %v216_v44  ;;  %240 = vst.msk [vmem:[%s502_s3 + $0x28] sm:$0xff] %vm41_vm0, %v182_v41 }
  0xeb   :  { %248 = vst.msk [vmem:[%s502_s3 + $0x68] sm:$0xff] %vm41_vm0, %v222_v42  ;;  %239 = vst.msk [vmem:[%s502_s3 + $0x20] sm:$0xff] %vm41_vm0, %v177_v45  ;;  %v311_v47 = vpop.f32.mrb[6].mxu0 }
  0xec   :  { %247 = vst.msk [vmem:[%s502_s3 + $0x60] sm:$0xff] %vm41_vm0, %v217_v46  ;;  %v323_v48 = vpop.f32.mrb[6].mxu1  ;;  %v192_v49 = vadd.f32 %v311_v47, %v255_v22  ;;  %v186_v51 = vpop.f32.mrb[7].mxu0 }
  0xed   :  { %v232_v50 = vadd.f32 %v323_v48, %v255_v22  ;;  %v226_v52 = vpop.f32.mrb[7].mxu1  ;;  %v187_v53 = vadd.f32 %v255_v22, %v186_v51 }
  0xee   :  { %v227_v54 = vadd.f32 %v255_v22, %v226_v52  ;;  %242 = vst.msk [vmem:[%s502_s3 + $0x38] sm:$0xff] %vm41_vm0, %v192_v49 }
  0xef   :  { %250 = vst.msk [vmem:[%s502_s3 + $0x78] sm:$0xff] %vm41_vm0, %v232_v50  ;;  %241 = vst.msk [vmem:[%s502_s3 + $0x30] sm:$0xff] %vm41_vm0, %v187_v53 }
  0xf0   :  { %249 = vst.msk [vmem:[%s502_s3 + $0x70] sm:$0xff] %vm41_vm0, %v227_v54 }

// kernel: _lambda_.9
= control target key start
LH: loop header
LB: loop body
LE: loop exit
PB: predicated region body
PF: predicated region fallthrough
CT: control target
= control target key end

     0   :  { %vm47_vm0 = vcmask 261120   ;;  %vm272_vm1 = vcmask 523264   ;;  %s964_s1 = inlined_call_operand.vmem [shape: f32[32,64], index: 1, kind: input, shape index: {}]   ;;  %s965_s0 = inlined_call_operand.vmem [shape: f32[128,32], index: 0, kind: input, shape index: {}]   ;;  %s966_s3 = inlined_call_operand.vmem [shape: f32[64,32], index: 3, kind: input, shape index: {}]   ;;  %s967_s2 = inlined_call_operand.vmem [shape: f32[1,64], index: 2, kind: input, shape index: {}]   ;;  %s968_s4 = inlined_call_operand.vmem [shape: f32[1,32], index: 4, kind: input, shape index: {}]   ;;  %s969_s5 = inlined_call_operand.vmem [shape: f32[128,32], index: 5, kind: output, shape index: {}]  }
   0x1   :  { %v36_v0 = vld [vmem:[%s964_s1] sm:$0xff]  ;;  %v37_v1 = vld [vmem:[%s964_s1 + $0x8] sm:$0xff]  ;;  %v38_v2 = vld [vmem:[%s964_s1 + $0x10] sm:$0xff] }
   0x2   :  { %v652_v3 = vpack.c.bf16 %v37_v1, %v36_v0  ;;  %v39_v4 = vld [vmem:[%s964_s1 + $0x18] sm:$0xff]  ;;  %v729_v5 = vld [vmem:[%s965_s0] sm:$0xff]  ;;  %v258_v8 = vld [vmem:[%s966_s3 + $0x8] sm:$0xff] }
   0x3   :  { %v656_v6 = vpack.c.bf16 %v39_v4, %v38_v2  ;;  %588 = vmatprep.mubr.msk.f32.mxu0 %vm47_vm0, %v729_v5  ;;  %v257_v7 = vld [vmem:[%s966_s3] sm:$0xff]  ;;  %v259_v9 = vld [vmem:[%s966_s3 + $0x10] sm:$0xff]  ;;  %v260_v10 = vld [vmem:[%s966_s3 + $0x18] sm:$0xff] }
   0x4   :  { %653 = vmatprep.subr.bf16.mxu0 %v652_v3  ;;  %v748_v11 = vld [vmem:[%s965_s0 + $0x8] sm:$0xff]  ;;  %v660_v12 = vpack.c.bf16 %v258_v8, %v257_v7  ;;  %v753_v13 = vld [vmem:[%s965_s0 + $0x10] sm:$0xff]  ;;  %v664_v14 = vpack.c.bf16 %v260_v10, %v259_v9  ;;  %v261_v15 = vld [vmem:[%s966_s3 + $0x20] sm:$0xff] }
   0x5   :  { %655 = vmatpush3.bf16.msra.mxu0 %v652_v3  ;;  %v262_v16 = vld [vmem:[%s966_s3 + $0x28] sm:$0xff]  ;;  %v768_v17 = vld [vmem:[%s965_s0 + $0x18] sm:$0xff]  ;;  %v773_v18 = vld [vmem:[%s965_s0 + $0x20] sm:$0xff] }
   0x6   :  { %657 = vmatprep.subr.bf16.mxu0 %v656_v6  ;;  %676 = vmatprep.subr.bf16.mxu1 %v660_v12  ;;  %v668_v19 = vpack.c.bf16 %v262_v16, %v261_v15  ;;  %v782_v20 = vld [vmem:[%s965_s0 + $0x28] sm:$0xff]  ;;  %v787_v21 = vld [vmem:[%s965_s0 + $0x30] sm:$0xff]  ;;  %v796_v22 = vld [vmem:[%s965_s0 + $0x38] sm:$0xff] }
   0x7   :  { %680 = vmatpush3.bf16.msra.mxu1 %v660_v12  ;;  %v801_v23 = vld [vmem:[%s965_s0 + $0x40] sm:$0xff]  ;;  %v810_v24 = vld [vmem:[%s965_s0 + $0x48] sm:$0xff]  ;;  %v815_v25 = vld [vmem:[%s965_s0 + $0x50] sm:$0xff] }
   0x8   :  { %677 = vmatprep.subr.bf16.mxu1 %v664_v14  ;;  %v824_v26 = vld [vmem:[%s965_s0 + $0x58] sm:$0xff]  ;;  %v829_v27 = vld [vmem:[%s965_s0 + $0x60] sm:$0xff]  ;;  %v838_v28 = vld [vmem:[%s965_s0 + $0x68] sm:$0xff] }
   0x9   :  { %659 = vmatpush3.bf16.msra.mxu0 %v656_v6  ;;  %v843_v29 = vld [vmem:[%s965_s0 + $0x70] sm:$0xff]  ;;  %v852_v30 = vld [vmem:[%s965_s0 + $0x78] sm:$0xff]  ;;  %v502_v34 = vld [vmem:[%s967_s2] ss:$0 sm:$0xff] }
   0xa   :  { %661 = vmatprep.subr.bf16.mxu0 %v660_v12  ;;  %v263_v31 = vld [vmem:[%s966_s3 + $0x30] sm:$0xff]  ;;  %v264_v32 = vld [vmem:[%s966_s3 + $0x38] sm:$0xff] }
   0xb   :  { %681 = vmatpush3.bf16.msra.mxu1 %v664_v14  ;;  %v672_v33 = vpack.c.bf16 %v264_v32, %v263_v31 }
   0xc   :  { %589 = vmatmul.mubr.msk.f32.vlgmr.msra.gmra.mrb[0].mxu0 %vm47_vm0, %v748_v11  ;;  %678 = vmatprep.subr.bf16.mxu1 %v668_v19 }
   0xd   :  { %591 = vmatprep.mubr.msk.f32.mxu0 %vm47_vm0, %v753_v13  ;;  %663 = vmatpush3.bf16.msra.mxu0 %v660_v12 }
   0xe   :  { %665 = vmatprep.subr.bf16.mxu0 %v664_v14 }
   0xf   :  { %682 = vmatpush3.bf16.msra.mxu1 %v668_v19 }
  0x10   :  { %592 = vmatmul.mubr.msk.f32.gmra.mrb[2].mxu0 %vm47_vm0, %v768_v17  ;;  %679 = vmatprep.subr.bf16.mxu1 %v672_v33 }
  0x11   :  { %594 = vmatprep.mubr.msk.f32.mxu0 %vm47_vm0, %v773_v18  ;;  %667 = vmatpush3.bf16.msra.mxu0 %v664_v14 }
  0x12   :  { %669 = vmatprep.subr.bf16.mxu0 %v668_v19 }
  0x13   :  { %683 = vmatpush3.bf16.msra.mxu1 %v672_v33 }
  0x14   :  { %595 = vmatmul.mubr.msk.f32.gmra.mrb[4].mxu0 %vm47_vm0, %v782_v20 }
  0x15   :  { %597 = vmatprep.mubr.msk.f32.mxu0 %vm47_vm0, %v787_v21  ;;  %671 = vmatpush3.bf16.msra.mxu0 %v668_v19 }
  0x16   :  { %673 = vmatprep.subr.bf16.mxu0 %v672_v33 }
  0x18   :  { %598 = vmatmul.mubr.msk.f32.gmra.mrb[6].mxu0 %vm47_vm0, %v796_v22 }
  0x19   :  { %600 = vmatprep.mubr.msk.f32.mxu0 %vm47_vm0, %v801_v23  ;;  %675 = vmatpush3.bf16.msra.mxu0 %v672_v33 }
  0x1c   :  { %601 = vmatmul.mubr.msk.f32.gmra.mrb[8].mxu0 %vm47_vm0, %v810_v24 }
  0x1d   :  { %603 = vmatprep.mubr.msk.f32.mxu0 %vm47_vm0, %v815_v25 }
  0x20   :  { %604 = vmatmul.mubr.msk.f32.gmra.mrb[10].mxu0 %vm47_vm0, %v824_v26 }
  0x21   :  { %606 = vmatprep.mubr.msk.f32.mxu0 %vm47_vm0, %v829_v27 }
  0x24   :  { %607 = vmatmul.mubr.msk.f32.gmra.mrb[12].mxu0 %vm47_vm0, %v838_v28 }
  0x25   :  { %609 = vmatprep.mubr.msk.f32.mxu0 %vm47_vm0, %v843_v29 }
  0x28   :  { %610 = vmatmul.mubr.msk.f32.gmra.mrb[14].mxu0 %vm47_vm0, %v852_v30 }
  0xdf   :  { %v590_v35 = vpop.f32.mrb[0].mxu0 }
  0xe0   :  { %v168_v36 = vadd.f32 %v590_v35, %v502_v34  ;;  %v162_v37 = vpop.f32.mrb[1].mxu0 }
  0xe1   :  { %v163_v38 = vadd.f32 %v502_v34, %v162_v37 }
  0xe2   :  { %v242_v41 = vmax.f32 %v168_v36, 0.0  ;;  %v519_v36 = vld [vmem:[%s968_s4] ss:$0 sm:$0xff] }
  0xe3   :  { %v241_v39 = vmax.f32 %v163_v38, 0.0  ;;  %v593_v40 = vpop.f32.mrb[2].mxu0 }
  0xe4   :  { %v178_v42 = vadd.f32 %v593_v40, %v502_v34  ;;  %v172_v43 = vpop.f32.mrb[3].mxu0 }
  0xe5   :  { %v173_v44 = vadd.f32 %v502_v34, %v172_v43  ;;  %628 = vmatprep.mubr.msk.f32.mxu0 %vm272_vm1, %v241_v39 }
  0xe6   :  { %629 = vmatmul.mubr.msk.f32.vlgmr.msra.gmra.mrb[16].mxu0 %vm272_vm1, %v242_v41  ;;  %v244_v47 = vmax.f32 %v178_v42, 0.0 }
  0xe7   :  { %v243_v45 = vmax.f32 %v173_v44, 0.0  ;;  %v596_v46 = vpop.f32.mrb[4].mxu0 }
  0xe8   :  { %v188_v48 = vadd.f32 %v596_v46, %v502_v34  ;;  %v182_v49 = vpop.f32.mrb[5].mxu0 }
  0xe9   :  { %v183_v50 = vadd.f32 %v502_v34, %v182_v49  ;;  %631 = vmatprep.mubr.msk.f32.mxu1 %vm272_vm1, %v243_v45 }
  0xea   :  { %632 = vmatmul.mubr.msk.f32.vlgmr.msra.gmra.mrb[0].mxu1 %vm272_vm1, %v244_v47  ;;  %v246_v53 = vmax.f32 %v188_v48, 0.0 }
  0xeb   :  { %v245_v51 = vmax.f32 %v183_v50, 0.0  ;;  %v599_v52 = vpop.f32.mrb[6].mxu0 }
  0xec   :  { %v198_v54 = vadd.f32 %v599_v52, %v502_v34  ;;  %v192_v55 = vpop.f32.mrb[7].mxu0 }
  0xed   :  { %v193_v56 = vadd.f32 %v502_v34, %v192_v55  ;;  %634 = vmatprep.mubr.msk.f32.mxu1 %vm272_vm1, %v245_v51 }
  0xee   :  { %635 = vmatmul.mubr.msk.f32.gmra.mrb[2].mxu1 %vm272_vm1, %v246_v53  ;;  %v248_v59 = vmax.f32 %v198_v54, 0.0 }
  0xef   :  { %v247_v57 = vmax.f32 %v193_v56, 0.0  ;;  %v602_v58 = vpop.f32.mrb[8].mxu0 }
  0xf0   :  { %v208_v60 = vadd.f32 %v602_v58, %v502_v34  ;;  %v202_v61 = vpop.f32.mrb[9].mxu0 }
  0xf1   :  { %v203_v62 = vadd.f32 %v502_v34, %v202_v61  ;;  %637 = vmatprep.mubr.msk.f32.mxu1 %vm272_vm1, %v247_v57 }
  0xf2   :  { %638 = vmatmul.mubr.msk.f32.gmra.mrb[4].mxu1 %vm272_vm1, %v248_v59  ;;  %v250_v1 = vmax.f32 %v208_v60, 0.0 }
  0xf3   :  { %v249_v63 = vmax.f32 %v203_v62, 0.0  ;;  %v605_v0 = vpop.f32.mrb[10].mxu0 }
  0xf4   :  { %v218_v2 = vadd.f32 %v605_v0, %v502_v34  ;;  %v212_v3 = vpop.f32.mrb[11].mxu0 }
  0xf5   :  { %v213_v4 = vadd.f32 %v502_v34, %v212_v3  ;;  %640 = vmatprep.mubr.msk.f32.mxu1 %vm272_vm1, %v249_v63 }
  0xf6   :  { %641 = vmatmul.mubr.msk.f32.gmra.mrb[6].mxu1 %vm272_vm1, %v250_v1  ;;  %v252_v8 = vmax.f32 %v218_v2, 0.0 }
  0xf7   :  { %v251_v6 = vmax.f32 %v213_v4, 0.0  ;;  %v608_v7 = vpop.f32.mrb[12].mxu0 }
  0xf8   :  { %v228_v9 = vadd.f32 %v608_v7, %v502_v34  ;;  %v222_v10 = vpop.f32.mrb[13].mxu0 }
  0xf9   :  { %v223_v12 = vadd.f32 %v502_v34, %v222_v10  ;;  %643 = vmatprep.mubr.msk.f32.mxu1 %vm272_vm1, %v251_v6 }
  0xfa   :  { %644 = vmatmul.mubr.msk.f32.gmra.mrb[8].mxu1 %vm272_vm1, %v252_v8  ;;  %v254_v16 = vmax.f32 %v228_v9, 0.0 }
  0xfb   :  { %v253_v14 = vmax.f32 %v223_v12, 0.0  ;;  %v611_v15 = vpop.f32.mrb[14].mxu0 }
  0xfc   :  { %v238_v19 = vadd.f32 %v611_v15, %v502_v34  ;;  %v232_v31 = vpop.f32.mrb[15].mxu0 }
  0xfd   :  { %v233_v32 = vadd.f32 %v502_v34, %v232_v31  ;;  %646 = vmatprep.mubr.msk.f32.mxu1 %vm272_vm1, %v253_v14 }
  0xfe   :  { %647 = vmatmul.mubr.msk.f32.gmra.mrb[10].mxu1 %vm272_vm1, %v254_v16  ;;  %v256_v35 = vmax.f32 %v238_v19, 0.0 }
  0xff   :  { %v255_v33 = vmax.f32 %v233_v32, 0.0 }
 0x101   :  { %649 = vmatprep.mubr.msk.f32.mxu1 %vm272_vm1, %v255_v33 }
 0x102   :  { %650 = vmatmul.mubr.msk.f32.gmra.mrb[12].mxu1 %vm272_vm1, %v256_v35 }
 0x1b9   :  { %v630_v37 = vpop.f32.mrb[16].mxu0 }
 0x1ba   :  { %v393_v38 = vadd.f32 %v630_v37, %v519_v36  ;;  %v387_v39 = vpop.f32.mrb[17].mxu0 }
 0x1bb   :  { %v388_v40 = vadd.f32 %v519_v36, %v387_v39 }
 0x1bc   :  { %v467_v34 = vadd.f32 %v393_v38, %v748_v11 }
 0x1bd   :  { %v466_v41 = vadd.f32 %v388_v40, %v729_v5  ;;  %v633_v42 = vpop.f32.mrb[0].mxu1 }
 0x1be   :  { %483 = vst.msk [vmem:[%s969_s5 + $0x8] sm:$0xff] %vm47_vm0, %v467_v34  ;;  %v403_v43 = vadd.f32 %v633_v42, %v519_v36  ;;  %v397_v44 = vpop.f32.mrb[1].mxu1 }
 0x1bf   :  { %482 = vst.msk [vmem:[%s969_s5] sm:$0xff] %vm47_vm0, %v466_v41  ;;  %v398_v45 = vadd.f32 %v519_v36, %v397_v44 }
 0x1c0   :  { %v469_v46 = vadd.f32 %v403_v43, %v768_v17 }
 0x1c1   :  { %v468_v11 = vadd.f32 %v398_v45, %v753_v13  ;;  %v636_v47 = vpop.f32.mrb[2].mxu1 }
 0x1c2   :  { %485 = vst.msk [vmem:[%s969_s5 + $0x18] sm:$0xff] %vm47_vm0, %v469_v46  ;;  %v413_v5 = vadd.f32 %v636_v47, %v519_v36  ;;  %v407_v48 = vpop.f32.mrb[3].mxu1 }
 0x1c3   :  { %484 = vst.msk [vmem:[%s969_s5 + $0x10] sm:$0xff] %vm47_vm0, %v468_v11  ;;  %v408_v49 = vadd.f32 %v519_v36, %v407_v48 }
 0x1c4   :  { %v471_v50 = vadd.f32 %v413_v5, %v782_v20 }
 0x1c5   :  { %v470_v17 = vadd.f32 %v408_v49, %v773_v18  ;;  %v639_v51 = vpop.f32.mrb[4].mxu1 }
 0x1c6   :  { %487 = vst.msk [vmem:[%s969_s5 + $0x28] sm:$0xff] %vm47_vm0, %v471_v50  ;;  %v423_v13 = vadd.f32 %v639_v51, %v519_v36  ;;  %v417_v52 = vpop.f32.mrb[5].mxu1 }
 0x1c7   :  { %486 = vst.msk [vmem:[%s969_s5 + $0x20] sm:$0xff] %vm47_vm0, %v470_v17  ;;  %v418_v53 = vadd.f32 %v519_v36, %v417_v52 }
 0x1c8   :  { %v473_v54 = vadd.f32 %v423_v13, %v796_v22 }
 0x1c9   :  { %v472_v20 = vadd.f32 %v418_v53, %v787_v21  ;;  %v642_v55 = vpop.f32.mrb[6].mxu1 }
 0x1ca   :  { %489 = vst.msk [vmem:[%s969_s5 + $0x38] sm:$0xff] %vm47_vm0, %v473_v54  ;;  %v433_v18 = vadd.f32 %v642_v55, %v519_v36  ;;  %v427_v56 = vpop.f32.mrb[7].mxu1 }
 0x1cb   :  { %488 = vst.msk [vmem:[%s969_s5 + $0x30] sm:$0xff] %vm47_vm0, %v472_v20  ;;  %v428_v57 = vadd.f32 %v519_v36, %v427_v56 }
 0x1cc   :  { %v475_v58 = vadd.f32 %v433_v18, %v810_v24 }
 0x1cd   :  { %v474_v22 = vadd.f32 %v428_v57, %v801_v23  ;;  %v645_v59 = vpop.f32.mrb[8].mxu1 }
 0x1ce   :  { %491 = vst.msk [vmem:[%s969_s5 + $0x48] sm:$0xff] %vm47_vm0, %v475_v58  ;;  %v443_v21 = vadd.f32 %v645_v59, %v519_v36  ;;  %v437_v60 = vpop.f32.mrb[9].mxu1 }
 0x1cf   :  { %490 = vst.msk [vmem:[%s969_s5 + $0x40] sm:$0xff] %vm47_vm0, %v474_v22  ;;  %v438_v61 = vadd.f32 %v519_v36, %v437_v60 }
 0x1d0   :  { %v477_v62 = vadd.f32 %v443_v21, %v824_v26 }
 0x1d1   :  { %v476_v24 = vadd.f32 %v438_v61, %v815_v25  ;;  %v648_v63 = vpop.f32.mrb[10].mxu1 }
 0x1d2   :  { %493 = vst.msk [vmem:[%s969_s5 + $0x58] sm:$0xff] %vm47_vm0, %v477_v62  ;;  %v453_v23 = vadd.f32 %v648_v63, %v519_v36  ;;  %v447_v0 = vpop.f32.mrb[11].mxu1 }
 0x1d3   :  { %492 = vst.msk [vmem:[%s969_s5 + $0x50] sm:$0xff] %vm47_vm0, %v476_v24  ;;  %v448_v1 = vadd.f32 %v519_v36, %v447_v0 }
 0x1d4   :  { %v479_v2 = vadd.f32 %v453_v23, %v838_v28 }
 0x1d5   :  { %v478_v26 = vadd.f32 %v448_v1, %v829_v27  ;;  %v651_v3 = vpop.f32.mrb[12].mxu1 }
 0x1d6   :  { %495 = vst.msk [vmem:[%s969_s5 + $0x68] sm:$0xff] %vm47_vm0, %v479_v2  ;;  %v463_v25 = vadd.f32 %v651_v3, %v519_v36  ;;  %v457_v4 = vpop.f32.mrb[13].mxu1 }
 0x1d7   :  { %494 = vst.msk [vmem:[%s969_s5 + $0x60] sm:$0xff] %vm47_vm0, %v478_v26  ;;  %v458_v6 = vadd.f32 %v519_v36, %v457_v4 }
 0x1d8   :  { %v481_v7 = vadd.f32 %v463_v25, %v852_v30 }
 0x1d9   :  { %v480_v28 = vadd.f32 %v458_v6, %v843_v29 }
 0x1da   :  { %497 = vst.msk [vmem:[%s969_s5 + $0x78] sm:$0xff] %vm47_vm0, %v481_v7 }
 0x1db   :  { %496 = vst.msk [vmem:[%s969_s5 + $0x70] sm:$0xff] %vm47_vm0, %v480_v28 }

// kernel: _lambda_.8
= control target key start
LH: loop header
LB: loop body
LE: loop exit
PB: predicated region body
PF: predicated region fallthrough
CT: control target
= control target key end

     0   :  { %s896_s12 = smov 0   ;;  %s1312_s0 = inlined_call_operand.vmem [shape: f32[2,10,10,32], index: 0, kind: input, shape index: {}]   ;;  %s1313_s1 = inlined_call_operand.vmem [shape: f32[9,32], index: 1, kind: input, shape index: {}]   ;;  %s1314_s2 = inlined_call_operand.vmem [shape: f32[1,32], index: 2, kind: input, shape index: {}]   ;;  %s1315_s3 = inlined_call_operand.vmem [shape: f32[2,8,8,32], index: 3, kind: output, shape index: {}]  }
   0x1 LB: > { %s846_s13 = sadd.s32 4294967295, %s874_s12   ;;  %p850_p0 = scmp.ge.s32.totalorder %s874_s12, 1  ;;  %s874_s12 = sphi %s896_s12, %s13_s12  }
   0x2   : > { %p137_p1 = scmp.lt.s32.totalorder %s874_s12, 3 }
   0x4   : > { %p138_p2 = pnand %p850_p0, %p137_p1 }
   0x5   : > { %p161_p3 = scmp.lt.s32.totalorder (!%p138_p2), %s846_s13, 1  ;;  %v193_v0 = vlaneseq (!%p138_p2)  ;;  %v191_v2 = vld [vmem:[%s1313_s1] sm:$0xff] (!%p138_p2)  ;;  %vm249_vm0 = vcmask (!%p138_p2), 1046528   ;;  %vm326_vm1 = vcmask (!%p138_p2), 1045504   ;;  %v948_v38 = vld [vmem:[%s1313_s1 + $0x8] ss:$0 sm:$0xff] (!%p138_p2) }
   0x6   : > { %141 = sbr.rel (%p138_p2) target bundleno = 122 (0x7a), region = 32  ;;  %vm782_vm2 = vcmask (!%p138_p2), 261120  }
   0x7   : > { %v194_v1 = vshrl.u32 (!%p138_p2), %v193_v0, 7 }
   0x9   : > { %v195_v3 = vsub.s32 (!%p138_p2), 0, %v194_v1  ;;  %v215_v4 = vsub.s32 (!%p138_p2), 1, %v194_v1  ;;  %v292_v5 = vsub.s32 (!%p138_p2), 2, %v194_v1  ;;  %v369_v6 = vsub.s32 (!%p138_p2), 3, %v194_v1 }
   0xa   : > { %v389_v7 = vsub.s32 (!%p138_p2), 4, %v194_v1  ;;  %v465_v8 = vsub.s32 (!%p138_p2), 5, %v194_v1  ;;  %v541_v9 = vsub.s32 (!%p138_p2), 6, %v194_v1  ;;  %v561_v10 = vsub.s32 (!%p138_p2), 7, %v194_v1 }
   0xb   : > { %v915_v11 = vrot.slane (!%p138_p2), %v191_v2, %v195_v3  ;;  %v917_v12 = vrot.slane (!%p138_p2), %v191_v2, %v215_v4  ;;  %v919_v13 = vrot.slane (!%p138_p2), %v191_v2, %v292_v5  ;;  %v923_v16 = vrot.slane (!%p138_p2), %v191_v2, %v369_v6 }
   0xc   : > { %v925_v17 = vrot.slane (!%p138_p2), %v191_v2, %v389_v7  ;;  %v927_v18 = vrot.slane (!%p138_p2), %v191_v2, %v465_v8  ;;  %v929_v19 = vrot.slane (!%p138_p2), %v191_v2, %v541_v9  ;;  %v935_v24 = vrot.slane (!%p138_p2), %v191_v2, %v561_v10 }
   0xd   : > { %s1317_s13 = smov (!%p161_p3, %s846_s13), 1 }
   0xe   : > { %s859_s16 = smul.u32 160, %s1317_s13  ;;  %s858_s24 = sshll.u32 %s1317_s13, 6 }
   0xf   : > { %s1028_s27 = scalar_lea.vmem %s1315_s3, %s858_s24 }
  0x10   : > { %s913_s19 = scalar_lea.vmem %s1312_s0, %s859_s16 }
  0x11   : > { %v171_v14 = vld [vmem:[%s913_s19] sm:$0xff]  ;;  %v172_v15 = vld [vmem:[%s913_s19 + $0x8] sm:$0x3]  ;;  %v174_v20 = vld [vmem:[%s913_s19 + $0x18] sm:$0x3] }
  0x12   : > { %v217_v21 = vmul.f32 %v917_v12, %v171_v14  ;;  %v218_v22 = vmul.f32 %v917_v12, %v172_v15  ;;  %v294_v23 = vmul.f32 %v919_v13, %v171_v14  ;;  %v173_v25 = vld [vmem:[%s913_s19 + $0x10] sm:$0xff]  ;;  %v197_v26 = vmul.f32 %v915_v11, %v171_v14  ;;  %v954_v43 = vld [vmem:[%s913_s19 + $0x20] sm:$0xff]  ;;  %v957_v44 = vld [vmem:[%s913_s19 + $0x28] sm:$0x3] }
  0x13   : > { %v220_v27 = vmul.f32 %v917_v12, %v174_v20  ;;  %v295_v28 = vmul.f32 %v919_v13, %v172_v15  ;;  %v297_v29 = vmul.f32 %v919_v13, %v174_v20  ;;  %v391_v33 = vmul.f32 %v925_v17, %v173_v25 }
  0x14   : > { %v250_v30 = vrot.slane %v217_v21, 1  ;;  %v251_v31 = vrot.slane %v218_v22, 1  ;;  %v327_v32 = vrot.slane %v294_v23, 2  ;;  %v371_v36 = vmul.f32 %v923_v16, %v173_v25 }
  0x15   : > { %v254_v34 = vrot.slane %v220_v27, 1  ;;  %v328_v35 = vrot.slane %v295_v28, 2  ;;  %v392_v37 = vmul.f32 %v925_v17, %v174_v20  ;;  %v423_v40 = vrot.slane %v391_v33, 1 }
  0x16   : > { %v252_v39 = vsel %vm249_vm0, %v250_v30, %v251_v31  ;;  %v467_v41 = vmul.f32 %v927_v18, %v173_v25  ;;  %v468_v42 = vmul.f32 %v927_v18, %v174_v20  ;;  %v331_v47 = vrot.slane %v297_v29, 2  ;;  %v991_v30 = vld [vmem:[%s913_s19 + $0x30] sm:$0xff]  ;;  %v994_v31 = vld [vmem:[%s913_s19 + $0x38] sm:$0x3] }
  0x17   : > { %v282_v45 = vadd.f32 %v252_v39, %v197_v26  ;;  %v329_v46 = vsel %vm326_vm1, %v327_v32, %v328_v35  ;;  %v424_v48 = vrot.slane %v392_v37, 1  ;;  %v563_v51 = vmul.f32 %v935_v24, %v954_v43 }
  0x18   : > { %v499_v49 = vrot.slane %v467_v41, 2  ;;  %v500_v50 = vrot.slane %v468_v42, 2  ;;  %v564_v52 = vmul.f32 %v935_v24, %v957_v44  ;;  %v543_v54 = vmul.f32 %v929_v19, %v954_v43 }
  0x19   : > { %v359_v53 = vadd.f32 %v329_v46, %v282_v45  ;;  %v639_v55 = vmul.f32 %v948_v38, %v954_v43  ;;  %v640_v56 = vmul.f32 %v948_v38, %v957_v44  ;;  %v425_v57 = vsel %vm249_vm0, %v423_v40, %v424_v48  ;;  %v1010_v46 = vld [vmem:[%s1314_s2] ss:$0 sm:$0xff] }
  0x1a   : > { %v595_v58 = vrot.slane %v563_v51, 1  ;;  %v596_v59 = vrot.slane %v564_v52, 1  ;;  %v742_v60 = vrot.slane %v173_v25, 1  ;;  %v743_v0 = vrot.slane %v174_v20, 1 }
  0x1b   : > { %v379_v61 = vadd.f32 %v371_v36, %v359_v53  ;;  %v671_v62 = vrot.slane %v639_v55, 2  ;;  %v672_v63 = vrot.slane %v640_v56, 2  ;;  %v501_v1 = vsel %vm326_vm1, %v499_v49, %v500_v50 }
  0x1c   : > { %v597_v2 = vsel %vm249_vm0, %v595_v58, %v596_v59  ;;  %v219_v3 = vmul.f32 %v917_v12, %v173_v25  ;;  %v296_v4 = vmul.f32 %v919_v13, %v173_v25  ;;  %v744_v7 = vsel %vm249_vm0, %v742_v60, %v743_v0 }
  0x1d   : > { %v455_v5 = vadd.f32 %v425_v57, %v379_v61  ;;  %v673_v6 = vsel %vm326_vm1, %v671_v62, %v672_v63  ;;  %v198_v8 = vmul.f32 %v915_v11, %v173_v25  ;;  %v393_v14 = vmul.f32 %v925_v17, %v954_v43 }
  0x1e   : > { %v253_v9 = vrot.slane %v219_v3, 1  ;;  %v330_v10 = vrot.slane %v296_v4, 2  ;;  %v394_v15 = vmul.f32 %v925_v17, %v957_v44  ;;  %v372_v21 = vmul.f32 %v923_v16, %v954_v43 }
  0x1f   : > { %v531_v20 = vadd.f32 %v501_v1, %v455_v5  ;;  %v469_v22 = vmul.f32 %v927_v18, %v954_v43  ;;  %v470_v23 = vmul.f32 %v927_v18, %v957_v44  ;;  %v426_v27 = vrot.slane %v393_v14, 1 }
  0x20   : > { %v255_v25 = vsel %vm249_vm0, %v253_v9, %v254_v34  ;;  %v332_v26 = vsel %vm326_vm1, %v330_v10, %v331_v47  ;;  %v427_v28 = vrot.slane %v394_v15, 1  ;;  %v544_v36 = vmul.f32 %v929_v19, %v991_v30 }
  0x21   : > { %v551_v29 = vadd.f32 %v543_v54, %v531_v20  ;;  %v283_v32 = vadd.f32 %v255_v25, %v198_v8  ;;  %v502_v33 = vrot.slane %v469_v22, 2  ;;  %v503_v35 = vrot.slane %v470_v23, 2 }
  0x22   : > { %v565_v37 = vmul.f32 %v935_v24, %v991_v30  ;;  %v566_v34 = vmul.f32 %v935_v24, %v994_v31  ;;  %v641_v39 = vmul.f32 %v948_v38, %v991_v30  ;;  %v428_v42 = vsel %vm249_vm0, %v426_v27, %v427_v28  ;;  %v1053_v27 = vld [vmem:[%s913_s19 + $0x48] sm:$0x3] }
  0x23   : > { %v627_v40 = vadd.f32 %v597_v2, %v551_v29  ;;  %v360_v41 = vadd.f32 %v332_v26, %v283_v32  ;;  %v642_v45 = vmul.f32 %v948_v38, %v994_v31  ;;  %v504_v47 = vsel %vm326_vm1, %v502_v33, %v503_v35 }
  0x24   : > { %v598_v48 = vrot.slane %v565_v37, 1  ;;  %v599_v49 = vrot.slane %v566_v34, 1  ;;  %v674_v50 = vrot.slane %v641_v39, 2  ;;  %v745_v54 = vrot.slane %v954_v43, 1 }
  0x25   : > { %v703_v51 = vadd.f32 %v673_v6, %v627_v40  ;;  %v380_v52 = vadd.f32 %v372_v21, %v360_v41  ;;  %v675_v53 = vrot.slane %v642_v45, 2  ;;  %v746_v56 = vrot.slane %v957_v44, 1  ;;  %v1047_v21 = vld [vmem:[%s913_s19 + $0x40] sm:$0xff] }
  0x26   : > { %v600_v55 = vsel %vm249_vm0, %v598_v48, %v599_v49  ;;  %v221_v57 = vmul.f32 %v917_v12, %v954_v43  ;;  %v222_v58 = vmul.f32 %v917_v12, %v957_v44  ;;  %v199_v62 = vmul.f32 %v915_v11, %v954_v43 }
  0x27   : > { %v718_v59 = vadd.f32 %v1010_v46, %v703_v51  ;;  %v456_v60 = vadd.f32 %v428_v42, %v380_v52  ;;  %v676_v61 = vsel %vm326_vm1, %v674_v50, %v675_v53  ;;  %v298_v1 = vmul.f32 %v919_v13, %v954_v43 }
  0x28   : > { %v256_v63 = vrot.slane %v221_v57, 1  ;;  %v257_v0 = vrot.slane %v222_v58, 1  ;;  %v299_v2 = vmul.f32 %v919_v13, %v957_v44  ;;  %v373_v5 = vmul.f32 %v923_v16, %v991_v30 }
  0x29   : > { %v774_v3 = vadd.f32 %v744_v7, %v718_v59  ;;  %v532_v4 = vadd.f32 %v504_v47, %v456_v60  ;;  %v395_v6 = vmul.f32 %v925_v17, %v991_v30  ;;  %v333_v9 = vrot.slane %v298_v1, 2 }
  0x2a   : > { %v258_v8 = vsel %vm249_vm0, %v256_v63, %v257_v0  ;;  %v334_v10 = vrot.slane %v299_v2, 2  ;;  %v396_v43 = vmul.f32 %v925_v17, %v994_v31  ;;  %v471_v15 = vmul.f32 %v927_v18, %v991_v30 }
  0x2b   : > { %783 = vst.msk [vmem:[%s1028_s27] sm:$0xff] %vm782_vm2, %v774_v3  ;;  %v552_v14 = vadd.f32 %v544_v36, %v532_v4  ;;  %v284_v44 = vadd.f32 %v258_v8, %v199_v62  ;;  %v429_v7 = vrot.slane %v395_v6, 1  ;;  %v747_v20 = vsel %vm249_vm0, %v745_v54, %v746_v56 }
  0x2c   : > { %v335_v22 = vsel %vm326_vm1, %v333_v9, %v334_v10  ;;  %v430_v23 = vrot.slane %v396_v43, 1  ;;  %v472_v25 = vmul.f32 %v927_v18, %v994_v31  ;;  %v505_v29 = vrot.slane %v471_v15, 2 }
  0x2d   : > { %v628_v26 = vadd.f32 %v600_v55, %v552_v14  ;;  %v361_v28 = vadd.f32 %v335_v22, %v284_v44  ;;  %v567_v32 = vmul.f32 %v935_v24, %v1047_v21  ;;  %v568_v36 = vmul.f32 %v935_v24, %v1053_v27  ;;  %v1095_v44 = vld [vmem:[%s913_s19 + $0x50] sm:$0xff] }
  0x2e   : > { %v431_v33 = vsel %vm249_vm0, %v429_v7, %v430_v23  ;;  %v506_v35 = vrot.slane %v472_v25, 2  ;;  %v643_v37 = vmul.f32 %v948_v38, %v1047_v21  ;;  %v644_v41 = vmul.f32 %v948_v38, %v1053_v27  ;;  %v1101_v23 = vld [vmem:[%s913_s19 + $0x58] sm:$0x3] }
  0x2f   : > { %v704_v34 = vadd.f32 %v676_v61, %v628_v26  ;;  %v381_v39 = vadd.f32 %v373_v5, %v361_v28  ;;  %v601_v40 = vrot.slane %v567_v32, 1  ;;  %v545_v45 = vmul.f32 %v929_v19, %v1047_v21 }
  0x30   : > { %v507_v42 = vsel %vm326_vm1, %v505_v29, %v506_v35  ;;  %v602_v47 = vrot.slane %v568_v36, 1  ;;  %v677_v48 = vrot.slane %v643_v37, 2  ;;  %v678_v51 = vrot.slane %v644_v41, 2 }
  0x31   : > { %v719_v49 = vadd.f32 %v1010_v46, %v704_v34  ;;  %v457_v50 = vadd.f32 %v431_v33, %v381_v39  ;;  %v748_v52 = vrot.slane %v991_v30, 1  ;;  %v749_v54 = vrot.slane %v994_v31, 1 }
  0x32   : > { %v603_v53 = vsel %vm249_vm0, %v601_v40, %v602_v47  ;;  %v223_v55 = vmul.f32 %v917_v12, %v991_v30  ;;  %v224_v56 = vmul.f32 %v917_v12, %v994_v31  ;;  %v679_v59 = vsel %vm326_vm1, %v677_v48, %v678_v51 }
  0x33   : > { %v775_v57 = vadd.f32 %v747_v20, %v719_v49  ;;  %v533_v58 = vadd.f32 %v507_v42, %v457_v50  ;;  %v200_v60 = vmul.f32 %v915_v11, %v991_v30  ;;  %v300_v63 = vmul.f32 %v919_v13, %v991_v30 }
  0x34   : > { %v259_v61 = vrot.slane %v223_v55, 1  ;;  %v260_v62 = vrot.slane %v224_v56, 1  ;;  %v301_v0 = vmul.f32 %v919_v13, %v994_v31  ;;  %v374_v2 = vmul.f32 %v923_v16, %v1047_v21 }
  0x35   : > { %784 = vst.msk [vmem:[%s1028_s27 + $0x8] sm:$0xff] %vm782_vm2, %v775_v57  ;;  %v553_v1 = vadd.f32 %v545_v45, %v533_v58  ;;  %v397_v3 = vmul.f32 %v925_v17, %v1047_v21  ;;  %v398_v4 = vmul.f32 %v925_v17, %v1053_v27  ;;  %v336_v30 = vrot.slane %v300_v63, 2 }
  0x36   : > { %v261_v5 = vsel %vm249_vm0, %v259_v61, %v260_v62  ;;  %v337_v6 = vrot.slane %v301_v0, 2  ;;  %v473_v31 = vmul.f32 %v927_v18, %v1047_v21  ;;  %v750_v14 = vsel %vm249_vm0, %v748_v52, %v749_v54 }
  0x37   : > { %v629_v8 = vadd.f32 %v603_v53, %v553_v1  ;;  %v285_v9 = vadd.f32 %v261_v5, %v200_v60  ;;  %v432_v10 = vrot.slane %v397_v3, 1  ;;  %v433_v43 = vrot.slane %v398_v4, 1 }
  0x38   : > { %v338_v7 = vsel %vm326_vm1, %v336_v30, %v337_v6  ;;  %v474_v15 = vmul.f32 %v927_v18, %v1053_v27  ;;  %v508_v20 = vrot.slane %v473_v31, 2  ;;  %v569_v28 = vmul.f32 %v935_v24, %v1095_v44  ;;  %v1144_v30 = vld [vmem:[%s913_s19 + $0x60] sm:$0xff] }
  0x39   : > { %v705_v22 = vadd.f32 %v679_v59, %v629_v8  ;;  %v362_v25 = vadd.f32 %v338_v7, %v285_v9  ;;  %v434_v26 = vsel %vm249_vm0, %v432_v10, %v433_v43  ;;  %v570_v32 = vmul.f32 %v935_v24, %v1101_v23  ;;  %v1149_v10 = vld [vmem:[%s913_s19 + $0x68] sm:$0x3] }
  0x3a   : > { %v509_v29 = vrot.slane %v474_v15, 2  ;;  %v645_v33 = vmul.f32 %v948_v38, %v1095_v44  ;;  %v646_v35 = vmul.f32 %v948_v38, %v1101_v23  ;;  %v546_v34 = vmul.f32 %v929_v19, %v1095_v44 }
  0x3b   : > { %v720_v36 = vadd.f32 %v1010_v46, %v705_v22  ;;  %v382_v37 = vadd.f32 %v374_v2, %v362_v25  ;;  %v604_v39 = vrot.slane %v569_v28, 1  ;;  %v605_v41 = vrot.slane %v570_v32, 1 }
  0x3c   : > { %v510_v40 = vsel %vm326_vm1, %v508_v20, %v509_v29  ;;  %v680_v42 = vrot.slane %v645_v33, 2  ;;  %v681_v45 = vrot.slane %v646_v35, 2  ;;  %v751_v49 = vrot.slane %v1047_v21, 1 }
  0x3d   : > { %v776_v47 = vadd.f32 %v750_v14, %v720_v36  ;;  %v458_v48 = vadd.f32 %v434_v26, %v382_v37  ;;  %v752_v50 = vrot.slane %v1053_v27, 1  ;;  %v606_v51 = vsel %vm249_vm0, %v604_v39, %v605_v41 }
  0x3e   : > { %v201_v52 = vmul.f32 %v915_v11, %v1047_v21  ;;  %v225_v53 = vmul.f32 %v917_v12, %v1047_v21  ;;  %v226_v54 = vmul.f32 %v917_v12, %v1053_v27  ;;  %v682_v56 = vsel %vm326_vm1, %v680_v42, %v681_v45 }
  0x3f   : > { %785 = vst.msk [vmem:[%s1028_s27 + $0x10] sm:$0xff] %vm782_vm2, %v776_v47  ;;  %v534_v55 = vadd.f32 %v510_v40, %v458_v48  ;;  %v302_v57 = vmul.f32 %v919_v13, %v1047_v21  ;;  %v303_v58 = vmul.f32 %v919_v13, %v1053_v27  ;;  %v375_v61 = vmul.f32 %v923_v16, %v1095_v44 }
  0x40   : > { %v262_v59 = vrot.slane %v225_v53, 1  ;;  %v263_v60 = vrot.slane %v226_v54, 1  ;;  %v399_v62 = vmul.f32 %v925_v17, %v1095_v44  ;;  %v400_v2 = vmul.f32 %v925_v17, %v1101_v23 }
  0x41   : > { %v554_v63 = vadd.f32 %v546_v34, %v534_v55  ;;  %v339_v0 = vrot.slane %v302_v57, 2  ;;  %v340_v1 = vrot.slane %v303_v58, 2  ;;  %v475_v27 = vmul.f32 %v927_v18, %v1095_v44 }
  0x42   : > { %v264_v21 = vsel %vm249_vm0, %v262_v59, %v263_v60  ;;  %v435_v3 = vrot.slane %v399_v62, 1  ;;  %v476_v4 = vmul.f32 %v927_v18, %v1101_v23  ;;  %v436_v8 = vrot.slane %v400_v2, 1 }
  0x43   : > { %v630_v5 = vadd.f32 %v606_v51, %v554_v63  ;;  %v286_v6 = vadd.f32 %v264_v21, %v201_v52  ;;  %v341_v31 = vsel %vm326_vm1, %v339_v0, %v340_v1  ;;  %v753_v9 = vsel %vm249_vm0, %v751_v49, %v752_v50 }
  0x44   : > { %v511_v43 = vrot.slane %v475_v27, 2  ;;  %v512_v14 = vrot.slane %v476_v4, 2  ;;  %v571_v7 = vmul.f32 %v935_v24, %v1144_v30  ;;  %v547_v22 = vmul.f32 %v929_v19, %v1144_v30  ;;  %v1196_v27 = vld [vmem:[%s913_s19 + $0x78] sm:$0x3] }
  0x45   : > { %v706_v15 = vadd.f32 %v682_v56, %v630_v5  ;;  %v363_v20 = vadd.f32 %v341_v31, %v286_v6  ;;  %v572_v25 = vmul.f32 %v935_v24, %v1149_v10  ;;  %v437_v26 = vsel %vm249_vm0, %v435_v3, %v436_v8  ;;  %v1193_v3 = vld [vmem:[%s913_s19 + $0x70] sm:$0xff] }
  0x46   : > { %v607_v28 = vrot.slane %v571_v7, 1  ;;  %v647_v29 = vmul.f32 %v948_v38, %v1144_v30  ;;  %v648_v32 = vmul.f32 %v948_v38, %v1149_v10  ;;  %v754_v37 = vrot.slane %v1095_v44, 1 }
  0x47   : > { %v721_v33 = vadd.f32 %v1010_v46, %v706_v15  ;;  %v383_v35 = vadd.f32 %v375_v61, %v363_v20  ;;  %v608_v36 = vrot.slane %v572_v25, 1  ;;  %v513_v34 = vsel %vm326_vm1, %v511_v43, %v512_v14 }
  0x48   : > { %v683_v39 = vrot.slane %v647_v29, 2  ;;  %v684_v40 = vrot.slane %v648_v32, 2  ;;  %v755_v41 = vrot.slane %v1101_v23, 1  ;;  %v202_v47 = vmul.f32 %v915_v11, %v1095_v44 }
  0x49   : > { %v777_v42 = vadd.f32 %v753_v9, %v721_v33  ;;  %v459_v45 = vadd.f32 %v437_v26, %v383_v35  ;;  %v227_v48 = vmul.f32 %v917_v12, %v1095_v44  ;;  %v609_v49 = vsel %vm249_vm0, %v607_v28, %v608_v36 }
  0x4a   : > { %v685_v50 = vsel %vm326_vm1, %v683_v39, %v684_v40  ;;  %v228_v51 = vmul.f32 %v917_v12, %v1101_v23  ;;  %v304_v52 = vmul.f32 %v919_v13, %v1095_v44  ;;  %v756_v54 = vsel %vm249_vm0, %v754_v37, %v755_v41 }
  0x4b   : > { %786 = vst.msk [vmem:[%s1028_s27 + $0x18] sm:$0xff] %vm782_vm2, %v777_v42  ;;  %v535_v53 = vadd.f32 %v513_v34, %v459_v45  ;;  %v265_v55 = vrot.slane %v227_v48, 1  ;;  %v305_v56 = vmul.f32 %v919_v13, %v1101_v23  ;;  %v401_v59 = vmul.f32 %v925_v17, %v1144_v30 }
  0x4c   : > { %v266_v57 = vrot.slane %v228_v51, 1  ;;  %v342_v58 = vrot.slane %v304_v52, 2  ;;  %v402_v60 = vmul.f32 %v925_v17, %v1149_v10  ;;  %v477_v62 = vmul.f32 %v927_v18, %v1144_v30 }
  0x4d   : > { %v555_v44 = vadd.f32 %v547_v22, %v535_v53  ;;  %v343_v61 = vrot.slane %v305_v56, 2  ;;  %v478_v63 = vmul.f32 %v927_v18, %v1149_v10  ;;  %v376_v23 = vmul.f32 %v923_v16, %v1144_v30 }
  0x4e   : > { %v267_v0 = vsel %vm249_vm0, %v265_v55, %v266_v57  ;;  %v438_v1 = vrot.slane %v401_v59, 1  ;;  %v439_v2 = vrot.slane %v402_v60, 1  ;;  %v514_v6 = vrot.slane %v477_v62, 2 }
  0x4f   : > { %v631_v21 = vadd.f32 %v609_v49, %v555_v44  ;;  %v287_v4 = vadd.f32 %v267_v0, %v202_v47  ;;  %v344_v5 = vsel %vm326_vm1, %v342_v58, %v343_v61  ;;  %v515_v31 = vrot.slane %v478_v63, 2  ;;  %v1240_v44 = vld [vmem:[%s913_s19 + $0x80] sm:$0xff] }
  0x50   : > { %v548_v8 = vmul.f32 %v929_v19, %v1193_v3  ;;  %v573_v9 = vmul.f32 %v935_v24, %v1193_v3  ;;  %v574_v43 = vmul.f32 %v935_v24, %v1196_v27  ;;  %v649_v15 = vmul.f32 %v948_v38, %v1193_v3 }
  0x51   : > { %v707_v14 = vadd.f32 %v685_v50, %v631_v21  ;;  %v364_v7 = vadd.f32 %v344_v5, %v287_v4  ;;  %v650_v20 = vmul.f32 %v948_v38, %v1196_v27  ;;  %v440_v22 = vsel %vm249_vm0, %v438_v1, %v439_v2  ;;  %v1245_v2 = vld [vmem:[%s913_s19 + $0x88] sm:$0x3] }
  0x52   : > { %v516_v25 = vsel %vm326_vm1, %v514_v6, %v515_v31  ;;  %v610_v26 = vrot.slane %v573_v9, 1  ;;  %v611_v28 = vrot.slane %v574_v43, 1  ;;  %v686_v33 = vrot.slane %v649_v15, 2 }
  0x53   : > { %v722_v29 = vadd.f32 %v1010_v46, %v707_v14  ;;  %v384_v32 = vadd.f32 %v376_v23, %v364_v7  ;;  %v687_v35 = vrot.slane %v650_v20, 2  ;;  %v757_v37 = vrot.slane %v1144_v30, 1 }
  0x54   : > { %v612_v36 = vsel %vm249_vm0, %v610_v26, %v611_v28  ;;  %v758_v34 = vrot.slane %v1149_v10, 1  ;;  %v229_v39 = vmul.f32 %v917_v12, %v1144_v30  ;;  %v203_v42 = vmul.f32 %v915_v11, %v1144_v30 }
  0x55   : > { %v778_v40 = vadd.f32 %v756_v54, %v722_v29  ;;  %v460_v41 = vadd.f32 %v440_v22, %v384_v32  ;;  %v230_v45 = vmul.f32 %v917_v12, %v1149_v10  ;;  %v688_v47 = vsel %vm326_vm1, %v686_v33, %v687_v35 }
  0x56   : > { %v268_v48 = vrot.slane %v229_v39, 1  ;;  %v306_v49 = vmul.f32 %v919_v13, %v1144_v30  ;;  %v307_v50 = vmul.f32 %v919_v13, %v1149_v10  ;;  %v377_v53 = vmul.f32 %v923_v16, %v1193_v3 }
  0x57   : > { %787 = vst.msk [vmem:[%s1028_s27 + $0x20] sm:$0xff] %vm782_vm2, %v778_v40  ;;  %v536_v51 = vadd.f32 %v516_v25, %v460_v41  ;;  %v269_v52 = vrot.slane %v230_v45, 1  ;;  %v403_v54 = vmul.f32 %v925_v17, %v1193_v3  ;;  %v404_v57 = vmul.f32 %v925_v17, %v1196_v27 }
  0x58   : > { %v345_v55 = vrot.slane %v306_v49, 2  ;;  %v346_v56 = vrot.slane %v307_v50, 2  ;;  %v479_v30 = vmul.f32 %v927_v18, %v1193_v3  ;;  %v480_v60 = vmul.f32 %v927_v18, %v1196_v27 }
  0x59   : > { %v556_v10 = vadd.f32 %v548_v8, %v536_v51  ;;  %v270_v58 = vsel %vm249_vm0, %v268_v48, %v269_v52  ;;  %v441_v59 = vrot.slane %v403_v54, 1  ;;  %v442_v63 = vrot.slane %v404_v57, 1 }
  0x5a   : > { %v288_v61 = vadd.f32 %v270_v58, %v203_v42  ;;  %v347_v62 = vsel %vm326_vm1, %v345_v55, %v346_v56  ;;  %v517_v0 = vrot.slane %v479_v30, 2  ;;  %v759_v1 = vsel %vm249_vm0, %v757_v37, %v758_v34 }
  0x5b   : > { %v632_v23 = vadd.f32 %v612_v36, %v556_v10  ;;  %v518_v21 = vrot.slane %v480_v60, 2  ;;  %v575_v4 = vmul.f32 %v935_v24, %v1240_v44  ;;  %v549_v6 = vmul.f32 %v929_v19, %v1240_v44 }
  0x5c   : > { %v365_v5 = vadd.f32 %v347_v62, %v288_v61  ;;  %v576_v31 = vmul.f32 %v935_v24, %v1245_v2  ;;  %v651_v8 = vmul.f32 %v948_v38, %v1240_v44  ;;  %v443_v43 = vsel %vm249_vm0, %v441_v59, %v442_v63 }
  0x5d   : > { %v708_v9 = vadd.f32 %v688_v47, %v632_v23  ;;  %v613_v14 = vrot.slane %v575_v4, 1  ;;  %v652_v7 = vmul.f32 %v948_v38, %v1245_v2  ;;  %v519_v20 = vsel %vm326_vm1, %v517_v0, %v518_v21 }
  0x5e   : > { %v385_v15 = vadd.f32 %v377_v53, %v365_v5  ;;  %v614_v22 = vrot.slane %v576_v31, 1  ;;  %v689_v25 = vrot.slane %v651_v8, 2  ;;  %v760_v29 = vrot.slane %v1193_v3, 1 }
  0x5f   : > { %v723_v26 = vadd.f32 %v1010_v46, %v708_v9  ;;  %v690_v28 = vrot.slane %v652_v7, 2  ;;  %v761_v32 = vrot.slane %v1196_v27, 1  ;;  %v204_v35 = vmul.f32 %v915_v11, %v1193_v3 }
  0x60   : > { %v461_v33 = vadd.f32 %v443_v43, %v385_v15  ;;  %v231_v36 = vmul.f32 %v917_v12, %v1193_v3  ;;  %v232_v37 = vmul.f32 %v917_v12, %v1196_v27  ;;  %v615_v39 = vsel %vm249_vm0, %v613_v14, %v614_v22 }
  0x61   : > { %v779_v34 = vadd.f32 %v759_v1, %v723_v26  ;;  %v691_v40 = vsel %vm326_vm1, %v689_v25, %v690_v28  ;;  %v308_v41 = vmul.f32 %v919_v13, %v1193_v3  ;;  %v309_v11 = vmul.f32 %v919_v13, %v1196_v27  ;;  %v189_v3 = vld [vmem:[%s913_s19 + $0x90] sm:$0xff]  ;;  %v190_v27 = vld [vmem:[%s913_s19 + $0x98] sm:$0x3] }
  0x62   : > { %v537_v42 = vadd.f32 %v519_v20, %v461_v33  ;;  %v271_v45 = vrot.slane %v231_v36, 1  ;;  %v272_v47 = vrot.slane %v232_v37, 1  ;;  %v378_v12 = vmul.f32 %v923_v16, %v1240_v44 }
  0x63   : > { %788 = vst.msk [vmem:[%s1028_s27 + $0x28] sm:$0xff] %vm782_vm2, %v779_v34  ;;  %v348_v48 = vrot.slane %v308_v41, 2  ;;  %v405_v49 = vmul.f32 %v925_v17, %v1240_v44  ;;  %v406_v50 = vmul.f32 %v925_v17, %v1245_v2  ;;  %v349_v53 = vrot.slane %v309_v11, 2 }
  0x64   : > { %v557_v51 = vadd.f32 %v549_v6, %v537_v42  ;;  %v273_v52 = vsel %vm249_vm0, %v271_v45, %v272_v47  ;;  %v481_v13 = vmul.f32 %v927_v18, %v1240_v44  ;;  %v482_v16 = vmul.f32 %v927_v18, %v1245_v2 }
  0x65   : > { %v289_v54 = vadd.f32 %v273_v52, %v204_v35  ;;  %v444_v55 = vrot.slane %v405_v49, 1  ;;  %v445_v56 = vrot.slane %v406_v50, 1  ;;  %v350_v30 = vsel %vm326_vm1, %v348_v48, %v349_v53 }
  0x66   : > { %v633_v57 = vadd.f32 %v615_v39, %v557_v51  ;;  %v520_v10 = vrot.slane %v481_v13, 2  ;;  %v521_v59 = vrot.slane %v482_v16, 2  ;;  %v577_v60 = vmul.f32 %v935_v24, %v189_v3 }
  0x67   : > { %v366_v17 = vadd.f32 %v350_v30, %v289_v54  ;;  %v446_v58 = vsel %vm249_vm0, %v444_v55, %v445_v56  ;;  %v578_v62 = vmul.f32 %v935_v24, %v190_v27  ;;  %v653_v63 = vmul.f32 %v948_v38, %v189_v3 }
  0x68   : > { %v709_v61 = vadd.f32 %v691_v40, %v633_v57  ;;  %v654_v0 = vmul.f32 %v948_v38, %v190_v27  ;;  %v762_v18 = vsel %vm249_vm0, %v760_v29, %v761_v32  ;;  %v522_v21 = vsel %vm326_vm1, %v520_v10, %v521_v59 }
  0x69   : > { %v386_v23 = vadd.f32 %v378_v12, %v366_v17  ;;  %v616_v4 = vrot.slane %v577_v60, 1  ;;  %v617_v5 = vrot.slane %v578_v62, 1  ;;  %v550_v31 = vmul.f32 %v929_v19, %v189_v3 }
  0x6a   : > { %v724_v1 = vadd.f32 %v1010_v46, %v709_v61  ;;  %v692_v9 = vrot.slane %v653_v63, 2  ;;  %v693_v24 = vrot.slane %v654_v0, 2  ;;  %v763_v15 = vrot.slane %v1240_v44, 1 }
  0x6b   : > { %v462_v6 = vadd.f32 %v446_v58, %v386_v23  ;;  %v618_v38 = vsel %vm249_vm0, %v616_v4, %v617_v5  ;;  %v764_v20 = vrot.slane %v1245_v2, 1 }
  0x6c   : > { %v780_v8 = vadd.f32 %v762_v18, %v724_v1  ;;  %v694_v7 = vsel %vm326_vm1, %v692_v9, %v693_v24 }
  0x6d   : > { %v538_v43 = vadd.f32 %v522_v21, %v462_v6  ;;  %v765_v19 = vsel %vm249_vm0, %v763_v15, %v764_v20 }
  0x6e   : > { %789 = vst.msk [vmem:[%s1028_s27 + $0x30] sm:$0xff] %vm782_vm2, %v780_v8 }
  0x6f   : > { %v558_v14 = vadd.f32 %v550_v31, %v538_v43 }
  0x71   : > { %v634_v22 = vadd.f32 %v618_v38, %v558_v14 }
  0x73   : > { %v710_v25 = vadd.f32 %v694_v7, %v634_v22 }
  0x75   : > { %v725_v26 = vadd.f32 %v1010_v46, %v710_v25 }
  0x77   : > { %v781_v28 = vadd.f32 %v765_v19, %v725_v26 }
  0x79   : > { %790 = vst.msk [vmem:[%s1028_s27 + $0x38] sm:$0xff] %vm782_vm2, %v781_v28 }
  0x7a PF: > { %s13_s12 = sadd.s32 1, %s874_s12  }
  0x7b   : > { %p10_p4 = scmp.ge.s32.totalorder %s13_s12, 4  }
  0x7d   :  { %12 = sbr.rel (!%p10_p4) target bundleno = 1 (0x1), region = 62 }

// kernel: _lambda_.11
= control target key start
LH: loop header
LB: loop body
LE: loop exit
PB: predicated region body
PF: predicated region fallthrough
CT: control target
= control target key end

     0   :  { %s840_s12 = smov 0   ;;  %s1220_s0 = inlined_call_operand.vmem [shape: f32[2,10,10,8], index: 0, kind: input, shape index: {}]   ;;  %s1221_s1 = inlined_call_operand.vmem [shape: f32[9,8], index: 1, kind: input, shape index: {}]   ;;  %s1222_s2 = inlined_call_operand.vmem [shape: f32[1,8], index: 2, kind: input, shape index: {}]   ;;  %s1223_s3 = inlined_call_operand.vmem [shape: f32[2,8,8,8], index: 3, kind: output, shape index: {}]  }
   0x1 LB: > { %s790_s13 = sadd.s32 4294967295, %s818_s12   ;;  %p794_p0 = scmp.ge.s32.totalorder %s818_s12, 1  ;;  %s818_s12 = sphi %s840_s12, %s13_s12  }
   0x2   : > { %p137_p1 = scmp.lt.s32.totalorder %s818_s12, 3 }
   0x4   : > { %p138_p2 = pnand %p794_p0, %p137_p1 }
   0x5   : > { %p161_p3 = scmp.lt.s32.totalorder (!%p138_p2), %s790_s13, 1  ;;  %v193_v0 = vlaneseq (!%p138_p2)  ;;  %v191_v2 = vld [vmem:[%s1221_s1] sm:$0xff] (!%p138_p2)  ;;  %vm249_vm0 = vcmask (!%p138_p2), 1046528   ;;  %vm326_vm1 = vcmask (!%p138_p2), 1045504   ;;  %v894_v36 = vld [vmem:[%s1221_s1 + $0x8] ss:$0 sm:$0xff] (!%p138_p2) }
   0x6   : > { %141 = sbr.rel (%p138_p2) target bundleno = 114 (0x72), region = 32  ;;  %vm726_vm2 = vcmask (!%p138_p2), 64512  }
   0x7   : > { %v194_v1 = vshrl.u32 (!%p138_p2), %v193_v0, 7 }
   0x9   : > { %v195_v3 = vsub.s32 (!%p138_p2), 0, %v194_v1  ;;  %v215_v4 = vsub.s32 (!%p138_p2), 1, %v194_v1  ;;  %v292_v5 = vsub.s32 (!%p138_p2), 2, %v194_v1  ;;  %v369_v6 = vsub.s32 (!%p138_p2), 3, %v194_v1 }
   0xa   : > { %v389_v7 = vsub.s32 (!%p138_p2), 4, %v194_v1  ;;  %v465_v8 = vsub.s32 (!%p138_p2), 5, %v194_v1  ;;  %v541_v9 = vsub.s32 (!%p138_p2), 6, %v194_v1  ;;  %v561_v10 = vsub.s32 (!%p138_p2), 7, %v194_v1 }
   0xb   : > { %v859_v11 = vrot.slane (!%p138_p2), %v191_v2, %v195_v3  ;;  %v861_v12 = vrot.slane (!%p138_p2), %v191_v2, %v215_v4  ;;  %v863_v13 = vrot.slane (!%p138_p2), %v191_v2, %v292_v5  ;;  %v865_v14 = vrot.slane (!%p138_p2), %v191_v2, %v369_v6 }
   0xc   : > { %v869_v17 = vrot.slane (!%p138_p2), %v191_v2, %v389_v7  ;;  %v871_v18 = vrot.slane (!%p138_p2), %v191_v2, %v465_v8  ;;  %v873_v19 = vrot.slane (!%p138_p2), %v191_v2, %v541_v9  ;;  %v875_v20 = vrot.slane (!%p138_p2), %v191_v2, %v561_v10 }
   0xd   : > { %s1225_s13 = smov (!%p161_p3, %s790_s13), 1 }
   0xe   : > { %s803_s16 = smul.u32 160, %s1225_s13  ;;  %s802_s22 = sshll.u32 %s1225_s13, 6 }
   0xf   : > { %s967_s27 = scalar_lea.vmem %s1223_s3, %s802_s22 }
  0x10   : > { %s857_s19 = scalar_lea.vmem %s1220_s0, %s803_s16 }
  0x11   : > { %v171_v15 = vld [vmem:[%s857_s19] sm:$0xff]  ;;  %v172_v16 = vld [vmem:[%s857_s19 + $0x8] sm:$0x3]  ;;  %v173_v21 = vld [vmem:[%s857_s19 + $0x10] sm:$0xff] }
  0x12   : > { %v174_v22 = vld [vmem:[%s857_s19 + $0x18] sm:$0x3]  ;;  %v197_v23 = vmul.f32 %v859_v11, %v171_v15  ;;  %v217_v24 = vmul.f32 %v861_v12, %v171_v15  ;;  %v218_v25 = vmul.f32 %v861_v12, %v172_v16  ;;  %v294_v26 = vmul.f32 %v863_v13, %v171_v15  ;;  %v889_v35 = vld [vmem:[%s857_s19 + $0x20] sm:$0xff]  ;;  %v903_v45 = vld [vmem:[%s857_s19 + $0x28] sm:$0x3] }
  0x13   : > { %v295_v27 = vmul.f32 %v863_v13, %v172_v16  ;;  %v371_v28 = vmul.f32 %v865_v14, %v173_v21  ;;  %v391_v29 = vmul.f32 %v869_v17, %v173_v21  ;;  %v392_v30 = vmul.f32 %v869_v17, %v174_v22 }
  0x14   : > { %v250_v31 = vrot.slane %v217_v24, 1  ;;  %v251_v32 = vrot.slane %v218_v25, 1  ;;  %v327_v33 = vrot.slane %v294_v26, 2  ;;  %v467_v34 = vmul.f32 %v871_v18, %v173_v21 }
  0x15   : > { %v328_v37 = vrot.slane %v295_v27, 2  ;;  %v423_v38 = vrot.slane %v391_v29, 1  ;;  %v424_v39 = vrot.slane %v392_v30, 1  ;;  %v468_v40 = vmul.f32 %v871_v18, %v174_v22  ;;  %v937_v27 = vld [vmem:[%s857_s19 + $0x38] sm:$0x3] }
  0x16   : > { %v252_v41 = vsel %vm249_vm0, %v250_v31, %v251_v32  ;;  %v499_v42 = vrot.slane %v467_v34, 2  ;;  %v543_v43 = vmul.f32 %v873_v19, %v889_v35  ;;  %v563_v44 = vmul.f32 %v875_v20, %v889_v35 }
  0x17   : > { %v282_v46 = vadd.f32 %v252_v41, %v197_v23  ;;  %v329_v47 = vsel %vm326_vm1, %v327_v33, %v328_v37  ;;  %v425_v48 = vsel %vm249_vm0, %v423_v38, %v424_v39  ;;  %v500_v49 = vrot.slane %v468_v40, 2  ;;  %v933_v23 = vld [vmem:[%s857_s19 + $0x30] sm:$0xff] }
  0x18   : > { %v564_v50 = vmul.f32 %v875_v20, %v903_v45  ;;  %v595_v51 = vrot.slane %v563_v44, 1  ;;  %v639_v52 = vmul.f32 %v894_v36, %v889_v35  ;;  %v640_v53 = vmul.f32 %v894_v36, %v903_v45 }
  0x19   : > { %v359_v54 = vadd.f32 %v329_v47, %v282_v46  ;;  %v501_v55 = vsel %vm326_vm1, %v499_v42, %v500_v49  ;;  %v198_v56 = vmul.f32 %v859_v11, %v173_v21  ;;  %v219_v57 = vmul.f32 %v861_v12, %v173_v21  ;;  %v955_v47 = vld [vmem:[%s1222_s2] ss:$0 sm:$0xff] }
  0x1a   : > { %v596_v58 = vrot.slane %v564_v50, 1  ;;  %v671_v59 = vrot.slane %v639_v52, 2  ;;  %v672_v60 = vrot.slane %v640_v53, 2  ;;  %v220_v61 = vmul.f32 %v861_v12, %v174_v22 }
  0x1b   : > { %v379_v62 = vadd.f32 %v371_v28, %v359_v54  ;;  %v253_v63 = vrot.slane %v219_v57, 1  ;;  %v296_v0 = vmul.f32 %v863_v13, %v173_v21  ;;  %v297_v1 = vmul.f32 %v863_v13, %v174_v22 }
  0x1c   : > { %v597_v2 = vsel %vm249_vm0, %v595_v51, %v596_v58  ;;  %v673_v3 = vsel %vm326_vm1, %v671_v59, %v672_v60  ;;  %v254_v4 = vrot.slane %v220_v61, 1  ;;  %v372_v5 = vmul.f32 %v865_v14, %v889_v35 }
  0x1d   : > { %v455_v6 = vadd.f32 %v425_v48, %v379_v62  ;;  %v330_v7 = vrot.slane %v296_v0, 2  ;;  %v331_v8 = vrot.slane %v297_v1, 2  ;;  %v393_v9 = vmul.f32 %v869_v17, %v889_v35 }
  0x1e   : > { %v255_v10 = vsel %vm249_vm0, %v253_v63, %v254_v4  ;;  %v394_v15 = vmul.f32 %v869_v17, %v903_v45  ;;  %v469_v16 = vmul.f32 %v871_v18, %v889_v35  ;;  %v470_v21 = vmul.f32 %v871_v18, %v903_v45 }
  0x1f   : > { %v531_v22 = vadd.f32 %v501_v55, %v455_v6  ;;  %v283_v24 = vadd.f32 %v255_v10, %v198_v56  ;;  %v332_v25 = vsel %vm326_vm1, %v330_v7, %v331_v8  ;;  %v426_v26 = vrot.slane %v393_v9, 1  ;;  %v989_v6 = vld [vmem:[%s857_s19 + $0x40] sm:$0xff] }
  0x20   : > { %v427_v28 = vrot.slane %v394_v15, 1  ;;  %v502_v29 = vrot.slane %v469_v16, 2  ;;  %v503_v30 = vrot.slane %v470_v21, 2  ;;  %v544_v31 = vmul.f32 %v873_v19, %v933_v23  ;;  %v993_v16 = vld [vmem:[%s857_s19 + $0x48] sm:$0x3] }
  0x21   : > { %v551_v32 = vadd.f32 %v543_v43, %v531_v22  ;;  %v360_v33 = vadd.f32 %v332_v25, %v283_v24  ;;  %v565_v34 = vmul.f32 %v875_v20, %v933_v23  ;;  %v566_v37 = vmul.f32 %v875_v20, %v937_v27 }
  0x22   : > { %v428_v38 = vsel %vm249_vm0, %v426_v26, %v427_v28  ;;  %v504_v39 = vsel %vm326_vm1, %v502_v29, %v503_v30  ;;  %v641_v40 = vmul.f32 %v894_v36, %v933_v23  ;;  %v642_v41 = vmul.f32 %v894_v36, %v937_v27 }
  0x23   : > { %v627_v42 = vadd.f32 %v597_v2, %v551_v32  ;;  %v380_v43 = vadd.f32 %v372_v5, %v360_v33  ;;  %v598_v44 = vrot.slane %v565_v34, 1  ;;  %v599_v46 = vrot.slane %v566_v37, 1 }
  0x24   : > { %v674_v48 = vrot.slane %v641_v40, 2  ;;  %v675_v49 = vrot.slane %v642_v41, 2  ;;  %v199_v50 = vmul.f32 %v859_v11, %v889_v35  ;;  %v221_v51 = vmul.f32 %v861_v12, %v889_v35 }
  0x25   : > { %v703_v52 = vadd.f32 %v673_v3, %v627_v42  ;;  %v456_v53 = vadd.f32 %v428_v38, %v380_v43  ;;  %v600_v54 = vsel %vm249_vm0, %v598_v44, %v599_v46  ;;  %v222_v55 = vmul.f32 %v861_v12, %v903_v45 }
  0x26   : > { %v676_v56 = vsel %vm326_vm1, %v674_v48, %v675_v49  ;;  %v256_v57 = vrot.slane %v221_v51, 1  ;;  %v298_v58 = vmul.f32 %v863_v13, %v889_v35  ;;  %v299_v59 = vmul.f32 %v863_v13, %v903_v45 }
  0x27   : > { %v718_v60 = vadd.f32 %v955_v47, %v703_v52  ;;  %v532_v61 = vadd.f32 %v504_v39, %v456_v53  ;;  %v257_v62 = vrot.slane %v222_v55, 1  ;;  %v373_v63 = vmul.f32 %v865_v14, %v933_v23 }
  0x28   : > { %v333_v0 = vrot.slane %v298_v58, 2  ;;  %v334_v1 = vrot.slane %v299_v59, 2  ;;  %v395_v2 = vmul.f32 %v869_v17, %v933_v23  ;;  %v396_v3 = vmul.f32 %v869_v17, %v937_v27  ;;  %v1027_v58 = vld [vmem:[%s857_s19 + $0x50] sm:$0xff] }
  0x29   : > { %727 = vst.msk [vmem:[%s967_s27] sm:$0xff] %vm726_vm2, %v718_v60  ;;  %v552_v35 = vadd.f32 %v544_v31, %v532_v61  ;;  %v258_v45 = vsel %vm249_vm0, %v256_v57, %v257_v62  ;;  %v471_v4 = vmul.f32 %v871_v18, %v933_v23  ;;  %v472_v5 = vmul.f32 %v871_v18, %v937_v27 }
  0x2a   : > { %v284_v7 = vadd.f32 %v258_v45, %v199_v50  ;;  %v335_v8 = vsel %vm326_vm1, %v333_v0, %v334_v1  ;;  %v429_v9 = vrot.slane %v395_v2, 1  ;;  %v430_v10 = vrot.slane %v396_v3, 1  ;;  %v1039_v1 = vld [vmem:[%s857_s19 + $0x58] sm:$0x3] }
  0x2b   : > { %v628_v15 = vadd.f32 %v600_v54, %v552_v35  ;;  %v505_v21 = vrot.slane %v471_v4, 2  ;;  %v506_v22 = vrot.slane %v472_v5, 2  ;;  %v545_v24 = vmul.f32 %v873_v19, %v989_v6 }
  0x2c   : > { %v361_v25 = vadd.f32 %v335_v8, %v284_v7  ;;  %v431_v26 = vsel %vm249_vm0, %v429_v9, %v430_v10  ;;  %v567_v28 = vmul.f32 %v875_v20, %v989_v6  ;;  %v568_v29 = vmul.f32 %v875_v20, %v993_v16 }
  0x2d   : > { %v704_v30 = vadd.f32 %v676_v56, %v628_v15  ;;  %v507_v31 = vsel %vm326_vm1, %v505_v21, %v506_v22  ;;  %v643_v32 = vmul.f32 %v894_v36, %v989_v6  ;;  %v644_v33 = vmul.f32 %v894_v36, %v993_v16 }
  0x2e   : > { %v381_v34 = vadd.f32 %v373_v63, %v361_v25  ;;  %v601_v37 = vrot.slane %v567_v28, 1  ;;  %v602_v38 = vrot.slane %v568_v29, 1  ;;  %v200_v39 = vmul.f32 %v859_v11, %v933_v23 }
  0x2f   : > { %v719_v40 = vadd.f32 %v955_v47, %v704_v30  ;;  %v677_v41 = vrot.slane %v643_v32, 2  ;;  %v678_v42 = vrot.slane %v644_v33, 2  ;;  %v223_v43 = vmul.f32 %v861_v12, %v933_v23 }
  0x30   : > { %v457_v44 = vadd.f32 %v431_v26, %v381_v34  ;;  %v603_v46 = vsel %vm249_vm0, %v601_v37, %v602_v38  ;;  %v224_v48 = vmul.f32 %v861_v12, %v937_v27  ;;  %v300_v49 = vmul.f32 %v863_v13, %v933_v23 }
  0x31   : > { %728 = vst.msk [vmem:[%s967_s27 + $0x8] sm:$0xff] %vm726_vm2, %v719_v40  ;;  %v679_v50 = vsel %vm326_vm1, %v677_v41, %v678_v42  ;;  %v259_v51 = vrot.slane %v223_v43, 1  ;;  %v301_v52 = vmul.f32 %v863_v13, %v937_v27  ;;  %v374_v53 = vmul.f32 %v865_v14, %v989_v6 }
  0x32   : > { %v533_v54 = vadd.f32 %v507_v31, %v457_v44  ;;  %v260_v55 = vrot.slane %v224_v48, 1  ;;  %v336_v56 = vrot.slane %v300_v49, 2  ;;  %v397_v57 = vmul.f32 %v869_v17, %v989_v6 }
  0x33   : > { %v337_v23 = vrot.slane %v301_v52, 2  ;;  %v398_v59 = vmul.f32 %v869_v17, %v993_v16  ;;  %v473_v60 = vmul.f32 %v871_v18, %v989_v6  ;;  %v474_v27 = vmul.f32 %v871_v18, %v993_v16 }
  0x34   : > { %v553_v61 = vadd.f32 %v545_v24, %v533_v54  ;;  %v261_v62 = vsel %vm249_vm0, %v259_v51, %v260_v55  ;;  %v432_v63 = vrot.slane %v397_v57, 1  ;;  %v546_v0 = vmul.f32 %v873_v19, %v1027_v58  ;;  %v1079_v55 = vld [vmem:[%s857_s19 + $0x60] sm:$0xff] }
  0x35   : > { %v285_v2 = vadd.f32 %v261_v62, %v200_v39  ;;  %v338_v3 = vsel %vm326_vm1, %v336_v56, %v337_v23  ;;  %v433_v35 = vrot.slane %v398_v59, 1  ;;  %v508_v45 = vrot.slane %v473_v60, 2  ;;  %v1083_v59 = vld [vmem:[%s857_s19 + $0x68] sm:$0x3] }
  0x36   : > { %v629_v4 = vadd.f32 %v603_v46, %v553_v61  ;;  %v509_v5 = vrot.slane %v474_v27, 2  ;;  %v569_v7 = vmul.f32 %v875_v20, %v1027_v58  ;;  %v570_v8 = vmul.f32 %v875_v20, %v1039_v1 }
  0x37   : > { %v362_v9 = vadd.f32 %v338_v3, %v285_v2  ;;  %v434_v10 = vsel %vm249_vm0, %v432_v63, %v433_v35  ;;  %v645_v15 = vmul.f32 %v894_v36, %v1027_v58  ;;  %v646_v21 = vmul.f32 %v894_v36, %v1039_v1 }
  0x38   : > { %v705_v22 = vadd.f32 %v679_v50, %v629_v4  ;;  %v510_v24 = vsel %vm326_vm1, %v508_v45, %v509_v5  ;;  %v604_v25 = vrot.slane %v569_v7, 1  ;;  %v605_v26 = vrot.slane %v570_v8, 1 }
  0x39   : > { %v382_v28 = vadd.f32 %v374_v53, %v362_v9  ;;  %v680_v29 = vrot.slane %v645_v15, 2  ;;  %v681_v30 = vrot.slane %v646_v21, 2  ;;  %v201_v31 = vmul.f32 %v859_v11, %v989_v6 }
  0x3a   : > { %v720_v32 = vadd.f32 %v955_v47, %v705_v22  ;;  %v606_v33 = vsel %vm249_vm0, %v604_v25, %v605_v26  ;;  %v225_v34 = vmul.f32 %v861_v12, %v989_v6  ;;  %v226_v37 = vmul.f32 %v861_v12, %v993_v16 }
  0x3b   : > { %v458_v38 = vadd.f32 %v434_v10, %v382_v28  ;;  %v682_v39 = vsel %vm326_vm1, %v680_v29, %v681_v30  ;;  %v302_v40 = vmul.f32 %v863_v13, %v989_v6  ;;  %v303_v41 = vmul.f32 %v863_v13, %v993_v16 }
  0x3c   : > { %729 = vst.msk [vmem:[%s967_s27 + $0x10] sm:$0xff] %vm726_vm2, %v720_v32  ;;  %v262_v42 = vrot.slane %v225_v34, 1  ;;  %v263_v43 = vrot.slane %v226_v37, 1  ;;  %v375_v44 = vmul.f32 %v865_v14, %v1027_v58  ;;  %v399_v46 = vmul.f32 %v869_v17, %v1027_v58 }
  0x3d   : > { %v534_v48 = vadd.f32 %v510_v24, %v458_v38  ;;  %v339_v49 = vrot.slane %v302_v40, 2  ;;  %v340_v50 = vrot.slane %v303_v41, 2  ;;  %v400_v6 = vmul.f32 %v869_v17, %v1039_v1 }
  0x3e   : > { %v264_v51 = vsel %vm249_vm0, %v262_v42, %v263_v43  ;;  %v435_v16 = vrot.slane %v399_v46, 1  ;;  %v475_v52 = vmul.f32 %v871_v18, %v1027_v58  ;;  %v476_v53 = vmul.f32 %v871_v18, %v1039_v1  ;;  %v1122_v43 = vld [vmem:[%s857_s19 + $0x70] sm:$0xff] }
  0x3f   : > { %v554_v54 = vadd.f32 %v546_v0, %v534_v48  ;;  %v286_v56 = vadd.f32 %v264_v51, %v201_v31  ;;  %v341_v57 = vsel %vm326_vm1, %v339_v49, %v340_v50  ;;  %v436_v23 = vrot.slane %v400_v6, 1 }
  0x40   : > { %v511_v60 = vrot.slane %v475_v52, 2  ;;  %v512_v27 = vrot.slane %v476_v53, 2  ;;  %v547_v61 = vmul.f32 %v873_v19, %v1079_v55  ;;  %v571_v62 = vmul.f32 %v875_v20, %v1079_v55  ;;  %v1130_v52 = vld [vmem:[%s857_s19 + $0x78] sm:$0x3] }
  0x41   : > { %v630_v63 = vadd.f32 %v606_v33, %v554_v54  ;;  %v363_v2 = vadd.f32 %v341_v57, %v286_v56  ;;  %v437_v0 = vsel %vm249_vm0, %v435_v16, %v436_v23  ;;  %v572_v3 = vmul.f32 %v875_v20, %v1083_v59 }
  0x42   : > { %v513_v35 = vsel %vm326_vm1, %v511_v60, %v512_v27  ;;  %v607_v45 = vrot.slane %v571_v62, 1  ;;  %v647_v4 = vmul.f32 %v894_v36, %v1079_v55  ;;  %v648_v5 = vmul.f32 %v894_v36, %v1083_v59 }
  0x43   : > { %v706_v7 = vadd.f32 %v682_v39, %v630_v63  ;;  %v383_v8 = vadd.f32 %v375_v44, %v363_v2  ;;  %v608_v9 = vrot.slane %v572_v3, 1  ;;  %v202_v10 = vmul.f32 %v859_v11, %v1027_v58 }
  0x44   : > { %v683_v15 = vrot.slane %v647_v4, 2  ;;  %v684_v21 = vrot.slane %v648_v5, 2  ;;  %v227_v22 = vmul.f32 %v861_v12, %v1027_v58  ;;  %v228_v24 = vmul.f32 %v861_v12, %v1039_v1 }
  0x45   : > { %v721_v25 = vadd.f32 %v955_v47, %v706_v7  ;;  %v459_v26 = vadd.f32 %v437_v0, %v383_v8  ;;  %v609_v28 = vsel %vm249_vm0, %v607_v45, %v608_v9  ;;  %v304_v29 = vmul.f32 %v863_v13, %v1027_v58 }
  0x46   : > { %v685_v30 = vsel %vm326_vm1, %v683_v15, %v684_v21  ;;  %v265_v31 = vrot.slane %v227_v22, 1  ;;  %v266_v32 = vrot.slane %v228_v24, 1  ;;  %v305_v33 = vmul.f32 %v863_v13, %v1039_v1 }
  0x47   : > { %730 = vst.msk [vmem:[%s967_s27 + $0x18] sm:$0xff] %vm726_vm2, %v721_v25  ;;  %v535_v34 = vadd.f32 %v513_v35, %v459_v26  ;;  %v342_v37 = vrot.slane %v304_v29, 2  ;;  %v376_v38 = vmul.f32 %v865_v14, %v1079_v55  ;;  %v401_v39 = vmul.f32 %v869_v17, %v1079_v55 }
  0x48   : > { %v267_v58 = vsel %vm249_vm0, %v265_v31, %v266_v32  ;;  %v343_v40 = vrot.slane %v305_v33, 2  ;;  %v402_v41 = vmul.f32 %v869_v17, %v1083_v59  ;;  %v477_v1 = vmul.f32 %v871_v18, %v1079_v55 }
  0x49   : > { %v555_v42 = vadd.f32 %v547_v61, %v535_v34  ;;  %v287_v44 = vadd.f32 %v267_v58, %v202_v10  ;;  %v438_v46 = vrot.slane %v401_v39, 1  ;;  %v478_v48 = vmul.f32 %v871_v18, %v1083_v59 }
  0x4a   : > { %v344_v49 = vsel %vm326_vm1, %v342_v37, %v343_v40  ;;  %v439_v50 = vrot.slane %v402_v41, 1  ;;  %v514_v6 = vrot.slane %v477_v1, 2  ;;  %v548_v51 = vmul.f32 %v873_v19, %v1122_v43  ;;  %v187_v40 = vld [vmem:[%s857_s19 + $0x80] sm:$0xff]  ;;  %v188_v41 = vld [vmem:[%s857_s19 + $0x88] sm:$0x3] }
  0x4b   : > { %v631_v16 = vadd.f32 %v609_v28, %v555_v42  ;;  %v364_v53 = vadd.f32 %v344_v49, %v287_v44  ;;  %v515_v54 = vrot.slane %v478_v48, 2  ;;  %v573_v56 = vmul.f32 %v875_v20, %v1122_v43 }
  0x4c   : > { %v440_v57 = vsel %vm249_vm0, %v438_v46, %v439_v50  ;;  %v574_v23 = vmul.f32 %v875_v20, %v1130_v52  ;;  %v649_v60 = vmul.f32 %v894_v36, %v1122_v43  ;;  %v650_v27 = vmul.f32 %v894_v36, %v1130_v52 }
  0x4d   : > { %v707_v61 = vadd.f32 %v685_v30, %v631_v16  ;;  %v384_v62 = vadd.f32 %v376_v38, %v364_v53  ;;  %v516_v63 = vsel %vm326_vm1, %v514_v6, %v515_v54  ;;  %v610_v2 = vrot.slane %v573_v56, 1 }
  0x4e   : > { %v611_v0 = vrot.slane %v574_v23, 1  ;;  %v686_v3 = vrot.slane %v649_v60, 2  ;;  %v687_v35 = vrot.slane %v650_v27, 2  ;;  %v203_v45 = vmul.f32 %v859_v11, %v1079_v55 }
  0x4f   : > { %v722_v4 = vadd.f32 %v955_v47, %v707_v61  ;;  %v460_v5 = vadd.f32 %v440_v57, %v384_v62  ;;  %v229_v7 = vmul.f32 %v861_v12, %v1079_v55  ;;  %v230_v8 = vmul.f32 %v861_v12, %v1083_v59 }
  0x50   : > { %v612_v9 = vsel %vm249_vm0, %v610_v2, %v611_v0  ;;  %v688_v10 = vsel %vm326_vm1, %v686_v3, %v687_v35  ;;  %v306_v15 = vmul.f32 %v863_v13, %v1079_v55  ;;  %v307_v21 = vmul.f32 %v863_v13, %v1083_v59 }
  0x51   : > { %731 = vst.msk [vmem:[%s967_s27 + $0x20] sm:$0xff] %vm726_vm2, %v722_v4  ;;  %v536_v22 = vadd.f32 %v516_v63, %v460_v5  ;;  %v268_v24 = vrot.slane %v229_v7, 1  ;;  %v269_v25 = vrot.slane %v230_v8, 1  ;;  %v377_v26 = vmul.f32 %v865_v14, %v1122_v43 }
  0x52   : > { %v345_v28 = vrot.slane %v306_v15, 2  ;;  %v346_v29 = vrot.slane %v307_v21, 2  ;;  %v403_v30 = vmul.f32 %v869_v17, %v1122_v43  ;;  %v404_v55 = vmul.f32 %v869_v17, %v1130_v52 }
  0x53   : > { %v556_v31 = vadd.f32 %v548_v51, %v536_v22  ;;  %v270_v59 = vsel %vm249_vm0, %v268_v24, %v269_v25  ;;  %v479_v32 = vmul.f32 %v871_v18, %v1122_v43  ;;  %v480_v33 = vmul.f32 %v871_v18, %v1130_v52 }
  0x54   : > { %v288_v34 = vadd.f32 %v270_v59, %v203_v45  ;;  %v347_v37 = vsel %vm326_vm1, %v345_v28, %v346_v29  ;;  %v441_v38 = vrot.slane %v403_v30, 1  ;;  %v442_v39 = vrot.slane %v404_v55, 1 }
  0x55   : > { %v632_v58 = vadd.f32 %v612_v9, %v556_v31  ;;  %v517_v1 = vrot.slane %v479_v32, 2  ;;  %v518_v42 = vrot.slane %v480_v33, 2  ;;  %v549_v46 = vmul.f32 %v873_v19, %v187_v40  ;;  %v189_v9 = vld [vmem:[%s857_s19 + $0x90] sm:$0xff] }
  0x56   : > { %v365_v44 = vadd.f32 %v347_v37, %v288_v34  ;;  %v575_v48 = vmul.f32 %v875_v20, %v187_v40  ;;  %v576_v49 = vmul.f32 %v875_v20, %v188_v41  ;;  %v443_v6 = vsel %vm249_vm0, %v441_v38, %v442_v39 }
  0x57   : > { %v708_v50 = vadd.f32 %v688_v10, %v632_v58  ;;  %v651_v51 = vmul.f32 %v894_v36, %v187_v40  ;;  %v652_v16 = vmul.f32 %v894_v36, %v188_v41  ;;  %v519_v54 = vsel %vm326_vm1, %v517_v1, %v518_v42 }
  0x58   : > { %v385_v53 = vadd.f32 %v377_v26, %v365_v44  ;;  %v613_v56 = vrot.slane %v575_v48, 1  ;;  %v614_v57 = vrot.slane %v576_v49, 1  ;;  %v231_v61 = vmul.f32 %v861_v12, %v1122_v43 }
  0x59   : > { %v723_v23 = vadd.f32 %v955_v47, %v708_v50  ;;  %v689_v60 = vrot.slane %v651_v51, 2  ;;  %v690_v27 = vrot.slane %v652_v16, 2  ;;  %v204_v63 = vmul.f32 %v859_v11, %v1122_v43 }
  0x5a   : > { %v461_v62 = vadd.f32 %v443_v6, %v385_v53  ;;  %v232_v2 = vmul.f32 %v861_v12, %v1130_v52  ;;  %v308_v0 = vmul.f32 %v863_v13, %v1122_v43  ;;  %v615_v3 = vsel %vm249_vm0, %v613_v56, %v614_v57  ;;  %v190_v12 = vld [vmem:[%s857_s19 + $0x98] sm:$0x3] }
  0x5b   : > { %732 = vst.msk [vmem:[%s967_s27 + $0x28] sm:$0xff] %vm726_vm2, %v723_v23  ;;  %v691_v35 = vsel %vm326_vm1, %v689_v60, %v690_v27  ;;  %v271_v45 = vrot.slane %v231_v61, 1  ;;  %v309_v4 = vmul.f32 %v863_v13, %v1130_v52  ;;  %v405_v11 = vmul.f32 %v869_v17, %v187_v40 }
  0x5c   : > { %v537_v5 = vadd.f32 %v519_v54, %v461_v62  ;;  %v272_v7 = vrot.slane %v232_v2, 1  ;;  %v348_v8 = vrot.slane %v308_v0, 2  ;;  %v406_v43 = vmul.f32 %v869_v17, %v188_v41 }
  0x5d   : > { %v349_v10 = vrot.slane %v309_v4, 2  ;;  %v481_v15 = vmul.f32 %v871_v18, %v187_v40  ;;  %v482_v21 = vmul.f32 %v871_v18, %v188_v41  ;;  %v378_v25 = vmul.f32 %v865_v14, %v187_v40 }
  0x5e   : > { %v557_v22 = vadd.f32 %v549_v46, %v537_v5  ;;  %v273_v24 = vsel %vm249_vm0, %v271_v45, %v272_v7  ;;  %v444_v13 = vrot.slane %v405_v11, 1  ;;  %v445_v28 = vrot.slane %v406_v43, 1 }
  0x5f   : > { %v289_v52 = vadd.f32 %v273_v24, %v204_v63  ;;  %v350_v26 = vsel %vm326_vm1, %v348_v8, %v349_v10  ;;  %v520_v29 = vrot.slane %v481_v15, 2  ;;  %v521_v55 = vrot.slane %v482_v21, 2 }
  0x60   : > { %v633_v30 = vadd.f32 %v615_v3, %v557_v22  ;;  %v577_v17 = vmul.f32 %v875_v20, %v189_v9  ;;  %v578_v31 = vmul.f32 %v875_v20, %v190_v12  ;;  %v446_v32 = vsel %vm249_vm0, %v444_v13, %v445_v28 }
  0x61   : > { %v366_v59 = vadd.f32 %v350_v26, %v289_v52  ;;  %v653_v33 = vmul.f32 %v894_v36, %v189_v9  ;;  %v654_v14 = vmul.f32 %v894_v36, %v190_v12  ;;  %v522_v38 = vsel %vm326_vm1, %v520_v29, %v521_v55 }
  0x62   : > { %v709_v18 = vadd.f32 %v691_v35, %v633_v30  ;;  %v616_v39 = vrot.slane %v577_v17, 1  ;;  %v617_v58 = vrot.slane %v578_v31, 1  ;;  %v550_v41 = vmul.f32 %v873_v19, %v189_v9 }
  0x63   : > { %v386_v34 = vadd.f32 %v378_v25, %v366_v59  ;;  %v692_v20 = vrot.slane %v653_v33, 2  ;;  %v693_v1 = vrot.slane %v654_v14, 2 }
  0x64   : > { %v724_v37 = vadd.f32 %v955_v47, %v709_v18  ;;  %v618_v44 = vsel %vm249_vm0, %v616_v39, %v617_v58 }
  0x65   : > { %v462_v40 = vadd.f32 %v446_v32, %v386_v34  ;;  %v694_v36 = vsel %vm326_vm1, %v692_v20, %v693_v1 }
  0x66   : > { %733 = vst.msk [vmem:[%s967_s27 + $0x30] sm:$0xff] %vm726_vm2, %v724_v37 }
  0x67   : > { %v538_v42 = vadd.f32 %v522_v38, %v462_v40 }
  0x69   : > { %v558_v46 = vadd.f32 %v550_v41, %v538_v42 }
  0x6b   : > { %v634_v48 = vadd.f32 %v618_v44, %v558_v46 }
  0x6d   : > { %v710_v49 = vadd.f32 %v694_v36, %v634_v48 }
  0x6f   : > { %v725_v50 = vadd.f32 %v955_v47, %v710_v49 }
  0x71   : > { %734 = vst.msk [vmem:[%s967_s27 + $0x38] sm:$0xff] %vm726_vm2, %v725_v50 }
  0x72 PF: > { %s13_s12 = sadd.s32 1, %s818_s12  }
  0x73   : > { %p10_p4 = scmp.ge.s32.totalorder %s13_s12, 4  }
  0x75   :  { %12 = sbr.rel (!%p10_p4) target bundleno = 1 (0x1), region = 62 }

// kernel: _lambda_.12
= control target key start
LH: loop header
LB: loop body
LE: loop exit
PB: predicated region body
PF: predicated region fallthrough
CT: control target
= control target key end

     0   :  { %s895_s15 = smov 0   ;;  %s994_s0 = inlined_call_operand.vmem [shape: f32[8,2,16,4], index: 0, kind: input, shape index: {}]   ;;  %s995_s1 = inlined_call_operand.vmem [shape: f32[8,2,16,4], index: 1, kind: input, shape index: {}]   ;;  %s996_s2 = inlined_call_operand.vmem [shape: f32[8,2,16,8], index: 2, kind: input, shape index: {}]   ;;  %s997_s3 = inlined_call_operand.vmem [shape: f32[2,16,16], index: 3, kind: input, shape index: {}]   ;;  %s998_s4 = inlined_call_operand.vmem [shape: f32[8,2,16,8], index: 4, kind: output, shape index: {}]  }
   0x1 LB: > { %s733_s16 = sadd.s32 4294967295, %s868_s15   ;;  %p737_p0 = scmp.ge.s32.totalorder %s868_s15, 1  ;;  %s868_s15 = sphi %s895_s15, %s14_s15  }
   0x2   : > { %p182_p1 = scmp.lt.s32.totalorder %s868_s15, 9 }
   0x4   : > { %p183_p2 = pnand %p737_p0, %p182_p1 }
   0x5   : > { %p218_p3 = scmp.lt.s32.totalorder (!%p183_p2), %s733_s16, 7  ;;  %vm242_vm0 = vcmask (!%p183_p2), 31744   ;;  %v332_v8 = vld [vmem:[%s997_s3] sm:$0xff] (!%p183_p2)  ;;  %vm336_vm2 = vcmask (!%p183_p2), 130048   ;;  %v333_v11 = vld [vmem:[%s997_s3 + $0x8] sm:$0xff] (!%p183_p2)  ;;  %vm442_vm3 = vcmask (!%p183_p2), 64512  }
   0x6   : > { %186 = sbr.rel (%p183_p2) target bundleno = 1316 (0x524), region = 36  ;;  %vm913_vm1 = vmpackc.low (!%p183_p2), %vm242_vm0, %vm242_vm0  ;;  %v761_v43 = vld [vmem:[%s997_s3 + $0x18] sm:$0xff] (!%p183_p2)  ;;  %v760_v46 = vld [vmem:[%s997_s3 + $0x10] sm:$0xff] (!%p183_p2) }
   0xd   : > { %s1002_s16 = smov (!%p218_p3, %s733_s16), 7 }
   0xe   : > { %s903_s17 = sshll.u32 %s1002_s16, 5 }
   0xf   : > { %s909_s20 = scalar_lea.vmem %s995_s1, %s903_s17  ;;  %s921_s23 = scalar_lea.vmem %s994_s0, %s903_s17 }
  0x10   : > { %v240_v1 = vld [vmem:[%s909_s20] sm:$0xff]  ;;  %v241_v2 = vld [vmem:[%s909_s20 + $0x8] sm:$0xff]  ;;  %s947_s30 = scalar_lea.vmem %s996_s2, %s903_s17  ;;  %v754_v29 = vld [vmem:[%s909_s20 + $0x10] sm:$0xff]  ;;  %s967_s7 = scalar_lea.vmem %s998_s4, %s903_s17 }
  0x11   : > { %v238_v3 = vld [vmem:[%s921_s23] sm:$0xff]  ;;  %v818_v4 = vpack.c.bf16 %v241_v2, %v240_v1  ;;  %v239_v5 = vld [vmem:[%s921_s23 + $0x8] sm:$0xff]  ;;  %v755_v30 = vld [vmem:[%s909_s20 + $0x18] sm:$0xff] }
  0x12   : > { %794 = vmatprep.mubr.msk.f32.mxu0 %vm242_vm0, %v238_v3  ;;  %v359_v26 = vld [vmem:[%s947_s30] sm:$0xff]  ;;  %v360_v27 = vld [vmem:[%s947_s30 + $0x8] sm:$0xff]  ;;  %v828_v31 = vpack.c.bf16 %v755_v30, %v754_v29  ;;  %v752_v38 = vld [vmem:[%s921_s23 + $0x10] sm:$0xff] }
  0x13   : > { %820 = vmatprep.subr.msk.bf16.mxu0 %vm913_vm1, %v818_v4  ;;  %v824_v28 = vpack.c.bf16 %v360_v27, %v359_v26  ;;  %v753_v39 = vld [vmem:[%s921_s23 + $0x18] sm:$0xff]  ;;  %v762_v62 = vld [vmem:[%s947_s30 + $0x10] sm:$0xff] }
  0x14   : > { %823 = vmatpush3.bf16.xpose.msk.msra.mxu0 %vm913_vm1, %v818_v4  ;;  %v763_v63 = vld [vmem:[%s947_s30 + $0x18] sm:$0xff] }
  0x15   : > { %825 = vmatprep.subr.bf16.mxu1 %v824_v28  ;;  %v834_v0 = vpack.c.bf16 %v763_v63, %v762_v62 }
  0x16   : > { %827 = vmatpush3.bf16.msra.mxu1 %v824_v28 }
  0x17   : > { %830 = vmatprep.subr.msk.bf16.mxu1 %vm913_vm1, %v828_v31  ;;  %835 = vmatprep.subr.bf16.mxu0 %v834_v0 }
  0x1b   : > { %795 = vmatmul.mubr.msk.f32.vlgmr.msra.gmra.mrb[0].mxu0 %vm242_vm0, %v239_v5 }
  0x1c   : > { %837 = vmatpush3.bf16.msra.mxu0 %v834_v0 }
  0xee   : > { %v796_v6 = vpop.f32.mrb[0].mxu0 }
  0xef   : > { %v321_v7 = vpop.f32.mrb[1].mxu0  ;;  %v331_v9 = vmul.f32 0.5, %v796_v6 }
  0xf0   : > { %v330_v10 = vmul.f32 0.5, %v321_v7 }
  0xf1   : > { %v335_v14 = vadd.f32 %v333_v11, %v331_v9 }
  0xf2   : > { %v334_v12 = vadd.f32 %v332_v8, %v330_v10 }
  0xf3   : > { %v340_v15 = vsel %vm336_vm2, %v335_v14, -inf }
  0xf4   : > { %v337_v13 = vsel %vm336_vm2, %v334_v12, -inf }
  0xf5   : > { %338 = vmax.xlane.f32.xlu0 %v337_v13 }
  0xf9   : > { %341 = vmax.xlane.f32.xlu0 %v340_v15 }
 0x182   : > { %v339_v16 = vpop.xlane.xlu0 %338 }
 0x183   : > { %v343_v17 = vsub.f32 %v334_v12, %v339_v16 }
 0x185   : > { %v345_v18 = vmul.f32 1.442695, %v343_v17 }
 0x186   : > { %v342_v19 = vpop.xlane.xlu0 %341 }
 0x187   : > { %846 = vpow2.f32 %v345_v18  ;;  %v344_v20 = vsub.f32 %v335_v14, %v342_v19 }
 0x189   : > { %v347_v21 = vmul.f32 1.442695, %v344_v20 }
 0x18b   : > { %848 = vpow2.f32 %v347_v21 }
 0x191   : > { %v847_v22 = vpop.eup %846 }
 0x192   : > { %v349_v23 = vsel %vm336_vm2, %v847_v22, 0.0 }
 0x193   : > { %350 = vadd.xlane.f32.xlu1 %v349_v23 }
 0x195   : > { %v849_v24 = vpop.eup %848 }
 0x196   : > { %v352_v25 = vsel %vm336_vm2, %v849_v24, 0.0 }
 0x197   : > { %353 = vadd.xlane.f32.xlu1 %v352_v25 }
 0x220   : > { %v351_v32 = vpop.xlane.xlu1 %350 }
 0x221   : > { %850 = vrcp.f32 %v351_v32 }
 0x224   : > { %v354_v33 = vpop.xlane.xlu1 %353 }
 0x225   : > { %852 = vrcp.f32 %v354_v33 }
 0x22b   : > { %v851_v34 = vpop.eup %850 }
 0x22c   : > { %v356_v35 = vmul.f32 %v851_v34, %v847_v22 }
 0x22e   : > { %801 = vmatprep.mubr.msk.f32.mxu1 %vm336_vm2, %v356_v35 }
 0x22f   : > { %v853_v36 = vpop.eup %852 }
 0x230   : > { %v358_v37 = vmul.f32 %v853_v36, %v849_v24 }
 0x232   : > { %802 = vmatmul.mubr.msk.f32.vlgmr.msra.gmra.mrb[0].mxu1 %vm336_vm2, %v358_v37 }
 0x233   : > { %833 = vmatpush3.bf16.xpose.msk.msra.mxu1 %vm913_vm1, %v828_v31  ;;  %808 = vmatprep.mubr.msk.f32.mxu1 %vm242_vm0, %v752_v38 }
 0x23a   : > { %809 = vmatmul.mubr.msk.f32.vlgmr.msra.gmra.mrb[2].mxu1 %vm242_vm0, %v753_v39 }
 0x305   : > { %v803_v40 = vpop.f32.mrb[0].mxu1 }
 0x306   : > { %444 = vst.msk [vmem:[%s967_s7 + $0x8] sm:$0xff] %vm442_vm3, %v803_v40  ;;  %v433_v41 = vpop.f32.mrb[1].mxu1 }
 0x307   : > { %443 = vst.msk [vmem:[%s967_s7] sm:$0xff] %vm442_vm3, %v433_v41 }
 0x30d   : > { %v810_v42 = vpop.f32.mrb[2].mxu1 }
 0x30e   : > { %v539_v44 = vmul.f32 0.5, %v810_v42  ;;  %v529_v45 = vpop.f32.mrb[3].mxu1 }
 0x30f   : > { %v538_v47 = vmul.f32 0.5, %v529_v45 }
 0x310   : > { %v544_v48 = vadd.f32 %v761_v43, %v539_v44 }
 0x311   : > { %v543_v49 = vadd.f32 %v760_v46, %v538_v47 }
 0x312   : > { %v548_v50 = vsel %vm336_vm2, %v544_v48, -inf }
 0x313   : > { %549 = vmax.xlane.f32.xlu1 %v548_v50  ;;  %v545_v51 = vsel %vm336_vm2, %v543_v49, -inf }
 0x314   : > { %546 = vmax.xlane.f32.xlu0 %v545_v51 }
 0x3a0   : > { %v550_v52 = vpop.xlane.xlu1 %549 }
 0x3a1   : > { %v552_v53 = vsub.f32 %v544_v48, %v550_v52  ;;  %v547_v54 = vpop.xlane.xlu0 %546 }
 0x3a2   : > { %v551_v55 = vsub.f32 %v543_v49, %v547_v54 }
 0x3a3   : > { %v555_v56 = vmul.f32 1.442695, %v552_v53 }
 0x3a4   : > { %v553_v57 = vmul.f32 1.442695, %v551_v55 }
 0x3a5   : > { %854 = vpow2.f32 %v555_v56 }
 0x3a6   : > { %856 = vpow2.f32 %v553_v57 }
 0x3af   : > { %v855_v58 = vpop.eup %854 }
 0x3b0   : > { %v857_v59 = vpop.eup %856  ;;  %v560_v60 = vsel %vm336_vm2, %v855_v58, 0.0 }
 0x3b1   : > { %561 = vadd.xlane.f32.xlu1 %v560_v60  ;;  %v557_v61 = vsel %vm336_vm2, %v857_v59, 0.0 }
 0x3b2   : > { %558 = vadd.xlane.f32.xlu0 %v557_v61 }
 0x43e   : > { %v562_v1 = vpop.xlane.xlu1 %561 }
 0x43f   : > { %858 = vrcp.f32 %v562_v1  ;;  %v559_v2 = vpop.xlane.xlu0 %558 }
 0x440   : > { %860 = vrcp.f32 %v559_v2 }
 0x449   : > { %v859_v3 = vpop.eup %858 }
 0x44a   : > { %v861_v4 = vpop.eup %860  ;;  %v566_v6 = vmul.f32 %v859_v3, %v855_v58 }
 0x44b   : > { %v564_v5 = vmul.f32 %v861_v4, %v857_v59 }
 0x44d   : > { %815 = vmatprep.mubr.msk.f32.mxu0 %vm336_vm2, %v564_v5 }
 0x44e   : > { %816 = vmatmul.mubr.msk.f32.vlgmr.msra.gmra.mrb[2].mxu0 %vm336_vm2, %v566_v6 }
 0x521   : > { %v817_v7 = vpop.f32.mrb[2].mxu0 }
 0x522   : > { %767 = vst.msk [vmem:[%s967_s7 + $0x18] sm:$0xff] %vm442_vm3, %v817_v7  ;;  %v642_v8 = vpop.f32.mrb[3].mxu0 }
 0x523   : > { %766 = vst.msk [vmem:[%s967_s7 + $0x10] sm:$0xff] %vm442_vm3, %v642_v8 }
 0x524 PF: > { %s14_s15 = sadd.s32 1, %s868_s15  }
 0x525   : > { %p11_p4 = scmp.ge.s32.totalorder %s14_s15, 10  }
 0x527   :  { %13 = sbr.rel (!%p11_p4) target bundleno = 1 (0x1), region = 77 }

// kernel: _lambda_.13
= control target key start
LH: loop header
LB: loop body
LE: loop exit
PB: predicated region body
PF: predicated region fallthrough
CT: control target
= control target key end

     0   :  { %vm58_vm0 = vcmask 130048   ;;  %vm284_vm1 = vcmask 261120   ;;  %s602_s2 = inlined_call_operand.vmem [shape: f32[16,32], index: 2, kind: input, shape index: {}]   ;;  %s603_s0 = inlined_call_operand.vmem [shape: f32[128,16], index: 0, kind: input, shape index: {}]   ;;  %s604_s3 = inlined_call_operand.vmem [shape: f32[1,32], index: 3, kind: input, shape index: {}]   ;;  %s605_s1 = inlined_call_operand.vmem [shape: f32[128,32], index: 1, kind: input, shape index: {}]   ;;  %s606_s4 = inlined_call_operand.vmem [shape: f32[128,32], index: 4, kind: output, shape index: {}]  }
   0x1   :  { %v49_v0 = vld [vmem:[%s602_s2] sm:$0xff]  ;;  %v50_v1 = vld [vmem:[%s602_s2 + $0x8] sm:$0xff]  ;;  %v19_v9 = vld [vmem:[%s603_s0 + $0x10] sm:$0xff] }
   0x2   :  { %v17_v2 = vld [vmem:[%s603_s0] sm:$0xff]  ;;  %v368_v3 = vpack.c.bf16 %v50_v1, %v49_v0  ;;  %v18_v6 = vld [vmem:[%s603_s0 + $0x8] sm:$0xff]  ;;  %v27_v10 = vld [vmem:[%s603_s0 + $0x50] sm:$0xff]  ;;  %v35_v13 = vmax.f32 %v19_v9, 0.0 }
   0x3   :  { %v33_v4 = vmax.f32 %v17_v2, 0.0  ;;  %v25_v5 = vld [vmem:[%s603_s0 + $0x40] sm:$0xff]  ;;  %v26_v7 = vld [vmem:[%s603_s0 + $0x48] sm:$0xff]  ;;  %v34_v11 = vmax.f32 %v18_v6, 0.0  ;;  %v43_v14 = vmax.f32 %v27_v10, 0.0  ;;  %v20_v15 = vld [vmem:[%s603_s0 + $0x18] sm:$0xff] }
   0x4   :  { %v41_v8 = vmax.f32 %v25_v5, 0.0  ;;  %369 = vmatprep.subr.bf16.mxu0 %v368_v3  ;;  %372 = vmatprep.subr.bf16.mxu1 %v368_v3  ;;  %v42_v12 = vmax.f32 %v26_v7, 0.0  ;;  %v28_v16 = vld [vmem:[%s603_s0 + $0x58] sm:$0xff]  ;;  %v21_v17 = vld [vmem:[%s603_s0 + $0x20] sm:$0xff]  ;;  %v36_v19 = vmax.f32 %v20_v15, 0.0  ;;  %v22_v23 = vld [vmem:[%s603_s0 + $0x28] sm:$0xff] }
   0x5   :  { %371 = vmatpush3.bf16.msra.mxu0 %v368_v3  ;;  %373 = vmatpush3.bf16.msra.mxu1 %v368_v3  ;;  %v29_v18 = vld [vmem:[%s603_s0 + $0x60] sm:$0xff]  ;;  %v44_v20 = vmax.f32 %v28_v16, 0.0  ;;  %v37_v21 = vmax.f32 %v21_v17, 0.0  ;;  %v30_v24 = vld [vmem:[%s603_s0 + $0x68] sm:$0xff]  ;;  %v23_v25 = vld [vmem:[%s603_s0 + $0x30] sm:$0xff]  ;;  %v38_v27 = vmax.f32 %v22_v23, 0.0 }
   0x6   :  { %344 = vmatprep.mubr.msk.f32.mxu0 %vm58_vm0, %v33_v4  ;;  %356 = vmatprep.mubr.msk.f32.mxu1 %vm58_vm0, %v41_v8  ;;  %v45_v22 = vmax.f32 %v29_v18, 0.0  ;;  %v31_v26 = vld [vmem:[%s603_s0 + $0x70] sm:$0xff]  ;;  %v46_v28 = vmax.f32 %v30_v24, 0.0  ;;  %v39_v29 = vmax.f32 %v23_v25, 0.0  ;;  %v24_v31 = vld [vmem:[%s603_s0 + $0x38] sm:$0xff]  ;;  %v253_v37 = vld [vmem:[%s605_s1 + $0x8] sm:$0xff] }
   0x7   :  { %v47_v30 = vmax.f32 %v31_v26, 0.0  ;;  %v32_v32 = vld [vmem:[%s603_s0 + $0x78] sm:$0xff]  ;;  %v40_v33 = vmax.f32 %v24_v31, 0.0  ;;  %v472_v35 = vld [vmem:[%s604_s3] ss:$0 sm:$0xff]  ;;  %v261_v39 = vld [vmem:[%s605_s1 + $0x48] sm:$0xff] }
   0x8   :  { %345 = vmatmul.mubr.msk.f32.vlgmr.msra.gmra.mrb[0].mxu0 %vm58_vm0, %v34_v11  ;;  %357 = vmatmul.mubr.msk.f32.vlgmr.msra.gmra.mrb[0].mxu1 %vm58_vm0, %v42_v12  ;;  %v48_v34 = vmax.f32 %v32_v32, 0.0  ;;  %v252_v43 = vld [vmem:[%s605_s1] sm:$0xff]  ;;  %v255_v53 = vld [vmem:[%s605_s1 + $0x18] sm:$0xff]  ;;  %v254_v59 = vld [vmem:[%s605_s1 + $0x10] sm:$0xff] }
   0x9   :  { %347 = vmatprep.mubr.msk.f32.mxu0 %vm58_vm0, %v35_v13  ;;  %359 = vmatprep.mubr.msk.f32.mxu1 %vm58_vm0, %v43_v14  ;;  %v260_v45 = vld [vmem:[%s605_s1 + $0x40] sm:$0xff]  ;;  %v263_v55 = vld [vmem:[%s605_s1 + $0x58] sm:$0xff]  ;;  %v262_v61 = vld [vmem:[%s605_s1 + $0x50] sm:$0xff] }
   0xa   :  { %v257_v5 = vld [vmem:[%s605_s1 + $0x28] sm:$0xff]  ;;  %v256_v11 = vld [vmem:[%s605_s1 + $0x20] sm:$0xff]  ;;  %v267_v23 = vld [vmem:[%s605_s1 + $0x78] sm:$0xff] }
   0xb   :  { %v265_v7 = vld [vmem:[%s605_s1 + $0x68] sm:$0xff]  ;;  %v264_v13 = vld [vmem:[%s605_s1 + $0x60] sm:$0xff] }
   0xc   :  { %348 = vmatmul.mubr.msk.f32.gmra.mrb[2].mxu0 %vm58_vm0, %v36_v19  ;;  %360 = vmatmul.mubr.msk.f32.gmra.mrb[2].mxu1 %vm58_vm0, %v44_v20 }
   0xd   :  { %350 = vmatprep.mubr.msk.f32.mxu0 %vm58_vm0, %v37_v21  ;;  %362 = vmatprep.mubr.msk.f32.mxu1 %vm58_vm0, %v45_v22  ;;  %v259_v21 = vld [vmem:[%s605_s1 + $0x38] sm:$0xff] }
  0x10   :  { %351 = vmatmul.mubr.msk.f32.gmra.mrb[4].mxu0 %vm58_vm0, %v38_v27  ;;  %363 = vmatmul.mubr.msk.f32.gmra.mrb[4].mxu1 %vm58_vm0, %v46_v28  ;;  %v258_v27 = vld [vmem:[%s605_s1 + $0x30] sm:$0xff] }
  0x11   :  { %353 = vmatprep.mubr.msk.f32.mxu0 %vm58_vm0, %v39_v29  ;;  %365 = vmatprep.mubr.msk.f32.mxu1 %vm58_vm0, %v47_v30  ;;  %v266_v29 = vld [vmem:[%s605_s1 + $0x70] sm:$0xff] }
  0x14   :  { %354 = vmatmul.mubr.msk.f32.gmra.mrb[6].mxu0 %vm58_vm0, %v40_v33  ;;  %366 = vmatmul.mubr.msk.f32.gmra.mrb[6].mxu1 %vm58_vm0, %v48_v34 }
  0xdb   :  { %v346_v36 = vpop.f32.mrb[0].mxu0  ;;  %v358_v38 = vpop.f32.mrb[0].mxu1 }
  0xdc   :  { %v179_v40 = vadd.f32 %v346_v36, %v472_v35  ;;  %v219_v41 = vadd.f32 %v358_v38, %v472_v35  ;;  %v173_v42 = vpop.f32.mrb[1].mxu0  ;;  %v213_v44 = vpop.f32.mrb[1].mxu1 }
  0xdd   :  { %v174_v46 = vadd.f32 %v472_v35, %v173_v42  ;;  %v214_v47 = vadd.f32 %v472_v35, %v213_v44 }
  0xde   :  { %v269_v48 = vadd.f32 %v253_v37, %v179_v40  ;;  %v277_v49 = vadd.f32 %v261_v39, %v219_v41 }
  0xdf   :  { %v268_v50 = vadd.f32 %v252_v43, %v174_v46  ;;  %v276_v51 = vadd.f32 %v260_v45, %v214_v47  ;;  %v349_v52 = vpop.f32.mrb[2].mxu0  ;;  %v361_v54 = vpop.f32.mrb[2].mxu1 }
  0xe0   :  { %286 = vst.msk [vmem:[%s606_s4 + $0x8] sm:$0xff] %vm284_vm1, %v269_v48  ;;  %294 = vst.msk [vmem:[%s606_s4 + $0x48] sm:$0xff] %vm284_vm1, %v277_v49  ;;  %v189_v56 = vadd.f32 %v349_v52, %v472_v35  ;;  %v229_v57 = vadd.f32 %v361_v54, %v472_v35  ;;  %v183_v58 = vpop.f32.mrb[3].mxu0  ;;  %v223_v60 = vpop.f32.mrb[3].mxu1 }
  0xe1   :  { %285 = vst.msk [vmem:[%s606_s4] sm:$0xff] %vm284_vm1, %v268_v50  ;;  %293 = vst.msk [vmem:[%s606_s4 + $0x40] sm:$0xff] %vm284_vm1, %v276_v51  ;;  %v184_v62 = vadd.f32 %v472_v35, %v183_v58  ;;  %v224_v63 = vadd.f32 %v472_v35, %v223_v60 }
  0xe2   :  { %v271_v0 = vadd.f32 %v255_v53, %v189_v56  ;;  %v279_v1 = vadd.f32 %v263_v55, %v229_v57 }
  0xe3   :  { %v270_v2 = vadd.f32 %v254_v59, %v184_v62  ;;  %v278_v3 = vadd.f32 %v262_v61, %v224_v63  ;;  %v352_v4 = vpop.f32.mrb[4].mxu0  ;;  %v364_v6 = vpop.f32.mrb[4].mxu1 }
  0xe4   :  { %288 = vst.msk [vmem:[%s606_s4 + $0x18] sm:$0xff] %vm284_vm1, %v271_v0  ;;  %296 = vst.msk [vmem:[%s606_s4 + $0x58] sm:$0xff] %vm284_vm1, %v279_v1  ;;  %v199_v8 = vadd.f32 %v352_v4, %v472_v35  ;;  %v239_v9 = vadd.f32 %v364_v6, %v472_v35  ;;  %v193_v10 = vpop.f32.mrb[5].mxu0  ;;  %v233_v12 = vpop.f32.mrb[5].mxu1 }
  0xe5   :  { %287 = vst.msk [vmem:[%s606_s4 + $0x10] sm:$0xff] %vm284_vm1, %v270_v2  ;;  %295 = vst.msk [vmem:[%s606_s4 + $0x50] sm:$0xff] %vm284_vm1, %v278_v3  ;;  %v194_v14 = vadd.f32 %v472_v35, %v193_v10  ;;  %v234_v15 = vadd.f32 %v472_v35, %v233_v12 }
  0xe6   :  { %v273_v16 = vadd.f32 %v257_v5, %v199_v8  ;;  %v281_v17 = vadd.f32 %v265_v7, %v239_v9 }
  0xe7   :  { %v272_v18 = vadd.f32 %v256_v11, %v194_v14  ;;  %v280_v19 = vadd.f32 %v264_v13, %v234_v15  ;;  %v355_v20 = vpop.f32.mrb[6].mxu0  ;;  %v367_v22 = vpop.f32.mrb[6].mxu1 }
  0xe8   :  { %290 = vst.msk [vmem:[%s606_s4 + $0x28] sm:$0xff] %vm284_vm1, %v273_v16  ;;  %298 = vst.msk [vmem:[%s606_s4 + $0x68] sm:$0xff] %vm284_vm1, %v281_v17  ;;  %v209_v24 = vadd.f32 %v355_v20, %v472_v35  ;;  %v249_v25 = vadd.f32 %v367_v22, %v472_v35  ;;  %v203_v26 = vpop.f32.mrb[7].mxu0  ;;  %v243_v28 = vpop.f32.mrb[7].mxu1 }
  0xe9   :  { %289 = vst.msk [vmem:[%s606_s4 + $0x20] sm:$0xff] %vm284_vm1, %v272_v18  ;;  %297 = vst.msk [vmem:[%s606_s4 + $0x60] sm:$0xff] %vm284_vm1, %v280_v19  ;;  %v204_v30 = vadd.f32 %v472_v35, %v203_v26  ;;  %v244_v31 = vadd.f32 %v472_v35, %v243_v28 }
  0xea   :  { %v275_v32 = vadd.f32 %v259_v21, %v209_v24  ;;  %v283_v33 = vadd.f32 %v267_v23, %v249_v25 }
  0xeb   :  { %v274_v34 = vadd.f32 %v258_v27, %v204_v30  ;;  %v282_v36 = vadd.f32 %v266_v29, %v244_v31 }
  0xec   :  { %292 = vst.msk [vmem:[%s606_s4 + $0x38] sm:$0xff] %vm284_vm1, %v275_v32  ;;  %300 = vst.msk [vmem:[%s606_s4 + $0x78] sm:$0xff] %vm284_vm1, %v283_v33 }
  0xed   :  { %291 = vst.msk [vmem:[%s606_s4 + $0x30] sm:$0xff] %vm284_vm1, %v274_v34  ;;  %299 = vst.msk [vmem:[%s606_s4 + $0x70] sm:$0xff] %vm284_vm1, %v282_v36 }

// kernel: _lambda_.15
= control target key start
LH: loop header
LB: loop body
LE: loop exit
PB: predicated region body
PF: predicated region fallthrough
CT: control target
= control target key end

     0   :  { %vm48_vm0 = vcmask 261120   ;;  %s971_s0 = inlined_call_operand.vmem [shape: f32[128,32], index: 0, kind: input, shape index: {}]   ;;  %s972_s1 = inlined_call_operand.vmem [shape: f32[32,64], index: 1, kind: input, shape index: {}]   ;;  %s973_s2 = inlined_call_operand.vmem [shape: f32[1,64], index: 2, kind: input, shape index: {}]   ;;  %s974_s3 = inlined_call_operand.vmem [shape: f32[64,32], index: 3, kind: input, shape index: {}]   ;;  %s975_s4 = inlined_call_operand.vmem [shape: f32[1,32], index: 4, kind: input, shape index: {}]   ;;  %s976_s5 = inlined_call_operand.hbm [shape: f32[128,32], index: 5, kind: output, shape index: {}]  }
   0x1   :  { %v37_v0 = vld [vmem:[%s972_s1] sm:$0xff]  ;;  %v38_v1 = vld [vmem:[%s972_s1 + $0x8] sm:$0xff]  ;;  %v39_v2 = vld [vmem:[%s972_s1 + $0x10] sm:$0xff] }
   0x2   :  { %v665_v3 = vpack.c.bf16 %v38_v1, %v37_v0  ;;  %v40_v4 = vld [vmem:[%s972_s1 + $0x18] sm:$0xff]  ;;  %v772_v5 = vld [vmem:[%s971_s0] sm:$0xff]  ;;  %v259_v8 = vld [vmem:[%s974_s3 + $0x8] sm:$0xff] }
   0x3   :  { %v669_v6 = vpack.c.bf16 %v40_v4, %v39_v2  ;;  %601 = vmatprep.mubr.msk.f32.mxu0 %vm48_vm0, %v772_v5  ;;  %v258_v7 = vld [vmem:[%s974_s3] sm:$0xff]  ;;  %v260_v9 = vld [vmem:[%s974_s3 + $0x10] sm:$0xff]  ;;  %v261_v10 = vld [vmem:[%s974_s3 + $0x18] sm:$0xff] }
   0x4   :  { %666 = vmatprep.subr.bf16.mxu0 %v665_v3  ;;  %v791_v11 = vld [vmem:[%s971_s0 + $0x8] sm:$0xff]  ;;  %v673_v12 = vpack.c.bf16 %v259_v8, %v258_v7 }
   0x5   :  { %668 = vmatpush3.bf16.msra.mxu0 %v665_v3 }
   0x6   :  { %670 = vmatprep.subr.bf16.mxu0 %v669_v6 }
   0x9   :  { %672 = vmatpush3.bf16.msra.mxu0 %v669_v6 }
   0xa   :  { %10 = vsyncpa [#allocation3], 0  ;;  %v796_v13 = vld [vmem:[%s971_s0 + $0x10] sm:$0xff]  ;;  %v677_v14 = vpack.c.bf16 %v261_v10, %v260_v9  ;;  %674 = vmatprep.subr.bf16.mxu0 %v673_v12  ;;  %689 = vmatprep.subr.bf16.mxu1 %v673_v12  ;;  %v262_v15 = vld [vmem:[%s974_s3 + $0x20] sm:$0xff]  ;;  %vm273_vm1 = vcmask 523264  }
   0xb   :  { %v263_v16 = vld [vmem:[%s974_s3 + $0x28] sm:$0xff]  ;;  %693 = vmatpush3.bf16.msra.mxu1 %v673_v12  ;;  %v811_v17 = vld [vmem:[%s971_s0 + $0x18] sm:$0xff]  ;;  %v816_v18 = vld [vmem:[%s971_s0 + $0x20] sm:$0xff] }
   0xc   :  { %602 = vmatmul.mubr.msk.f32.vlgmr.msra.gmra.mrb[0].mxu0 %vm48_vm0, %v791_v11  ;;  %690 = vmatprep.subr.bf16.mxu1 %v677_v14  ;;  %v681_v19 = vpack.c.bf16 %v263_v16, %v262_v15  ;;  %v825_v20 = vld [vmem:[%s971_s0 + $0x28] sm:$0xff]  ;;  %v830_v21 = vld [vmem:[%s971_s0 + $0x30] sm:$0xff]  ;;  %v839_v22 = vld [vmem:[%s971_s0 + $0x38] sm:$0xff] }
   0xd   :  { %604 = vmatprep.mubr.msk.f32.mxu0 %vm48_vm0, %v796_v13  ;;  %676 = vmatpush3.bf16.msra.mxu0 %v673_v12  ;;  %v844_v23 = vld [vmem:[%s971_s0 + $0x40] sm:$0xff]  ;;  %v853_v24 = vld [vmem:[%s971_s0 + $0x48] sm:$0xff]  ;;  %v858_v25 = vld [vmem:[%s971_s0 + $0x50] sm:$0xff] }
   0xe   :  { %678 = vmatprep.subr.bf16.mxu0 %v677_v14  ;;  %v867_v26 = vld [vmem:[%s971_s0 + $0x58] sm:$0xff]  ;;  %v872_v27 = vld [vmem:[%s971_s0 + $0x60] sm:$0xff]  ;;  %v881_v28 = vld [vmem:[%s971_s0 + $0x68] sm:$0xff] }
   0xf   :  { %694 = vmatpush3.bf16.msra.mxu1 %v677_v14  ;;  %v886_v29 = vld [vmem:[%s971_s0 + $0x70] sm:$0xff]  ;;  %v895_v30 = vld [vmem:[%s971_s0 + $0x78] sm:$0xff]  ;;  %v515_v34 = vld [vmem:[%s973_s2] ss:$0 sm:$0xff] }
  0x10   :  { %605 = vmatmul.mubr.msk.f32.gmra.mrb[2].mxu0 %vm48_vm0, %v811_v17  ;;  %691 = vmatprep.subr.bf16.mxu1 %v681_v19  ;;  %v264_v31 = vld [vmem:[%s974_s3 + $0x30] sm:$0xff]  ;;  %v265_v32 = vld [vmem:[%s974_s3 + $0x38] sm:$0xff]  ;;  %s724_s3 = smov [#allocation2]  }
  0x11   :  { %607 = vmatprep.mubr.msk.f32.mxu0 %vm48_vm0, %v816_v18  ;;  %680 = vmatpush3.bf16.msra.mxu0 %v677_v14  ;;  %v685_v33 = vpack.c.bf16 %v265_v32, %v264_v31 }
  0x12   :  { %682 = vmatprep.subr.bf16.mxu0 %v681_v19 }
  0x13   :  { %695 = vmatpush3.bf16.msra.mxu1 %v681_v19 }
  0x14   :  { %608 = vmatmul.mubr.msk.f32.gmra.mrb[4].mxu0 %vm48_vm0, %v825_v20  ;;  %692 = vmatprep.subr.bf16.mxu1 %v685_v33 }
  0x15   :  { %610 = vmatprep.mubr.msk.f32.mxu0 %vm48_vm0, %v830_v21  ;;  %684 = vmatpush3.bf16.msra.mxu0 %v681_v19 }
  0x16   :  { %686 = vmatprep.subr.bf16.mxu0 %v685_v33 }
  0x17   :  { %696 = vmatpush3.bf16.msra.mxu1 %v685_v33 }
  0x18   :  { %611 = vmatmul.mubr.msk.f32.gmra.mrb[6].mxu0 %vm48_vm0, %v839_v22 }
  0x19   :  { %613 = vmatprep.mubr.msk.f32.mxu0 %vm48_vm0, %v844_v23  ;;  %688 = vmatpush3.bf16.msra.mxu0 %v685_v33 }
  0x1c   :  { %614 = vmatmul.mubr.msk.f32.gmra.mrb[8].mxu0 %vm48_vm0, %v853_v24 }
  0x1d   :  { %616 = vmatprep.mubr.msk.f32.mxu0 %vm48_vm0, %v858_v25 }
  0x20   :  { %617 = vmatmul.mubr.msk.f32.gmra.mrb[10].mxu0 %vm48_vm0, %v867_v26 }
  0x21   :  { %619 = vmatprep.mubr.msk.f32.mxu0 %vm48_vm0, %v872_v27 }
  0x24   :  { %620 = vmatmul.mubr.msk.f32.gmra.mrb[12].mxu0 %vm48_vm0, %v881_v28 }
  0x25   :  { %622 = vmatprep.mubr.msk.f32.mxu0 %vm48_vm0, %v886_v29 }
  0x28   :  { %623 = vmatmul.mubr.msk.f32.gmra.mrb[14].mxu0 %vm48_vm0, %v895_v30 }
  0xdf   :  { %v603_v35 = vpop.f32.mrb[0].mxu0 }
  0xe0   :  { %v169_v36 = vadd.f32 %v603_v35, %v515_v34  ;;  %v163_v37 = vpop.f32.mrb[1].mxu0 }
  0xe1   :  { %v164_v38 = vadd.f32 %v515_v34, %v163_v37 }
  0xe2   :  { %v243_v41 = vmax.f32 %v169_v36, 0.0  ;;  %v532_v36 = vld [vmem:[%s975_s4] ss:$0 sm:$0xff]  ;;  %s504_s4 = sshll.u32 %s724_s3, 4  ;;  %s505_s4 = int_to_ptr.vmem [resolvable:$true] %s504_s4 }
  0xe3   :  { %v242_v39 = vmax.f32 %v164_v38, 0.0  ;;  %v606_v40 = vpop.f32.mrb[2].mxu0  ;;  %s700_s24 = scalar_lea.vmem %s505_s4, 2048  ;;  %p705_p1 = scmp.lt.s32.totalorder %s505_s4, %s505_s4 }
  0xe4   :  { %v179_v42 = vadd.f32 %v606_v40, %v515_v34  ;;  %v173_v43 = vpop.f32.mrb[3].mxu0  ;;  %p701_p0 = scmp.ne.s32.totalorder %s505_s4, %s700_s24  ;;  %p706_p2 = scmp.lt.s32.totalorder %s700_s24, %s700_s24 }
  0xe5   :  { %v174_v44 = vadd.f32 %v515_v34, %v173_v43  ;;  %641 = vmatprep.mubr.msk.f32.mxu0 %vm273_vm1, %v242_v39 }
  0xe6   :  { %642 = vmatmul.mubr.msk.f32.vlgmr.msra.gmra.mrb[16].mxu0 %vm273_vm1, %v243_v41  ;;  %v245_v47 = vmax.f32 %v179_v42, 0.0  ;;  %p707_p3 = por %p706_p2, %p705_p1 }
  0xe7   :  { %v244_v45 = vmax.f32 %v174_v44, 0.0  ;;  %v609_v46 = vpop.f32.mrb[4].mxu0 }
  0xe8   :  { %v189_v48 = vadd.f32 %v609_v46, %v515_v34  ;;  %v183_v49 = vpop.f32.mrb[5].mxu0  ;;  %p708_p4 = pnand %p707_p3, %p701_p0 }
  0xe9   :  { %v184_v50 = vadd.f32 %v515_v34, %v183_v49  ;;  %644 = vmatprep.mubr.msk.f32.mxu1 %vm273_vm1, %v244_v45 }
  0xea   :  { %645 = vmatmul.mubr.msk.f32.vlgmr.msra.gmra.mrb[0].mxu1 %vm273_vm1, %v245_v47  ;;  %v247_v53 = vmax.f32 %v189_v48, 0.0 }
  0xeb   :  { %v246_v51 = vmax.f32 %v184_v50, 0.0  ;;  %v612_v52 = vpop.f32.mrb[6].mxu0 }
  0xec   :  { %v199_v54 = vadd.f32 %v612_v52, %v515_v34  ;;  %v193_v55 = vpop.f32.mrb[7].mxu0 }
  0xed   :  { %v194_v56 = vadd.f32 %v515_v34, %v193_v55  ;;  %647 = vmatprep.mubr.msk.f32.mxu1 %vm273_vm1, %v246_v51 }
  0xee   :  { %648 = vmatmul.mubr.msk.f32.gmra.mrb[2].mxu1 %vm273_vm1, %v247_v53  ;;  %v249_v59 = vmax.f32 %v199_v54, 0.0 }
  0xef   :  { %v248_v57 = vmax.f32 %v194_v56, 0.0  ;;  %v615_v58 = vpop.f32.mrb[8].mxu0 }
  0xf0   :  { %v209_v60 = vadd.f32 %v615_v58, %v515_v34  ;;  %v203_v61 = vpop.f32.mrb[9].mxu0 }
  0xf1   :  { %v204_v62 = vadd.f32 %v515_v34, %v203_v61  ;;  %650 = vmatprep.mubr.msk.f32.mxu1 %vm273_vm1, %v248_v57 }
  0xf2   :  { %651 = vmatmul.mubr.msk.f32.gmra.mrb[4].mxu1 %vm273_vm1, %v249_v59  ;;  %v251_v1 = vmax.f32 %v209_v60, 0.0 }
  0xf3   :  { %v250_v63 = vmax.f32 %v204_v62, 0.0  ;;  %v618_v0 = vpop.f32.mrb[10].mxu0 }
  0xf4   :  { %v219_v2 = vadd.f32 %v618_v0, %v515_v34  ;;  %v213_v3 = vpop.f32.mrb[11].mxu0 }
  0xf5   :  { %v214_v4 = vadd.f32 %v515_v34, %v213_v3  ;;  %653 = vmatprep.mubr.msk.f32.mxu1 %vm273_vm1, %v250_v63 }
  0xf6   :  { %654 = vmatmul.mubr.msk.f32.gmra.mrb[6].mxu1 %vm273_vm1, %v251_v1  ;;  %v253_v8 = vmax.f32 %v219_v2, 0.0 }
  0xf7   :  { %v252_v6 = vmax.f32 %v214_v4, 0.0  ;;  %v621_v7 = vpop.f32.mrb[12].mxu0 }
  0xf8   :  { %v229_v9 = vadd.f32 %v621_v7, %v515_v34  ;;  %v223_v10 = vpop.f32.mrb[13].mxu0 }
  0xf9   :  { %v224_v12 = vadd.f32 %v515_v34, %v223_v10  ;;  %656 = vmatprep.mubr.msk.f32.mxu1 %vm273_vm1, %v252_v6 }
  0xfa   :  { %657 = vmatmul.mubr.msk.f32.gmra.mrb[8].mxu1 %vm273_vm1, %v253_v8  ;;  %v255_v16 = vmax.f32 %v229_v9, 0.0 }
  0xfb   :  { %v254_v14 = vmax.f32 %v224_v12, 0.0  ;;  %v624_v15 = vpop.f32.mrb[14].mxu0 }
  0xfc   :  { %v239_v19 = vadd.f32 %v624_v15, %v515_v34  ;;  %v233_v31 = vpop.f32.mrb[15].mxu0 }
  0xfd   :  { %v234_v32 = vadd.f32 %v515_v34, %v233_v31  ;;  %659 = vmatprep.mubr.msk.f32.mxu1 %vm273_vm1, %v254_v14 }
  0xfe   :  { %660 = vmatmul.mubr.msk.f32.gmra.mrb[10].mxu1 %vm273_vm1, %v255_v16  ;;  %v257_v35 = vmax.f32 %v239_v19, 0.0 }
  0xff   :  { %v256_v33 = vmax.f32 %v234_v32, 0.0 }
 0x101   :  { %662 = vmatprep.mubr.msk.f32.mxu1 %vm273_vm1, %v256_v33 }
 0x102   :  { %663 = vmatmul.mubr.msk.f32.gmra.mrb[12].mxu1 %vm273_vm1, %v257_v35 }
 0x1b9   :  { %v643_v37 = vpop.f32.mrb[16].mxu0 }
 0x1ba   :  { %v394_v38 = vadd.f32 %v643_v37, %v532_v36  ;;  %v388_v39 = vpop.f32.mrb[17].mxu0 }
 0x1bb   :  { %v389_v40 = vadd.f32 %v532_v36, %v388_v39 }
 0x1bc   :  { %v468_v34 = vadd.f32 %v394_v38, %v791_v11 }
 0x1bd   :  { %v467_v41 = vadd.f32 %v389_v40, %v772_v5  ;;  %v646_v42 = vpop.f32.mrb[0].mxu1 }
 0x1be   :  { %484 = vst.msk [vmem:[#allocation2 + $0x8] sm:$0xff] %vm48_vm0, %v468_v34  ;;  %v404_v43 = vadd.f32 %v646_v42, %v532_v36  ;;  %v398_v44 = vpop.f32.mrb[1].mxu1 }
 0x1bf   :  { %483 = vst.msk [vmem:[#allocation2] sm:$0xff] %vm48_vm0, %v467_v41  ;;  %v399_v45 = vadd.f32 %v532_v36, %v398_v44 }
 0x1c0   :  { %v470_v46 = vadd.f32 %v404_v43, %v811_v17 }
 0x1c1   :  { %v469_v47 = vadd.f32 %v399_v45, %v796_v13  ;;  %v649_v48 = vpop.f32.mrb[2].mxu1 }
 0x1c2   :  { %486 = vst.msk [vmem:[#allocation2 + $0x18] sm:$0xff] %vm48_vm0, %v470_v46  ;;  %v414_v49 = vadd.f32 %v649_v48, %v532_v36  ;;  %v408_v50 = vpop.f32.mrb[3].mxu1 }
 0x1c3   :  { %485 = vst.msk [vmem:[#allocation2 + $0x10] sm:$0xff] %vm48_vm0, %v469_v47  ;;  %v409_v5 = vadd.f32 %v532_v36, %v408_v50 }
 0x1c4   :  { %v472_v11 = vadd.f32 %v414_v49, %v825_v20 }
 0x1c5   :  { %v471_v51 = vadd.f32 %v409_v5, %v816_v18  ;;  %v652_v52 = vpop.f32.mrb[4].mxu1 }
 0x1c6   :  { %488 = vst.msk [vmem:[#allocation2 + $0x28] sm:$0xff] %vm48_vm0, %v472_v11  ;;  %v424_v53 = vadd.f32 %v652_v52, %v532_v36  ;;  %v418_v54 = vpop.f32.mrb[5].mxu1 }
 0x1c7   :  { %487 = vst.msk [vmem:[#allocation2 + $0x20] sm:$0xff] %vm48_vm0, %v471_v51  ;;  %v419_v13 = vadd.f32 %v532_v36, %v418_v54 }
 0x1c8   :  { %v474_v17 = vadd.f32 %v424_v53, %v839_v22 }
 0x1c9   :  { %v473_v55 = vadd.f32 %v419_v13, %v830_v21  ;;  %v655_v56 = vpop.f32.mrb[6].mxu1 }
 0x1ca   :  { %490 = vst.msk [vmem:[#allocation2 + $0x38] sm:$0xff] %vm48_vm0, %v474_v17  ;;  %v434_v57 = vadd.f32 %v655_v56, %v532_v36  ;;  %v428_v58 = vpop.f32.mrb[7].mxu1 }
 0x1cb   :  { %489 = vst.msk [vmem:[#allocation2 + $0x30] sm:$0xff] %vm48_vm0, %v473_v55  ;;  %v429_v18 = vadd.f32 %v532_v36, %v428_v58 }
 0x1cc   :  { %v476_v20 = vadd.f32 %v434_v57, %v853_v24 }
 0x1cd   :  { %v475_v59 = vadd.f32 %v429_v18, %v844_v23  ;;  %v658_v60 = vpop.f32.mrb[8].mxu1 }
 0x1ce   :  { %492 = vst.msk [vmem:[#allocation2 + $0x48] sm:$0xff] %vm48_vm0, %v476_v20  ;;  %v444_v61 = vadd.f32 %v658_v60, %v532_v36  ;;  %v438_v62 = vpop.f32.mrb[9].mxu1 }
 0x1cf   :  { %491 = vst.msk [vmem:[#allocation2 + $0x40] sm:$0xff] %vm48_vm0, %v475_v59  ;;  %v439_v21 = vadd.f32 %v532_v36, %v438_v62 }
 0x1d0   :  { %v478_v22 = vadd.f32 %v444_v61, %v867_v26 }
 0x1d1   :  { %v477_v63 = vadd.f32 %v439_v21, %v858_v25  ;;  %v661_v0 = vpop.f32.mrb[10].mxu1 }
 0x1d2   :  { %494 = vst.msk [vmem:[#allocation2 + $0x58] sm:$0xff] %vm48_vm0, %v478_v22  ;;  %v454_v1 = vadd.f32 %v661_v0, %v532_v36  ;;  %v448_v2 = vpop.f32.mrb[11].mxu1 }
 0x1d3   :  { %493 = vst.msk [vmem:[#allocation2 + $0x50] sm:$0xff] %vm48_vm0, %v477_v63  ;;  %v449_v23 = vadd.f32 %v532_v36, %v448_v2 }
 0x1d4   :  { %v480_v24 = vadd.f32 %v454_v1, %v881_v28 }
 0x1d5   :  { %v479_v3 = vadd.f32 %v449_v23, %v872_v27  ;;  %v664_v4 = vpop.f32.mrb[12].mxu1 }
 0x1d6   :  { %496 = vst.msk [vmem:[#allocation2 + $0x68] sm:$0xff] %vm48_vm0, %v480_v24  ;;  %v464_v26 = vadd.f32 %v664_v4, %v532_v36  ;;  %v458_v6 = vpop.f32.mrb[13].mxu1 }
 0x1d7   :  { %495 = vst.msk [vmem:[#allocation2 + $0x60] sm:$0xff] %vm48_vm0, %v479_v3  ;;  %v459_v25 = vadd.f32 %v532_v36, %v458_v6 }
 0x1d8   :  { %v482_v7 = vadd.f32 %v464_v26, %v895_v30 }
 0x1d9   :  { %v481_v8 = vadd.f32 %v459_v25, %v886_v29 }
 0x1da   :  { %498 = vst.msk [vmem:[#allocation2 + $0x78] sm:$0xff] %vm48_vm0, %v482_v7 }
 0x1db   :  { %497 = vst.msk [vmem:[#allocation2 + $0x70] sm:$0xff] %vm48_vm0, %v481_v8 }
 0x1dc   :  { %711 = shalt.err (!%p708_p4)
}
 0x1dd   :  { %s712_s27 = scalar_lea.hbm %s976_s5, 2048 }
 0x1de   :  { %p713_p5 = scmp.ne.s32.totalorder %s976_s5, %s712_s27  ;;  %p716_p6 = scmp.lt.u32.totalorder %s712_s27, %s976_s5 }
 0x1e0   :  { %p718_p7 = pnand %p716_p6, %p713_p5 }
 0x1e2   :  { %721 = shalt.err (!%p718_p7)
}
 0x1e3   :  { %s725_s1 = smov 128   ;;  %s726_s7 = smov 8  }
 0x1e4   :  { %510 = dma.vmem_to_hbm [thread:$0]  %s505_s4, 2048, %s976_s5, [#allocation3], %s725_s1, %s725_s1, %s726_s7  }
 0x1e5   :  { %722 = dma.done.wait [#allocation3], 2048  }
 0x1e6   :  { %723 = vsyncadd [#allocation3], 4294965248 }
 0x1e7   :  { %514 = vsyncpa [#allocation3], 1 }

</bundles_post_ra>
